<compile_context>
chip_gen: v6e
topology: v6e:2x2x1
jax: 0.10.0
libtpu: 0.0.40
codegen_flags: <defaults>
</compile_context>

<pallas_src>
import numpy as np
import jax
import jax.numpy as jnp
from jax.experimental import pallas as pl
from jax.experimental.pallas import tpu as pltpu


# -----------------------------------------------------------------------------
# Weight-slab layout: every parameter lives in ONE lane-padded f32 slab so the
# kernel has exactly 3 inputs (enc, tgt, slab).  Each section starts on an
# 8-row (sublane) boundary so the in-kernel reads are aligned static slices.
# Lane width of the slab = 4*H (the widest tensor, the fused LSTM weight).
# -----------------------------------------------------------------------------
def _slab_layout(M, H):
    rows = {
        "whh":  H,   # (H, 4H)  LSTM hidden->gates, fused [i|f|g|o] (whh^T)
        "wih":  1,   # (1, 4H)  LSTM input->gates (input size 1)
        "bias": 1,   # (1, 4H)  bih + bhh + bc*wih   (concat_layer bias folded in)
        "w1h":  H,   # (H, M)   attn_layer1 weight^T, hidden half
        "w1c":  H,   # (H, M)   attn_layer1 weight^T, cell half
        "b1":   1,   # (1, M)
        "w2t":  M,   # (M, M)   attn_layer2 weight^T
        "b2":   1,   # (1, M)
        "w3":   1,   # (1, M)   attn_layer3 weight (bias dropped: softmax-invariant)
        "wcx":  1,   # (1, M)   concat_layer weight, context half (as a row)
        "wct":  1,   # (1, 1)   concat_layer weight, target half (scalar)
        "wf1h": H,   # (H, H)   fc_layer1 weight^T, hidden half
        "wf1m": M,   # (M, H)   fc_layer1 weight^T, context half
        "bf1":  1,   # (1, H)
        "wf2":  H,   # (H, 1)   fc_layer2 weight^T
        "bf2":  1,   # (1, 1)
    }
    offs, r = {}, 0
    for name, n in rows.items():
        offs[name] = r
        r = -(-(r + n) // 8) * 8          # next section starts 8-aligned
    return offs, r


# -----------------------------------------------------------------------------
# Parameter preparation (outside jit): transpose / split / fold / pack once.
# -----------------------------------------------------------------------------
def prepare_params(p, hidden_dim):
    H = hidden_dim
    M = int(np.asarray(p["w2"]).shape[0])
    assert 4 * H >= max(M, H), "slab lane width must cover the widest tensor"
    lanes = 4 * H
    offs, total = _slab_layout(M, H)
    slab = np.zeros((total, lanes), np.float32)

    def put(name, arr):
        arr = np.asarray(arr, np.float32)
        r, c = arr.shape
        o = offs[name]
        slab[o:o + r, :c] = arr

    w1t  = np.asarray(p["w1"], np.float32).T               # (2H, M)
    wc   = np.asarray(p["wc"], np.float32)                 # (1, M+1): [target | context]
    wf1t = np.asarray(p["wf1"], np.float32).T              # (H+M, H): [hidden | context]
    wih  = np.asarray(p["wih"], np.float32).reshape(-1)    # (4H,) gate order i,f,g,o
    bc   = np.asarray(p["bc"], np.float32).reshape(-1)     # (1,)
    # Exact fold of the concat_layer bias into the LSTM bias: pre = (y0+bc)*wih + b
    bias = (np.asarray(p["bih"], np.float32)
            + np.asarray(p["bhh"], np.float32)
            + bc * wih)                                    # (4H,)

    put("whh",  np.asarray(p["whh"], np.float32).T)        # (H, 4H)
    put("wih",  wih.reshape(1, -1))
    put("bias", bias.reshape(1, -1))
    put("w1h",  w1t[:H])
    put("w1c",  w1t[H:])
    put("b1",   np.asarray(p["b1"], np.float32).reshape(1, M))
    put("w2t",  np.asarray(p["w2"], np.float32).T)
    put("b2",   np.asarray(p["b2"], np.float32).reshape(1, M))
    put("w3",   np.asarray(p["w3"], np.float32).reshape(1, M))
    put("wcx",  wc[:, 1:].reshape(1, M))                   # context half
    put("wct",  wc[:, 0:1].reshape(1, 1))                  # target half (scalar)
    put("wf1h", wf1t[:H])
    put("wf1m", wf1t[H:])
    put("bf1",  np.asarray(p["bf1"], np.float32).reshape(1, H))
    put("wf2",  np.asarray(p["wf2"], np.float32).T)        # (H, 1)
    put("bf2",  np.asarray(p["bf2"], np.float32).reshape(1, 1))
    return jnp.asarray(slab)


# -----------------------------------------------------------------------------
# Pallas kernel: the whole decode (all T timesteps) in one invocation, no grid.
# -----------------------------------------------------------------------------
def decoder_kernel(enc_ref, tgt_ref, slab_ref, out_ref):
    f32 = jnp.float32
    B, T, M = enc_ref.shape
    H = slab_ref.shape[1] // 4
    offs, _ = _slab_layout(M, H)

    def wread(name, r, c):
        o = offs[name]
        return slab_ref[o:o + r, 0:c]

    # ---- weight reads hoisted before the unrolled loop (one vld each) --------
    whh  = wread("whh",  H, 4 * H)                 # (H, 4H)  fused [i|f|g|o]
    wih  = wread("wih",  1, 4 * H)                 # (1, 4H)
    bias = wread("bias", 1, 4 * H)                 # (1, 4H)  (bc folded in)
    w1h  = wread("w1h",  H, M)                     # (H, M)
    w1c  = wread("w1c",  H, M)                     # (H, M)
    b1   = wread("b1",   1, M)                     # (1, M)
    w3v  = wread("w3",   1, M).reshape(1, 1, M)    # (1, 1, M)
    wcxv = wread("wcx",  1, M).reshape(1, 1, M)    # (1, 1, M)
    wct  = wread("wct",  1, 1)                     # (1, 1)

    enc = enc_ref[...]                             # (B, T, M)
    tgt = tgt_ref[...] * wct                       # (B, T), pre-scaled by wc_t
    enc2d = enc.reshape(B * T, M)

    # ---- loop-invariant prologue ---------------------------------------------
    # attn_layer2(encoded_hidden), computed once.
    s2 = (jnp.dot(enc2d, wread("w2t", M, M), preferred_element_type=f32)
          + wread("b2", 1, M)).reshape(B, T, M)
    # Hoisted context projection: enc @ wc_ctx  -> (B, T)
    enc_wc = jnp.sum(enc * wcxv, axis=-1)

    def attention_beta(h, c):
        # attn_layer1([h; c]) without a lane concat: split-weight dots.
        s1 = (jnp.dot(h, w1h, preferred_element_type=f32)
              + jnp.dot(c, w1c, preferred_element_type=f32) + b1)      # (B, M)
        combined = jnp.tanh(s1[:, None, :] + s2)                       # (B, T, M)
        scores = jnp.sum(combined * w3v, axis=-1)                      # (B, T)
        # Softmax over sequence axis (batch_size > 1 branch of the module).
        mx = jnp.max(scores, axis=1, keepdims=True)
        ex = jnp.exp(scores - mx)
        return ex * pl.reciprocal(jnp.sum(ex, axis=1, keepdims=True), approx=True)

    h = jnp.zeros((B, H), f32)
    c = jnp.zeros((B, H), f32)

    # T-1 LSTM steps (module skips the state update at t == T-1).  Static Python
    # unroll: T is small & static, t stays a compile-time constant.
    for t in range(T - 1):
        beta = attention_beta(h, c)
        # concat_layer([target_t, context]) with the context projection hoisted:
        #   y0 = target_t*wc_t + beta . (enc @ wc_ctx)       (bc folded into bias)
        y = tgt[:, t:t + 1] + jnp.sum(beta * enc_wc, axis=1, keepdims=True)  # (B,1)
        # dropout -> identity (inference)

        # One fused MXU matmul for all four gates + 2 EUP passes.
        pre = y * wih + bias + jnp.dot(h, whh, preferred_element_type=f32)   # (B,4H)
        sig = jax.nn.sigmoid(pre)                         # i, f, o (one EUP pass)
        g_g = jnp.tanh(pre[:, 2 * H:3 * H])               # g        (one EUP pass)
        c = sig[:, H:2 * H] * c + sig[:, 0:H] * g_g
        h = sig[:, 3 * H:4 * H] * jnp.tanh(c)

    # Final attention (t = T-1): the only place the full (B, M) context is needed.
    beta = attention_beta(h, c)
    context = jnp.sum(beta[:, :, None] * enc, axis=1)                        # (B, M)
    hid = (jnp.dot(h, wread("wf1h", H, H), preferred_element_type=f32)
           + jnp.dot(context, wread("wf1m", M, H), preferred_element_type=f32)
           + wread("bf1", 1, H))                                             # (B, H)
    out_ref[...] = (jnp.dot(hid, wread("wf2", H, 1), preferred_element_type=f32)
                    + wread("bf2", 1, 1))


# -----------------------------------------------------------------------------
# Wrapper: single pallas_call, no grid, 3 inputs total.
# -----------------------------------------------------------------------------
@jax.jit
def attention_decoder_forward(enc, tgt, slab):
    B = enc.shape[0]
    f32 = jnp.float32
    vmem = pl.BlockSpec(memory_space=pltpu.MemorySpace.VMEM)
    return pl.pallas_call(
        decoder_kernel,
        out_shape=jax.ShapeDtypeStruct((B, 1), f32),
        in_specs=[vmem, vmem, vmem],
        out_specs=vmem,
    )(enc.astype(f32), tgt.astype(f32), slab)


# -----------------------------------------------------------------------------
# Pure-JAX reference (mirrors the PyTorch forward, dropout = identity).
# -----------------------------------------------------------------------------
def reference_forward(enc, tgt, p, hidden_dim):
    B, T, M = enc.shape
    H = hidden_dim
    h = jnp.zeros((B, H), jnp.float32)
    c = jnp.zeros((B, H), jnp.float32)
    ctx = jnp.zeros((B, M), jnp.float32)
    for t in range(T):
        hc = jnp.concatenate([h, c], axis=1)
        s1 = hc @ p["w1"].T + p["b1"]                              # (B, M)
        s2 = enc @ p["w2"].T + p["b2"]                             # (B, T, M)
        comb = jnp.tanh(s1[:, None, :] + s2)
        scores = (comb @ p["w3"].T)[..., 0] + p["b3"][0]           # (B, T)
        beta = jax.nn.softmax(scores, axis=1)
        ctx = jnp.einsum("bt,btm->bm", beta, enc)
        if t < T - 1:
            target_t = tgt[:, t:t + 1]
            ci = jnp.concatenate([target_t, ctx], axis=1)
            y = ci @ p["wc"].T + p["bc"]                           # (B, 1)
            gates = y @ p["wih"].T + p["bih"] + h @ p["whh"].T + p["bhh"]
            i_g = jax.nn.sigmoid(gates[:, :H])
            f_g = jax.nn.sigmoid(gates[:, H:2 * H])
            g_g = jnp.tanh(gates[:, 2 * H:3 * H])
            o_g = jax.nn.sigmoid(gates[:, 3 * H:4 * H])
            c = f_g * c + i_g * g_g
            h = o_g * jnp.tanh(c)
    feat = jnp.concatenate([h, ctx], axis=1)
    hid = feat @ p["wf1"].T + p["bf1"]
    return hid @ p["wf2"].T + p["bf2"]


if __name__ == "__main__":
    B, T, M, H = 4, 8, 16, 32    # batch, sequence_length, encoded_hidden_dim, hidden_dim

    key = jax.random.PRNGKey(0)
    ks = jax.random.split(key, 18)

    def rnd(k, shape, scale=0.1):
        return (scale * jax.random.normal(k, shape)).astype(jnp.float32)

    params = {
        "w1": rnd(ks[0], (M, 2 * H)),   "b1": rnd(ks[1], (M,)),
        "w2": rnd(ks[2], (M, M)),       "b2": rnd(ks[3], (M,)),
        "w3": rnd(ks[4], (1, M)),       "b3": rnd(ks[5], (1,)),
        "wc": rnd(ks[6], (1, M + 1)),   "bc": rnd(ks[7], (1,)),
        "wih": rnd(ks[8], (4 * H, 1)),  "whh": rnd(ks[9], (4 * H, H)),
        "bih": rnd(ks[10], (4 * H,)),   "bhh": rnd(ks[11], (4 * H,)),
        "wf1": rnd(ks[12], (H, M + H)), "bf1": rnd(ks[13], (H,)),
        "wf2": rnd(ks[14], (1, H)),     "bf2": rnd(ks[15], (1,)),
    }
    encoded_hidden = rnd(ks[16], (B, T, M), scale=1.0)
    target_sequence = rnd(ks[17], (B, T), scale=1.0)

    weight_slab = prepare_params(params, H)
    out = attention_decoder_forward(encoded_hidden, target_sequence, weight_slab)
    out = jax.block_until_ready(out)

    ref = reference_forward(encoded_hidden, target_sequence, params, H)
    np.testing.assert_allclose(np.asarray(out), np.asarray(ref),
                               rtol=1e-2, atol=1e-3)
    print("KERNEL_OK")
</pallas_src>

<mosaic_0001>
module attributes {stable_mosaic.version = 11 : i64} {
  func.func @decoder_kernel(%arg0: memref<4x8x16xf32, #tpu.memory_space<vmem>>, %arg1: memref<4x8xf32, #tpu.memory_space<vmem>>, %arg2: memref<264x128xf32, #tpu.memory_space<vmem>>, %arg3: memref<4x1xf32, #tpu.memory_space<vmem>>) attributes {dimension_semantics = [], scalar_prefetch = 0 : i64, scratch_operands = 0 : i64, tpu.core_type = #tpu.core_type<tc>} {
    %c0 = arith.constant 0 : index
    %c0_0 = arith.constant 0 : index
    %0 = vector.load %arg2[%c0, %c0_0] : memref<264x128xf32, #tpu.memory_space<vmem>>, vector<32x128xf32>
    %c32 = arith.constant 32 : index
    %c0_1 = arith.constant 0 : index
    %1 = vector.load %arg2[%c32, %c0_1] : memref<264x128xf32, #tpu.memory_space<vmem>>, vector<1x128xf32>
    %c40 = arith.constant 40 : index
    %c0_2 = arith.constant 0 : index
    %2 = vector.load %arg2[%c40, %c0_2] : memref<264x128xf32, #tpu.memory_space<vmem>>, vector<1x128xf32>
    %c48 = arith.constant 48 : index
    %c0_3 = arith.constant 0 : index
    %3 = vector.load %arg2[%c48, %c0_3] : memref<264x128xf32, #tpu.memory_space<vmem>>, vector<32x16xf32>
    %c80 = arith.constant 80 : index
    %c0_4 = arith.constant 0 : index
    %4 = vector.load %arg2[%c80, %c0_4] : memref<264x128xf32, #tpu.memory_space<vmem>>, vector<32x16xf32>
    %c112 = arith.constant 112 : index
    %c0_5 = arith.constant 0 : index
    %5 = vector.load %arg2[%c112, %c0_5] : memref<264x128xf32, #tpu.memory_space<vmem>>, vector<1x16xf32>
    %c144 = arith.constant 144 : index
    %c0_6 = arith.constant 0 : index
    %6 = vector.load %arg2[%c144, %c0_6] : memref<264x128xf32, #tpu.memory_space<vmem>>, vector<1x16xf32>
    %7 = vector.shape_cast %6 : vector<1x16xf32> to vector<1x1x16xf32>
    %c152 = arith.constant 152 : index
    %c0_7 = arith.constant 0 : index
    %8 = vector.load %arg2[%c152, %c0_7] : memref<264x128xf32, #tpu.memory_space<vmem>>, vector<1x16xf32>
    %9 = vector.shape_cast %8 : vector<1x16xf32> to vector<1x1x16xf32>
    %c160 = arith.constant 160 : index
    %c0_8 = arith.constant 0 : index
    %10 = vector.load %arg2[%c160, %c0_8] : memref<264x128xf32, #tpu.memory_space<vmem>>, vector<1x1xf32>
    %c0_9 = arith.constant 0 : index
    %c0_10 = arith.constant 0 : index
    %c0_11 = arith.constant 0 : index
    %11 = vector.load %arg0[%c0_9, %c0_10, %c0_11] : memref<4x8x16xf32, #tpu.memory_space<vmem>>, vector<4x8x16xf32>
    %c0_12 = arith.constant 0 : index
    %c0_13 = arith.constant 0 : index
    %12 = vector.load %arg1[%c0_12, %c0_13] : memref<4x8xf32, #tpu.memory_space<vmem>>, vector<4x8xf32>
    %13 = vector.broadcast %10 : vector<1x1xf32> to vector<4x8xf32>
    %14 = arith.mulf %12, %13 : vector<4x8xf32>
    %15 = vector.shape_cast %11 : vector<4x8x16xf32> to vector<32x16xf32>
    %c120 = arith.constant 120 : index
    %c0_14 = arith.constant 0 : index
    %16 = vector.load %arg2[%c120, %c0_14] : memref<264x128xf32, #tpu.memory_space<vmem>>, vector<16x16xf32>
    %cst = arith.constant dense<0.000000e+00> : vector<32x16xf32>
    %17 = tpu.matmul %15, %16, %cst {dimension_numbers = #tpu.dot_dimension_numbers<[1], [0], [0], [1], [0, 0, 1, 1], [], []>} : vector<32x16xf32>, vector<16x16xf32>, vector<32x16xf32> -> vector<32x16xf32>
    %c136 = arith.constant 136 : index
    %c0_15 = arith.constant 0 : index
    %18 = vector.load %arg2[%c136, %c0_15] : memref<264x128xf32, #tpu.memory_space<vmem>>, vector<1x16xf32>
    %19 = vector.broadcast %18 : vector<1x16xf32> to vector<32x16xf32>
    %20 = arith.addf %17, %19 : vector<32x16xf32>
    %21 = vector.shape_cast %20 : vector<32x16xf32> to vector<4x8x16xf32>
    %22 = vector.broadcast %9 : vector<1x1x16xf32> to vector<4x8x16xf32>
    %23 = arith.mulf %11, %22 : vector<4x8x16xf32>
    %cst_16 = arith.constant dense<0.000000e+00> : vector<4x8xf32>
    %24 = vector.multi_reduction <add>, %23, %cst_16 [2] : vector<4x8x16xf32> to vector<4x8xf32>
    %cst_17 = arith.constant 0.000000e+00 : f32
    %25 = vector.broadcast %cst_17 : f32 to vector<4x32xf32>
    %cst_18 = arith.constant 0.000000e+00 : f32
    %26 = vector.broadcast %cst_18 : f32 to vector<4x32xf32>
    %cst_19 = arith.constant dense<0.000000e+00> : vector<4x16xf32>
    %27 = tpu.matmul %25, %3, %cst_19 {dimension_numbers = #tpu.dot_dimension_numbers<[1], [0], [0], [1], [0, 0, 1, 1], [], []>} : vector<4x32xf32>, vector<32x16xf32>, vector<4x16xf32> -> vector<4x16xf32>
    %cst_20 = arith.constant dense<0.000000e+00> : vector<4x16xf32>
    %28 = tpu.matmul %26, %4, %cst_20 {dimension_numbers = #tpu.dot_dimension_numbers<[1], [0], [0], [1], [0, 0, 1, 1], [], []>} : vector<4x32xf32>, vector<32x16xf32>, vector<4x16xf32> -> vector<4x16xf32>
    %29 = arith.addf %27, %28 : vector<4x16xf32>
    %30 = vector.broadcast %5 : vector<1x16xf32> to vector<4x16xf32>
    %31 = arith.addf %29, %30 : vector<4x16xf32>
    %32 = vector.shape_cast %31 : vector<4x16xf32> to vector<4x1x16xf32>
    %33 = vector.broadcast %32 : vector<4x1x16xf32> to vector<4x8x16xf32>
    %34 = arith.addf %33, %21 : vector<4x8x16xf32>
    %35 = math.tanh %34 : vector<4x8x16xf32>
    %36 = vector.broadcast %7 : vector<1x1x16xf32> to vector<4x8x16xf32>
    %37 = arith.mulf %35, %36 : vector<4x8x16xf32>
    %cst_21 = arith.constant dense<0.000000e+00> : vector<4x8xf32>
    %38 = vector.multi_reduction <add>, %37, %cst_21 [2] : vector<4x8x16xf32> to vector<4x8xf32>
    %cst_22 = arith.constant dense<0xFF800000> : vector<4xf32>
    %39 = vector.multi_reduction <maximumf>, %38, %cst_22 [1] : vector<4x8xf32> to vector<4xf32>
    %40 = vector.shape_cast %39 : vector<4xf32> to vector<4x1xf32>
    %41 = vector.broadcast %40 : vector<4x1xf32> to vector<4x8xf32>
    %42 = arith.subf %38, %41 : vector<4x8xf32>
    %43 = math.exp %42 : vector<4x8xf32>
    %cst_23 = arith.constant dense<0.000000e+00> : vector<4xf32>
    %44 = vector.multi_reduction <add>, %43, %cst_23 [1] : vector<4x8xf32> to vector<4xf32>
    %45 = vector.shape_cast %44 : vector<4xf32> to vector<4x1xf32>
    %46 = tpu.reciprocal %45 {approx = true} : vector<4x1xf32> -> vector<4x1xf32>
    %47 = vector.broadcast %46 : vector<4x1xf32> to vector<4x8xf32>
    %48 = arith.mulf %43, %47 : vector<4x8xf32>
    %49 = vector.extract_strided_slice %14 {offsets = [0, 0], sizes = [4, 1], strides = [1, 1]} : vector<4x8xf32> to vector<4x1xf32>
    %50 = arith.mulf %48, %24 : vector<4x8xf32>
    %cst_24 = arith.constant dense<0.000000e+00> : vector<4xf32>
    %51 = vector.multi_reduction <add>, %50, %cst_24 [1] : vector<4x8xf32> to vector<4xf32>
    %52 = vector.shape_cast %51 : vector<4xf32> to vector<4x1xf32>
    %53 = arith.addf %49, %52 : vector<4x1xf32>
    %54 = vector.broadcast %53 : vector<4x1xf32> to vector<4x128xf32>
    %55 = vector.broadcast %1 : vector<1x128xf32> to vector<4x128xf32>
    %56 = arith.mulf %54, %55 : vector<4x128xf32>
    %57 = vector.broadcast %2 : vector<1x128xf32> to vector<4x128xf32>
    %58 = arith.addf %56, %57 : vector<4x128xf32>
    %cst_25 = arith.constant dense<0.000000e+00> : vector<4x128xf32>
    %59 = tpu.matmul %25, %0, %cst_25 {dimension_numbers = #tpu.dot_dimension_numbers<[1], [0], [0], [1], [0, 0, 1, 1], [], []>} : vector<4x32xf32>, vector<32x128xf32>, vector<4x128xf32> -> vector<4x128xf32>
    %60 = arith.addf %58, %59 : vector<4x128xf32>
    %61 = arith.negf %60 : vector<4x128xf32>
    %62 = math.exp %61 : vector<4x128xf32>
    %cst_26 = arith.constant 1.000000e+00 : f32
    %63 = vector.broadcast %cst_26 : f32 to vector<4x128xf32>
    %64 = arith.addf %63, %62 : vector<4x128xf32>
    %65 = arith.divf %63, %64 : vector<4x128xf32>
    %66 = vector.extract_strided_slice %60 {offsets = [0, 64], sizes = [4, 32], strides = [1, 1]} : vector<4x128xf32> to vector<4x32xf32>
    %67 = math.tanh %66 : vector<4x32xf32>
    %68 = vector.extract_strided_slice %65 {offsets = [0, 32], sizes = [4, 32], strides = [1, 1]} : vector<4x128xf32> to vector<4x32xf32>
    %69 = arith.mulf %68, %26 : vector<4x32xf32>
    %70 = vector.extract_strided_slice %65 {offsets = [0, 0], sizes = [4, 32], strides = [1, 1]} : vector<4x128xf32> to vector<4x32xf32>
    %71 = arith.mulf %70, %67 : vector<4x32xf32>
    %72 = arith.addf %69, %71 : vector<4x32xf32>
    %73 = vector.extract_strided_slice %65 {offsets = [0, 96], sizes = [4, 32], strides = [1, 1]} : vector<4x128xf32> to vector<4x32xf32>
    %74 = math.tanh %72 : vector<4x32xf32>
    %75 = arith.mulf %73, %74 : vector<4x32xf32>
    %cst_27 = arith.constant dense<0.000000e+00> : vector<4x16xf32>
    %76 = tpu.matmul %75, %3, %cst_27 {dimension_numbers = #tpu.dot_dimension_numbers<[1], [0], [0], [1], [0, 0, 1, 1], [], []>} : vector<4x32xf32>, vector<32x16xf32>, vector<4x16xf32> -> vector<4x16xf32>
    %cst_28 = arith.constant dense<0.000000e+00> : vector<4x16xf32>
    %77 = tpu.matmul %72, %4, %cst_28 {dimension_numbers = #tpu.dot_dimension_numbers<[1], [0], [0], [1], [0, 0, 1, 1], [], []>} : vector<4x32xf32>, vector<32x16xf32>, vector<4x16xf32> -> vector<4x16xf32>
    %78 = arith.addf %76, %77 : vector<4x16xf32>
    %79 = vector.broadcast %5 : vector<1x16xf32> to vector<4x16xf32>
    %80 = arith.addf %78, %79 : vector<4x16xf32>
    %81 = vector.shape_cast %80 : vector<4x16xf32> to vector<4x1x16xf32>
    %82 = vector.broadcast %81 : vector<4x1x16xf32> to vector<4x8x16xf32>
    %83 = arith.addf %82, %21 : vector<4x8x16xf32>
    %84 = math.tanh %83 : vector<4x8x16xf32>
    %85 = vector.broadcast %7 : vector<1x1x16xf32> to vector<4x8x16xf32>
    %86 = arith.mulf %84, %85 : vector<4x8x16xf32>
    %cst_29 = arith.constant dense<0.000000e+00> : vector<4x8xf32>
    %87 = vector.multi_reduction <add>, %86, %cst_29 [2] : vector<4x8x16xf32> to vector<4x8xf32>
    %cst_30 = arith.constant dense<0xFF800000> : vector<4xf32>
    %88 = vector.multi_reduction <maximumf>, %87, %cst_30 [1] : vector<4x8xf32> to vector<4xf32>
    %89 = vector.shape_cast %88 : vector<4xf32> to vector<4x1xf32>
    %90 = vector.broadcast %89 : vector<4x1xf32> to vector<4x8xf32>
    %91 = arith.subf %87, %90 : vector<4x8xf32>
    %92 = math.exp %91 : vector<4x8xf32>
    %cst_31 = arith.constant dense<0.000000e+00> : vector<4xf32>
    %93 = vector.multi_reduction <add>, %92, %cst_31 [1] : vector<4x8xf32> to vector<4xf32>
    %94 = vector.shape_cast %93 : vector<4xf32> to vector<4x1xf32>
    %95 = tpu.reciprocal %94 {approx = true} : vector<4x1xf32> -> vector<4x1xf32>
    %96 = vector.broadcast %95 : vector<4x1xf32> to vector<4x8xf32>
    %97 = arith.mulf %92, %96 : vector<4x8xf32>
    %98 = vector.extract_strided_slice %14 {offsets = [0, 1], sizes = [4, 1], strides = [1, 1]} : vector<4x8xf32> to vector<4x1xf32>
    %99 = arith.mulf %97, %24 : vector<4x8xf32>
    %cst_32 = arith.constant dense<0.000000e+00> : vector<4xf32>
    %100 = vector.multi_reduction <add>, %99, %cst_32 [1] : vector<4x8xf32> to vector<4xf32>
    %101 = vector.shape_cast %100 : vector<4xf32> to vector<4x1xf32>
    %102 = arith.addf %98, %101 : vector<4x1xf32>
    %103 = vector.broadcast %102 : vector<4x1xf32> to vector<4x128xf32>
    %104 = vector.broadcast %1 : vector<1x128xf32> to vector<4x128xf32>
    %105 = arith.mulf %103, %104 : vector<4x128xf32>
    %106 = vector.broadcast %2 : vector<1x128xf32> to vector<4x128xf32>
    %107 = arith.addf %105, %106 : vector<4x128xf32>
    %cst_33 = arith.constant dense<0.000000e+00> : vector<4x128xf32>
    %108 = tpu.matmul %75, %0, %cst_33 {dimension_numbers = #tpu.dot_dimension_numbers<[1], [0], [0], [1], [0, 0, 1, 1], [], []>} : vector<4x32xf32>, vector<32x128xf32>, vector<4x128xf32> -> vector<4x128xf32>
    %109 = arith.addf %107, %108 : vector<4x128xf32>
    %110 = arith.negf %109 : vector<4x128xf32>
    %111 = math.exp %110 : vector<4x128xf32>
    %cst_34 = arith.constant 1.000000e+00 : f32
    %112 = vector.broadcast %cst_34 : f32 to vector<4x128xf32>
    %113 = arith.addf %112, %111 : vector<4x128xf32>
    %114 = arith.divf %112, %113 : vector<4x128xf32>
    %115 = vector.extract_strided_slice %109 {offsets = [0, 64], sizes = [4, 32], strides = [1, 1]} : vector<4x128xf32> to vector<4x32xf32>
    %116 = math.tanh %115 : vector<4x32xf32>
    %117 = vector.extract_strided_slice %114 {offsets = [0, 32], sizes = [4, 32], strides = [1, 1]} : vector<4x128xf32> to vector<4x32xf32>
    %118 = arith.mulf %117, %72 : vector<4x32xf32>
    %119 = vector.extract_strided_slice %114 {offsets = [0, 0], sizes = [4, 32], strides = [1, 1]} : vector<4x128xf32> to vector<4x32xf32>
    %120 = arith.mulf %119, %116 : vector<4x32xf32>
    %121 = arith.addf %118, %120 : vector<4x32xf32>
    %122 = vector.extract_strided_slice %114 {offsets = [0, 96], sizes = [4, 32], strides = [1, 1]} : vector<4x128xf32> to vector<4x32xf32>
    %123 = math.tanh %121 : vector<4x32xf32>
    %124 = arith.mulf %122, %123 : vector<4x32xf32>
    %cst_35 = arith.constant dense<0.000000e+00> : vector<4x16xf32>
    %125 = tpu.matmul %124, %3, %cst_35 {dimension_numbers = #tpu.dot_dimension_numbers<[1], [0], [0], [1], [0, 0, 1, 1], [], []>} : vector<4x32xf32>, vector<32x16xf32>, vector<4x16xf32> -> vector<4x16xf32>
    %cst_36 = arith.constant dense<0.000000e+00> : vector<4x16xf32>
    %126 = tpu.matmul %121, %4, %cst_36 {dimension_numbers = #tpu.dot_dimension_numbers<[1], [0], [0], [1], [0, 0, 1, 1], [], []>} : vector<4x32xf32>, vector<32x16xf32>, vector<4x16xf32> -> vector<4x16xf32>
    %127 = arith.addf %125, %126 : vector<4x16xf32>
    %128 = vector.broadcast %5 : vector<1x16xf32> to vector<4x16xf32>
    %129 = arith.addf %127, %128 : vector<4x16xf32>
    %130 = vector.shape_cast %129 : vector<4x16xf32> to vector<4x1x16xf32>
    %131 = vector.broadcast %130 : vector<4x1x16xf32> to vector<4x8x16xf32>
    %132 = arith.addf %131, %21 : vector<4x8x16xf32>
    %133 = math.tanh %132 : vector<4x8x16xf32>
    %134 = vector.broadcast %7 : vector<1x1x16xf32> to vector<4x8x16xf32>
    %135 = arith.mulf %133, %134 : vector<4x8x16xf32>
    %cst_37 = arith.constant dense<0.000000e+00> : vector<4x8xf32>
    %136 = vector.multi_reduction <add>, %135, %cst_37 [2] : vector<4x8x16xf32> to vector<4x8xf32>
    %cst_38 = arith.constant dense<0xFF800000> : vector<4xf32>
    %137 = vector.multi_reduction <maximumf>, %136, %cst_38 [1] : vector<4x8xf32> to vector<4xf32>
    %138 = vector.shape_cast %137 : vector<4xf32> to vector<4x1xf32>
    %139 = vector.broadcast %138 : vector<4x1xf32> to vector<4x8xf32>
    %140 = arith.subf %136, %139 : vector<4x8xf32>
    %141 = math.exp %140 : vector<4x8xf32>
    %cst_39 = arith.constant dense<0.000000e+00> : vector<4xf32>
    %142 = vector.multi_reduction <add>, %141, %cst_39 [1] : vector<4x8xf32> to vector<4xf32>
    %143 = vector.shape_cast %142 : vector<4xf32> to vector<4x1xf32>
    %144 = tpu.reciprocal %143 {approx = true} : vector<4x1xf32> -> vector<4x1xf32>
    %145 = vector.broadcast %144 : vector<4x1xf32> to vector<4x8xf32>
    %146 = arith.mulf %141, %145 : vector<4x8xf32>
    %147 = vector.extract_strided_slice %14 {offsets = [0, 2], sizes = [4, 1], strides = [1, 1]} : vector<4x8xf32> to vector<4x1xf32>
    %148 = arith.mulf %146, %24 : vector<4x8xf32>
    %cst_40 = arith.constant dense<0.000000e+00> : vector<4xf32>
    %149 = vector.multi_reduction <add>, %148, %cst_40 [1] : vector<4x8xf32> to vector<4xf32>
    %150 = vector.shape_cast %149 : vector<4xf32> to vector<4x1xf32>
    %151 = arith.addf %147, %150 : vector<4x1xf32>
    %152 = vector.broadcast %151 : vector<4x1xf32> to vector<4x128xf32>
    %153 = vector.broadcast %1 : vector<1x128xf32> to vector<4x128xf32>
    %154 = arith.mulf %152, %153 : vector<4x128xf32>
    %155 = vector.broadcast %2 : vector<1x128xf32> to vector<4x128xf32>
    %156 = arith.addf %154, %155 : vector<4x128xf32>
    %cst_41 = arith.constant dense<0.000000e+00> : vector<4x128xf32>
    %157 = tpu.matmul %124, %0, %cst_41 {dimension_numbers = #tpu.dot_dimension_numbers<[1], [0], [0], [1], [0, 0, 1, 1], [], []>} : vector<4x32xf32>, vector<32x128xf32>, vector<4x128xf32> -> vector<4x128xf32>
    %158 = arith.addf %156, %157 : vector<4x128xf32>
    %159 = arith.negf %158 : vector<4x128xf32>
    %160 = math.exp %159 : vector<4x128xf32>
    %cst_42 = arith.constant 1.000000e+00 : f32
    %161 = vector.broadcast %cst_42 : f32 to vector<4x128xf32>
    %162 = arith.addf %161, %160 : vector<4x128xf32>
    %163 = arith.divf %161, %162 : vector<4x128xf32>
    %164 = vector.extract_strided_slice %158 {offsets = [0, 64], sizes = [4, 32], strides = [1, 1]} : vector<4x128xf32> to vector<4x32xf32>
    %165 = math.tanh %164 : vector<4x32xf32>
    %166 = vector.extract_strided_slice %163 {offsets = [0, 32], sizes = [4, 32], strides = [1, 1]} : vector<4x128xf32> to vector<4x32xf32>
    %167 = arith.mulf %166, %121 : vector<4x32xf32>
    %168 = vector.extract_strided_slice %163 {offsets = [0, 0], sizes = [4, 32], strides = [1, 1]} : vector<4x128xf32> to vector<4x32xf32>
    %169 = arith.mulf %168, %165 : vector<4x32xf32>
    %170 = arith.addf %167, %169 : vector<4x32xf32>
    %171 = vector.extract_strided_slice %163 {offsets = [0, 96], sizes = [4, 32], strides = [1, 1]} : vector<4x128xf32> to vector<4x32xf32>
    %172 = math.tanh %170 : vector<4x32xf32>
    %173 = arith.mulf %171, %172 : vector<4x32xf32>
    %cst_43 = arith.constant dense<0.000000e+00> : vector<4x16xf32>
    %174 = tpu.matmul %173, %3, %cst_43 {dimension_numbers = #tpu.dot_dimension_numbers<[1], [0], [0], [1], [0, 0, 1, 1], [], []>} : vector<4x32xf32>, vector<32x16xf32>, vector<4x16xf32> -> vector<4x16xf32>
    %cst_44 = arith.constant dense<0.000000e+00> : vector<4x16xf32>
    %175 = tpu.matmul %170, %4, %cst_44 {dimension_numbers = #tpu.dot_dimension_numbers<[1], [0], [0], [1], [0, 0, 1, 1], [], []>} : vector<4x32xf32>, vector<32x16xf32>, vector<4x16xf32> -> vector<4x16xf32>
    %176 = arith.addf %174, %175 : vector<4x16xf32>
    %177 = vector.broadcast %5 : vector<1x16xf32> to vector<4x16xf32>
    %178 = arith.addf %176, %177 : vector<4x16xf32>
    %179 = vector.shape_cast %178 : vector<4x16xf32> to vector<4x1x16xf32>
    %180 = vector.broadcast %179 : vector<4x1x16xf32> to vector<4x8x16xf32>
    %181 = arith.addf %180, %21 : vector<4x8x16xf32>
    %182 = math.tanh %181 : vector<4x8x16xf32>
    %183 = vector.broadcast %7 : vector<1x1x16xf32> to vector<4x8x16xf32>
    %184 = arith.mulf %182, %183 : vector<4x8x16xf32>
    %cst_45 = arith.constant dense<0.000000e+00> : vector<4x8xf32>
    %185 = vector.multi_reduction <add>, %184, %cst_45 [2] : vector<4x8x16xf32> to vector<4x8xf32>
    %cst_46 = arith.constant dense<0xFF800000> : vector<4xf32>
    %186 = vector.multi_reduction <maximumf>, %185, %cst_46 [1] : vector<4x8xf32> to vector<4xf32>
    %187 = vector.shape_cast %186 : vector<4xf32> to vector<4x1xf32>
    %188 = vector.broadcast %187 : vector<4x1xf32> to vector<4x8xf32>
    %189 = arith.subf %185, %188 : vector<4x8xf32>
    %190 = math.exp %189 : vector<4x8xf32>
    %cst_47 = arith.constant dense<0.000000e+00> : vector<4xf32>
    %191 = vector.multi_reduction <add>, %190, %cst_47 [1] : vector<4x8xf32> to vector<4xf32>
    %192 = vector.shape_cast %191 : vector<4xf32> to vector<4x1xf32>
    %193 = tpu.reciprocal %192 {approx = true} : vector<4x1xf32> -> vector<4x1xf32>
    %194 = vector.broadcast %193 : vector<4x1xf32> to vector<4x8xf32>
    %195 = arith.mulf %190, %194 : vector<4x8xf32>
    %196 = vector.extract_strided_slice %14 {offsets = [0, 3], sizes = [4, 1], strides = [1, 1]} : vector<4x8xf32> to vector<4x1xf32>
    %197 = arith.mulf %195, %24 : vector<4x8xf32>
    %cst_48 = arith.constant dense<0.000000e+00> : vector<4xf32>
    %198 = vector.multi_reduction <add>, %197, %cst_48 [1] : vector<4x8xf32> to vector<4xf32>
    %199 = vector.shape_cast %198 : vector<4xf32> to vector<4x1xf32>
    %200 = arith.addf %196, %199 : vector<4x1xf32>
    %201 = vector.broadcast %200 : vector<4x1xf32> to vector<4x128xf32>
    %202 = vector.broadcast %1 : vector<1x128xf32> to vector<4x128xf32>
    %203 = arith.mulf %201, %202 : vector<4x128xf32>
    %204 = vector.broadcast %2 : vector<1x128xf32> to vector<4x128xf32>
    %205 = arith.addf %203, %204 : vector<4x128xf32>
    %cst_49 = arith.constant dense<0.000000e+00> : vector<4x128xf32>
    %206 = tpu.matmul %173, %0, %cst_49 {dimension_numbers = #tpu.dot_dimension_numbers<[1], [0], [0], [1], [0, 0, 1, 1], [], []>} : vector<4x32xf32>, vector<32x128xf32>, vector<4x128xf32> -> vector<4x128xf32>
    %207 = arith.addf %205, %206 : vector<4x128xf32>
    %208 = arith.negf %207 : vector<4x128xf32>
    %209 = math.exp %208 : vector<4x128xf32>
    %cst_50 = arith.constant 1.000000e+00 : f32
    %210 = vector.broadcast %cst_50 : f32 to vector<4x128xf32>
    %211 = arith.addf %210, %209 : vector<4x128xf32>
    %212 = arith.divf %210, %211 : vector<4x128xf32>
    %213 = vector.extract_strided_slice %207 {offsets = [0, 64], sizes = [4, 32], strides = [1, 1]} : vector<4x128xf32> to vector<4x32xf32>
    %214 = math.tanh %213 : vector<4x32xf32>
    %215 = vector.extract_strided_slice %212 {offsets = [0, 32], sizes = [4, 32], strides = [1, 1]} : vector<4x128xf32> to vector<4x32xf32>
    %216 = arith.mulf %215, %170 : vector<4x32xf32>
    %217 = vector.extract_strided_slice %212 {offsets = [0, 0], sizes = [4, 32], strides = [1, 1]} : vector<4x128xf32> to vector<4x32xf32>
    %218 = arith.mulf %217, %214 : vector<4x32xf32>
    %219 = arith.addf %216, %218 : vector<4x32xf32>
    %220 = vector.extract_strided_slice %212 {offsets = [0, 96], sizes = [4, 32], strides = [1, 1]} : vector<4x128xf32> to vector<4x32xf32>
    %221 = math.tanh %219 : vector<4x32xf32>
    %222 = arith.mulf %220, %221 : vector<4x32xf32>
    %cst_51 = arith.constant dense<0.000000e+00> : vector<4x16xf32>
    %223 = tpu.matmul %222, %3, %cst_51 {dimension_numbers = #tpu.dot_dimension_numbers<[1], [0], [0], [1], [0, 0, 1, 1], [], []>} : vector<4x32xf32>, vector<32x16xf32>, vector<4x16xf32> -> vector<4x16xf32>
    %cst_52 = arith.constant dense<0.000000e+00> : vector<4x16xf32>
    %224 = tpu.matmul %219, %4, %cst_52 {dimension_numbers = #tpu.dot_dimension_numbers<[1], [0], [0], [1], [0, 0, 1, 1], [], []>} : vector<4x32xf32>, vector<32x16xf32>, vector<4x16xf32> -> vector<4x16xf32>
    %225 = arith.addf %223, %224 : vector<4x16xf32>
    %226 = vector.broadcast %5 : vector<1x16xf32> to vector<4x16xf32>
    %227 = arith.addf %225, %226 : vector<4x16xf32>
    %228 = vector.shape_cast %227 : vector<4x16xf32> to vector<4x1x16xf32>
    %229 = vector.broadcast %228 : vector<4x1x16xf32> to vector<4x8x16xf32>
    %230 = arith.addf %229, %21 : vector<4x8x16xf32>
    %231 = math.tanh %230 : vector<4x8x16xf32>
    %232 = vector.broadcast %7 : vector<1x1x16xf32> to vector<4x8x16xf32>
    %233 = arith.mulf %231, %232 : vector<4x8x16xf32>
    %cst_53 = arith.constant dense<0.000000e+00> : vector<4x8xf32>
    %234 = vector.multi_reduction <add>, %233, %cst_53 [2] : vector<4x8x16xf32> to vector<4x8xf32>
    %cst_54 = arith.constant dense<0xFF800000> : vector<4xf32>
    %235 = vector.multi_reduction <maximumf>, %234, %cst_54 [1] : vector<4x8xf32> to vector<4xf32>
    %236 = vector.shape_cast %235 : vector<4xf32> to vector<4x1xf32>
    %237 = vector.broadcast %236 : vector<4x1xf32> to vector<4x8xf32>
    %238 = arith.subf %234, %237 : vector<4x8xf32>
    %239 = math.exp %238 : vector<4x8xf32>
    %cst_55 = arith.constant dense<0.000000e+00> : vector<4xf32>
    %240 = vector.multi_reduction <add>, %239, %cst_55 [1] : vector<4x8xf32> to vector<4xf32>
    %241 = vector.shape_cast %240 : vector<4xf32> to vector<4x1xf32>
    %242 = tpu.reciprocal %241 {approx = true} : vector<4x1xf32> -> vector<4x1xf32>
    %243 = vector.broadcast %242 : vector<4x1xf32> to vector<4x8xf32>
    %244 = arith.mulf %239, %243 : vector<4x8xf32>
    %245 = vector.extract_strided_slice %14 {offsets = [0, 4], sizes = [4, 1], strides = [1, 1]} : vector<4x8xf32> to vector<4x1xf32>
    %246 = arith.mulf %244, %24 : vector<4x8xf32>
    %cst_56 = arith.constant dense<0.000000e+00> : vector<4xf32>
    %247 = vector.multi_reduction <add>, %246, %cst_56 [1] : vector<4x8xf32> to vector<4xf32>
    %248 = vector.shape_cast %247 : vector<4xf32> to vector<4x1xf32>
    %249 = arith.addf %245, %248 : vector<4x1xf32>
    %250 = vector.broadcast %249 : vector<4x1xf32> to vector<4x128xf32>
    %251 = vector.broadcast %1 : vector<1x128xf32> to vector<4x128xf32>
    %252 = arith.mulf %250, %251 : vector<4x128xf32>
    %253 = vector.broadcast %2 : vector<1x128xf32> to vector<4x128xf32>
    %254 = arith.addf %252, %253 : vector<4x128xf32>
    %cst_57 = arith.constant dense<0.000000e+00> : vector<4x128xf32>
    %255 = tpu.matmul %222, %0, %cst_57 {dimension_numbers = #tpu.dot_dimension_numbers<[1], [0], [0], [1], [0, 0, 1, 1], [], []>} : vector<4x32xf32>, vector<32x128xf32>, vector<4x128xf32> -> vector<4x128xf32>
    %256 = arith.addf %254, %255 : vector<4x128xf32>
    %257 = arith.negf %256 : vector<4x128xf32>
    %258 = math.exp %257 : vector<4x128xf32>
    %cst_58 = arith.constant 1.000000e+00 : f32
    %259 = vector.broadcast %cst_58 : f32 to vector<4x128xf32>
    %260 = arith.addf %259, %258 : vector<4x128xf32>
    %261 = arith.divf %259, %260 : vector<4x128xf32>
    %262 = vector.extract_strided_slice %256 {offsets = [0, 64], sizes = [4, 32], strides = [1, 1]} : vector<4x128xf32> to vector<4x32xf32>
    %263 = math.tanh %262 : vector<4x32xf32>
    %264 = vector.extract_strided_slice %261 {offsets = [0, 32], sizes = [4, 32], strides = [1, 1]} : vector<4x128xf32> to vector<4x32xf32>
    %265 = arith.mulf %264, %219 : vector<4x32xf32>
    %266 = vector.extract_strided_slice %261 {offsets = [0, 0], sizes = [4, 32], strides = [1, 1]} : vector<4x128xf32> to vector<4x32xf32>
    %267 = arith.mulf %266, %263 : vector<4x32xf32>
    %268 = arith.addf %265, %267 : vector<4x32xf32>
    %269 = vector.extract_strided_slice %261 {offsets = [0, 96], sizes = [4, 32], strides = [1, 1]} : vector<4x128xf32> to vector<4x32xf32>
    %270 = math.tanh %268 : vector<4x32xf32>
    %271 = arith.mulf %269, %270 : vector<4x32xf32>
    %cst_59 = arith.constant dense<0.000000e+00> : vector<4x16xf32>
    %272 = tpu.matmul %271, %3, %cst_59 {dimension_numbers = #tpu.dot_dimension_numbers<[1], [0], [0], [1], [0, 0, 1, 1], [], []>} : vector<4x32xf32>, vector<32x16xf32>, vector<4x16xf32> -> vector<4x16xf32>
    %cst_60 = arith.constant dense<0.000000e+00> : vector<4x16xf32>
    %273 = tpu.matmul %268, %4, %cst_60 {dimension_numbers = #tpu.dot_dimension_numbers<[1], [0], [0], [1], [0, 0, 1, 1], [], []>} : vector<4x32xf32>, vector<32x16xf32>, vector<4x16xf32> -> vector<4x16xf32>
    %274 = arith.addf %272, %273 : vector<4x16xf32>
    %275 = vector.broadcast %5 : vector<1x16xf32> to vector<4x16xf32>
    %276 = arith.addf %274, %275 : vector<4x16xf32>
    %277 = vector.shape_cast %276 : vector<4x16xf32> to vector<4x1x16xf32>
    %278 = vector.broadcast %277 : vector<4x1x16xf32> to vector<4x8x16xf32>
    %279 = arith.addf %278, %21 : vector<4x8x16xf32>
    %280 = math.tanh %279 : vector<4x8x16xf32>
    %281 = vector.broadcast %7 : vector<1x1x16xf32> to vector<4x8x16xf32>
    %282 = arith.mulf %280, %281 : vector<4x8x16xf32>
    %cst_61 = arith.constant dense<0.000000e+00> : vector<4x8xf32>
    %283 = vector.multi_reduction <add>, %282, %cst_61 [2] : vector<4x8x16xf32> to vector<4x8xf32>
    %cst_62 = arith.constant dense<0xFF800000> : vector<4xf32>
    %284 = vector.multi_reduction <maximumf>, %283, %cst_62 [1] : vector<4x8xf32> to vector<4xf32>
    %285 = vector.shape_cast %284 : vector<4xf32> to vector<4x1xf32>
    %286 = vector.broadcast %285 : vector<4x1xf32> to vector<4x8xf32>
    %287 = arith.subf %283, %286 : vector<4x8xf32>
    %288 = math.exp %287 : vector<4x8xf32>
    %cst_63 = arith.constant dense<0.000000e+00> : vector<4xf32>
    %289 = vector.multi_reduction <add>, %288, %cst_63 [1] : vector<4x8xf32> to vector<4xf32>
    %290 = vector.shape_cast %289 : vector<4xf32> to vector<4x1xf32>
    %291 = tpu.reciprocal %290 {approx = true} : vector<4x1xf32> -> vector<4x1xf32>
    %292 = vector.broadcast %291 : vector<4x1xf32> to vector<4x8xf32>
    %293 = arith.mulf %288, %292 : vector<4x8xf32>
    %294 = vector.extract_strided_slice %14 {offsets = [0, 5], sizes = [4, 1], strides = [1, 1]} : vector<4x8xf32> to vector<4x1xf32>
    %295 = arith.mulf %293, %24 : vector<4x8xf32>
    %cst_64 = arith.constant dense<0.000000e+00> : vector<4xf32>
    %296 = vector.multi_reduction <add>, %295, %cst_64 [1] : vector<4x8xf32> to vector<4xf32>
    %297 = vector.shape_cast %296 : vector<4xf32> to vector<4x1xf32>
    %298 = arith.addf %294, %297 : vector<4x1xf32>
    %299 = vector.broadcast %298 : vector<4x1xf32> to vector<4x128xf32>
    %300 = vector.broadcast %1 : vector<1x128xf32> to vector<4x128xf32>
    %301 = arith.mulf %299, %300 : vector<4x128xf32>
    %302 = vector.broadcast %2 : vector<1x128xf32> to vector<4x128xf32>
    %303 = arith.addf %301, %302 : vector<4x128xf32>
    %cst_65 = arith.constant dense<0.000000e+00> : vector<4x128xf32>
    %304 = tpu.matmul %271, %0, %cst_65 {dimension_numbers = #tpu.dot_dimension_numbers<[1], [0], [0], [1], [0, 0, 1, 1], [], []>} : vector<4x32xf32>, vector<32x128xf32>, vector<4x128xf32> -> vector<4x128xf32>
    %305 = arith.addf %303, %304 : vector<4x128xf32>
    %306 = arith.negf %305 : vector<4x128xf32>
    %307 = math.exp %306 : vector<4x128xf32>
    %cst_66 = arith.constant 1.000000e+00 : f32
    %308 = vector.broadcast %cst_66 : f32 to vector<4x128xf32>
    %309 = arith.addf %308, %307 : vector<4x128xf32>
    %310 = arith.divf %308, %309 : vector<4x128xf32>
    %311 = vector.extract_strided_slice %305 {offsets = [0, 64], sizes = [4, 32], strides = [1, 1]} : vector<4x128xf32> to vector<4x32xf32>
    %312 = math.tanh %311 : vector<4x32xf32>
    %313 = vector.extract_strided_slice %310 {offsets = [0, 32], sizes = [4, 32], strides = [1, 1]} : vector<4x128xf32> to vector<4x32xf32>
    %314 = arith.mulf %313, %268 : vector<4x32xf32>
    %315 = vector.extract_strided_slice %310 {offsets = [0, 0], sizes = [4, 32], strides = [1, 1]} : vector<4x128xf32> to vector<4x32xf32>
    %316 = arith.mulf %315, %312 : vector<4x32xf32>
    %317 = arith.addf %314, %316 : vector<4x32xf32>
    %318 = vector.extract_strided_slice %310 {offsets = [0, 96], sizes = [4, 32], strides = [1, 1]} : vector<4x128xf32> to vector<4x32xf32>
    %319 = math.tanh %317 : vector<4x32xf32>
    %320 = arith.mulf %318, %319 : vector<4x32xf32>
    %cst_67 = arith.constant dense<0.000000e+00> : vector<4x16xf32>
    %321 = tpu.matmul %320, %3, %cst_67 {dimension_numbers = #tpu.dot_dimension_numbers<[1], [0], [0], [1], [0, 0, 1, 1], [], []>} : vector<4x32xf32>, vector<32x16xf32>, vector<4x16xf32> -> vector<4x16xf32>
    %cst_68 = arith.constant dense<0.000000e+00> : vector<4x16xf32>
    %322 = tpu.matmul %317, %4, %cst_68 {dimension_numbers = #tpu.dot_dimension_numbers<[1], [0], [0], [1], [0, 0, 1, 1], [], []>} : vector<4x32xf32>, vector<32x16xf32>, vector<4x16xf32> -> vector<4x16xf32>
    %323 = arith.addf %321, %322 : vector<4x16xf32>
    %324 = vector.broadcast %5 : vector<1x16xf32> to vector<4x16xf32>
    %325 = arith.addf %323, %324 : vector<4x16xf32>
    %326 = vector.shape_cast %325 : vector<4x16xf32> to vector<4x1x16xf32>
    %327 = vector.broadcast %326 : vector<4x1x16xf32> to vector<4x8x16xf32>
    %328 = arith.addf %327, %21 : vector<4x8x16xf32>
    %329 = math.tanh %328 : vector<4x8x16xf32>
    %330 = vector.broadcast %7 : vector<1x1x16xf32> to vector<4x8x16xf32>
    %331 = arith.mulf %329, %330 : vector<4x8x16xf32>
    %cst_69 = arith.constant dense<0.000000e+00> : vector<4x8xf32>
    %332 = vector.multi_reduction <add>, %331, %cst_69 [2] : vector<4x8x16xf32> to vector<4x8xf32>
    %cst_70 = arith.constant dense<0xFF800000> : vector<4xf32>
    %333 = vector.multi_reduction <maximumf>, %332, %cst_70 [1] : vector<4x8xf32> to vector<4xf32>
    %334 = vector.shape_cast %333 : vector<4xf32> to vector<4x1xf32>
    %335 = vector.broadcast %334 : vector<4x1xf32> to vector<4x8xf32>
    %336 = arith.subf %332, %335 : vector<4x8xf32>
    %337 = math.exp %336 : vector<4x8xf32>
    %cst_71 = arith.constant dense<0.000000e+00> : vector<4xf32>
    %338 = vector.multi_reduction <add>, %337, %cst_71 [1] : vector<4x8xf32> to vector<4xf32>
    %339 = vector.shape_cast %338 : vector<4xf32> to vector<4x1xf32>
    %340 = tpu.reciprocal %339 {approx = true} : vector<4x1xf32> -> vector<4x1xf32>
    %341 = vector.broadcast %340 : vector<4x1xf32> to vector<4x8xf32>
    %342 = arith.mulf %337, %341 : vector<4x8xf32>
    %343 = vector.extract_strided_slice %14 {offsets = [0, 6], sizes = [4, 1], strides = [1, 1]} : vector<4x8xf32> to vector<4x1xf32>
    %344 = arith.mulf %342, %24 : vector<4x8xf32>
    %cst_72 = arith.constant dense<0.000000e+00> : vector<4xf32>
    %345 = vector.multi_reduction <add>, %344, %cst_72 [1] : vector<4x8xf32> to vector<4xf32>
    %346 = vector.shape_cast %345 : vector<4xf32> to vector<4x1xf32>
    %347 = arith.addf %343, %346 : vector<4x1xf32>
    %348 = vector.broadcast %347 : vector<4x1xf32> to vector<4x128xf32>
    %349 = vector.broadcast %1 : vector<1x128xf32> to vector<4x128xf32>
    %350 = arith.mulf %348, %349 : vector<4x128xf32>
    %351 = vector.broadcast %2 : vector<1x128xf32> to vector<4x128xf32>
    %352 = arith.addf %350, %351 : vector<4x128xf32>
    %cst_73 = arith.constant dense<0.000000e+00> : vector<4x128xf32>
    %353 = tpu.matmul %320, %0, %cst_73 {dimension_numbers = #tpu.dot_dimension_numbers<[1], [0], [0], [1], [0, 0, 1, 1], [], []>} : vector<4x32xf32>, vector<32x128xf32>, vector<4x128xf32> -> vector<4x128xf32>
    %354 = arith.addf %352, %353 : vector<4x128xf32>
    %355 = arith.negf %354 : vector<4x128xf32>
    %356 = math.exp %355 : vector<4x128xf32>
    %cst_74 = arith.constant 1.000000e+00 : f32
    %357 = vector.broadcast %cst_74 : f32 to vector<4x128xf32>
    %358 = arith.addf %357, %356 : vector<4x128xf32>
    %359 = arith.divf %357, %358 : vector<4x128xf32>
    %360 = vector.extract_strided_slice %354 {offsets = [0, 64], sizes = [4, 32], strides = [1, 1]} : vector<4x128xf32> to vector<4x32xf32>
    %361 = math.tanh %360 : vector<4x32xf32>
    %362 = vector.extract_strided_slice %359 {offsets = [0, 32], sizes = [4, 32], strides = [1, 1]} : vector<4x128xf32> to vector<4x32xf32>
    %363 = arith.mulf %362, %317 : vector<4x32xf32>
    %364 = vector.extract_strided_slice %359 {offsets = [0, 0], sizes = [4, 32], strides = [1, 1]} : vector<4x128xf32> to vector<4x32xf32>
    %365 = arith.mulf %364, %361 : vector<4x32xf32>
    %366 = arith.addf %363, %365 : vector<4x32xf32>
    %367 = vector.extract_strided_slice %359 {offsets = [0, 96], sizes = [4, 32], strides = [1, 1]} : vector<4x128xf32> to vector<4x32xf32>
    %368 = math.tanh %366 : vector<4x32xf32>
    %369 = arith.mulf %367, %368 : vector<4x32xf32>
    %cst_75 = arith.constant dense<0.000000e+00> : vector<4x16xf32>
    %370 = tpu.matmul %369, %3, %cst_75 {dimension_numbers = #tpu.dot_dimension_numbers<[1], [0], [0], [1], [0, 0, 1, 1], [], []>} : vector<4x32xf32>, vector<32x16xf32>, vector<4x16xf32> -> vector<4x16xf32>
    %cst_76 = arith.constant dense<0.000000e+00> : vector<4x16xf32>
    %371 = tpu.matmul %366, %4, %cst_76 {dimension_numbers = #tpu.dot_dimension_numbers<[1], [0], [0], [1], [0, 0, 1, 1], [], []>} : vector<4x32xf32>, vector<32x16xf32>, vector<4x16xf32> -> vector<4x16xf32>
    %372 = arith.addf %370, %371 : vector<4x16xf32>
    %373 = vector.broadcast %5 : vector<1x16xf32> to vector<4x16xf32>
    %374 = arith.addf %372, %373 : vector<4x16xf32>
    %375 = vector.shape_cast %374 : vector<4x16xf32> to vector<4x1x16xf32>
    %376 = vector.broadcast %375 : vector<4x1x16xf32> to vector<4x8x16xf32>
    %377 = arith.addf %376, %21 : vector<4x8x16xf32>
    %378 = math.tanh %377 : vector<4x8x16xf32>
    %379 = vector.broadcast %7 : vector<1x1x16xf32> to vector<4x8x16xf32>
    %380 = arith.mulf %378, %379 : vector<4x8x16xf32>
    %cst_77 = arith.constant dense<0.000000e+00> : vector<4x8xf32>
    %381 = vector.multi_reduction <add>, %380, %cst_77 [2] : vector<4x8x16xf32> to vector<4x8xf32>
    %cst_78 = arith.constant dense<0xFF800000> : vector<4xf32>
    %382 = vector.multi_reduction <maximumf>, %381, %cst_78 [1] : vector<4x8xf32> to vector<4xf32>
    %383 = vector.shape_cast %382 : vector<4xf32> to vector<4x1xf32>
    %384 = vector.broadcast %383 : vector<4x1xf32> to vector<4x8xf32>
    %385 = arith.subf %381, %384 : vector<4x8xf32>
    %386 = math.exp %385 : vector<4x8xf32>
    %cst_79 = arith.constant dense<0.000000e+00> : vector<4xf32>
    %387 = vector.multi_reduction <add>, %386, %cst_79 [1] : vector<4x8xf32> to vector<4xf32>
    %388 = vector.shape_cast %387 : vector<4xf32> to vector<4x1xf32>
    %389 = tpu.reciprocal %388 {approx = true} : vector<4x1xf32> -> vector<4x1xf32>
    %390 = vector.broadcast %389 : vector<4x1xf32> to vector<4x8xf32>
    %391 = arith.mulf %386, %390 : vector<4x8xf32>
    %392 = vector.shape_cast %391 : vector<4x8xf32> to vector<4x8x1xf32>
    %393 = vector.broadcast %392 : vector<4x8x1xf32> to vector<4x8x16xf32>
    %394 = arith.mulf %393, %11 : vector<4x8x16xf32>
    %cst_80 = arith.constant dense<0.000000e+00> : vector<4x16xf32>
    %395 = vector.multi_reduction <add>, %394, %cst_80 [1] : vector<4x8x16xf32> to vector<4x16xf32>
    %c168 = arith.constant 168 : index
    %c0_81 = arith.constant 0 : index
    %396 = vector.load %arg2[%c168, %c0_81] : memref<264x128xf32, #tpu.memory_space<vmem>>, vector<32x32xf32>
    %cst_82 = arith.constant dense<0.000000e+00> : vector<4x32xf32>
    %397 = tpu.matmul %369, %396, %cst_82 {dimension_numbers = #tpu.dot_dimension_numbers<[1], [0], [0], [1], [0, 0, 1, 1], [], []>} : vector<4x32xf32>, vector<32x32xf32>, vector<4x32xf32> -> vector<4x32xf32>
    %c200 = arith.constant 200 : index
    %c0_83 = arith.constant 0 : index
    %398 = vector.load %arg2[%c200, %c0_83] : memref<264x128xf32, #tpu.memory_space<vmem>>, vector<16x32xf32>
    %cst_84 = arith.constant dense<0.000000e+00> : vector<4x32xf32>
    %399 = tpu.matmul %395, %398, %cst_84 {dimension_numbers = #tpu.dot_dimension_numbers<[1], [0], [0], [1], [0, 0, 1, 1], [], []>} : vector<4x16xf32>, vector<16x32xf32>, vector<4x32xf32> -> vector<4x32xf32>
    %400 = arith.addf %397, %399 : vector<4x32xf32>
    %c216 = arith.constant 216 : index
    %c0_85 = arith.constant 0 : index
    %401 = vector.load %arg2[%c216, %c0_85] : memref<264x128xf32, #tpu.memory_space<vmem>>, vector<1x32xf32>
    %402 = vector.broadcast %401 : vector<1x32xf32> to vector<4x32xf32>
    %403 = arith.addf %400, %402 : vector<4x32xf32>
    %c224 = arith.constant 224 : index
    %c0_86 = arith.constant 0 : index
    %404 = vector.load %arg2[%c224, %c0_86] : memref<264x128xf32, #tpu.memory_space<vmem>>, vector<32x1xf32>
    %cst_87 = arith.constant dense<0.000000e+00> : vector<4x1xf32>
    %405 = tpu.matmul %403, %404, %cst_87 {dimension_numbers = #tpu.dot_dimension_numbers<[1], [0], [0], [1], [0, 0, 1, 1], [], []>} : vector<4x32xf32>, vector<32x1xf32>, vector<4x1xf32> -> vector<4x1xf32>
    %c256 = arith.constant 256 : index
    %c0_88 = arith.constant 0 : index
    %406 = vector.load %arg2[%c256, %c0_88] : memref<264x128xf32, #tpu.memory_space<vmem>>, vector<1x1xf32>
    %407 = vector.broadcast %406 : vector<1x1xf32> to vector<4x1xf32>
    %408 = arith.addf %405, %407 : vector<4x1xf32>
    %c0_89 = arith.constant 0 : index
    %c0_90 = arith.constant 0 : index
    %409 = vector.load %arg3[%c0_89, %c0_90] : memref<4x1xf32, #tpu.memory_space<vmem>>, vector<4x1xf32>
    tpu.vector_store %arg3[%c0_89, %c0_90], %408 {strides = array<i32>} : memref<4x1xf32, #tpu.memory_space<vmem>>, vector<4x1xf32>,
    return
  }
}

</mosaic_0001>

<bundles_post_ra>
// kernel: attention_decoder_forward.1
= control target key start
LH: loop header
LB: loop body
LE: loop exit
PB: predicated region body
PF: predicated region fallthrough
CT: control target
= control target key end

     0   :  { %8 = vsyncpa [#allocation3], 0  ;;  %s6106_s0 = inlined_call_operand.hbm [shape: f32[4,8,16], index: 0, kind: input, shape index: {}]   ;;  %s6107_s1 = inlined_call_operand.hbm [shape: f32[4,8], index: 1, kind: input, shape index: {}]   ;;  %s6108_s2 = inlined_call_operand.hbm [shape: f32[264,128], index: 2, kind: input, shape index: {}]   ;;  %s6109_s3 = inlined_call_operand.vmem [shape: f32[4,1], index: 3, kind: output, shape index: {}]  }
   0x1   :  { %9 = vsyncpa [#allocation5], 0  ;;  %s5105_s12 = smov [#allocation4]   ;;  %s5106_s14 = smov [#allocation2]  }
   0x2   :  { %s28_s13 = sshll.u32 %s5105_s12, 4  ;;  %s15_s15 = sshll.u32 %s5106_s14, 4  ;;  %s29_s13 = int_to_ptr.vmem [resolvable:$true] %s28_s13  ;;  %s16_s15 = int_to_ptr.vmem [resolvable:$true] %s15_s15 }
   0x3   :  { %s5049_s16 = scalar_lea.vmem %s29_s13, 64  ;;  %p5054_p1 = scmp.lt.s32.totalorder %s29_s13, %s29_s13 }
   0x4   :  { %p5050_p0 = scmp.ne.s32.totalorder %s29_s13, %s5049_s16  ;;  %p5055_p2 = scmp.lt.s32.totalorder %s5049_s16, %s5049_s16 }
   0x6   :  { %p5056_p3 = por %p5055_p2, %p5054_p1 }
   0x8   :  { %p5057_p4 = pnand %p5056_p3, %p5050_p0 }
   0xa   :  { %5060 = shalt.err (!%p5057_p4)
}
   0xb   :  { %31 = dma.hbm_to_vmem [thread:$0]  %s6107_s1, 64, %s29_s13, [#allocation5]  }
   0xc   :  { %s5069_s19 = scalar_lea.vmem %s16_s15, 512  ;;  %p5074_p6 = scmp.lt.s32.totalorder %s16_s15, %s16_s15 }
   0xd   :  { %p5070_p5 = scmp.ne.s32.totalorder %s16_s15, %s5069_s19  ;;  %p5075_p7 = scmp.lt.s32.totalorder %s5069_s19, %s5069_s19 }
   0xf   :  { %p5076_p8 = por %p5075_p7, %p5074_p6 }
  0x11   :  { %p5077_p9 = pnand %p5076_p8, %p5070_p5 }
  0x13   :  { %5080 = shalt.err (!%p5077_p9)
}
  0x14   :  { %s5107_s20 = smov 128   ;;  %s5108_s21 = smov 8  }
  0x15   :  { %21 = dma.hbm_to_vmem [thread:$0]  %s6106_s0, 512, %s16_s15, [#allocation3], %s5107_s20, %s5107_s20, %s5108_s21  }
  0x16   :  { %s5109_s24 = smov [#allocation6]  }
  0x17   :  { %s37_s25 = sshll.u32 %s5109_s24, 4  ;;  %s38_s25 = int_to_ptr.vmem [resolvable:$true] %s37_s25 }
  0x18   :  { %s5089_s26 = scalar_lea.vmem %s38_s25, 4224  ;;  %p5094_p11 = scmp.lt.s32.totalorder %s38_s25, %s38_s25 }
  0x19   :  { %p5090_p10 = scmp.ne.s32.totalorder %s38_s25, %s5089_s26  ;;  %p5095_p12 = scmp.lt.s32.totalorder %s5089_s26, %s5089_s26 }
  0x1b   :  { %p5096_p13 = por %p5095_p12, %p5094_p11 }
  0x1d   :  { %p5097_p0 = pnand %p5096_p13, %p5090_p10 }
  0x1f   :  { %5100 = shalt.err (!%p5097_p0)
}
  0x20   :  { %43 = dma.hbm_to_vmem [thread:$0]  %s6108_s2, 4224, %s38_s25, [#allocation5], %s5107_s20, %s5107_s20, %s5108_s21  }
  0x21   :  { %5101 = dma.done.wait [#allocation3], 512  }
  0x22   :  { %5102 = vsyncadd [#allocation3], 4294966784 }
  0x23   :  { %5103 = dma.done.wait [#allocation5], 4288  }
  0x24   :  { %5104 = vsyncadd [#allocation5], 4294963008  ;;  %v5110_v0 = vmov 0.0   ;;  %vm5111_vm0 = vmmov 0   ;;  %vm88_vm1 = vcmask 130048   ;;  %v82_v1 = vld [vmem:[#allocation6 + $0x80] sm:$0xff]  ;;  %v359_v19 = vlaneseq }
  0x25   :  { %4493 = vmatprep.subr.mxu1 %v5110_v0  ;;  %4501 = vmatprep.mubr.msk.f32.mxu1 %vm5111_vm0, %v5110_v0  ;;  %v81_v2 = vld [vmem:[#allocation6 + $0x78] sm:$0xff]  ;;  %v5159_v4 = vld [vmem:[#allocation6 + $0x68] sm:$0xff]  ;;  %v5164_v6 = vld [vmem:[#allocation6 + $0x60] sm:$0xff]  ;;  %v5112_v17 = vmov 1966171168   ;;  %vm450_vm2 = vcmask 1041409  }
  0x26   :  { %v5155_v3 = vld [vmem:[#allocation2] sm:$0xff]  ;;  %4483 = vmatprep.subr.mxu0 %v82_v1  ;;  %v5161_v5 = vld [vmem:[#allocation2 + $0x8] sm:$0xff]  ;;  %4494 = vmatpush3.msra.mxu1 %v5159_v4  ;;  %v5169_v8 = vld [vmem:[#allocation2 + $0x10] sm:$0xff]  ;;  %v357_v18 = vunpack.c.l.s4 %v5112_v17  ;;  %v5220_v23 = vshrl.u32 %v359_v19, 7  ;;  %vm452_vm3 = vcmask 1042434   ;;  %vm454_vm4 = vcmask 1043459  }
  0x27   :  { %4487 = vmatprep.mubr.msk.f32.mxu0 %vm88_vm1, %v5155_v3  ;;  %4484 = vmatpush3.msra.mxu0 %v82_v1  ;;  %v5167_v7 = vld [vmem:[#allocation6 + $0x48] sm:$0xff]  ;;  %v5175_v9 = vld [vmem:[#allocation6 + $0x40] sm:$0xff]  ;;  %v5177_v10 = vld [vmem:[#allocation6 + $0x58] sm:$0xff]  ;;  %vm457_vm5 = vcmask 60416   ;;  %s5114_s2 = smov 64   ;;  %s5115_s28 = smov 32  }
  0x28   :  { %4485 = vmatprep.subr.mxu0 %v81_v2  ;;  %4495 = vmatprep.subr.mxu1 %v5110_v0  ;;  %v5182_v11 = vld [vmem:[#allocation2 + $0x18] sm:$0xff]  ;;  %v358_v22 = vunpack.c.0.s8 %v357_v18  ;;  %v5222_v25 = vld [vmem:[#allocation6 + $0x70] ss:$0 sm:$0xff]  ;;  %v5230_v33 = vsub.s32 0, %v5220_v23  ;;  %v4307_v34 = vld [vmem:[#allocation6 + $0x88] ss:$0 sm:$0xff] }
  0x29   :  { %4486 = vmatpush3.msra.mxu0 %v81_v2  ;;  %4496 = vmatpush3.msra.mxu1 %v5164_v6  ;;  %v5186_v12 = vld [vmem:[#allocation6 + $0x38] sm:$0xff]  ;;  %v5190_v13 = vld [vmem:[#allocation6 + $0x50] sm:$0xff]  ;;  %v433_v2 = vand.u32 127, %v359_v19  ;;  %s5116_s29 = smov 96   ;;  %vm206_vm6 = vcmask 261120   ;;  %vm4299_vm7 = vcmask 3072  }
  0x2a   :  { %4488 = vmatmul.mubr.msk.f32.vlgmr.msra.gmra.mxu0 %vm88_vm1, %v5161_v5  ;;  %4504 = vmatprep.subr.mxu0 %v5110_v0  ;;  %v5195_v14 = vld [vmem:[#allocation6 + $0x30] sm:$0xff]  ;;  %v5225_v29 = vsub.s32 %v358_v22, %v5220_v23 }
  0x2b   :  { %4505 = vmatpush3.msra.mxu0 %v5167_v7  ;;  %4490 = vmatprep.mubr.msk.f32.mxu0 %vm88_vm1, %v5169_v8  ;;  %v5250_v52 = vld [vmem:[#allocation6 + $0x90] ss:$0 sm:$0xff] }
  0x2c   :  { %4506 = vmatprep.subr.mxu0 %v5110_v0  ;;  %4497 = vmatprep.subr.mxu1 %v5110_v0 }
  0x2d   :  { %4507 = vmatpush3.msra.mxu0 %v5175_v9  ;;  %4498 = vmatpush3.msra.mxu1 %v5177_v10 }
  0x2e   :  { %4491 = vmatmul.mubr.msk.f32.gmra.mxu0 %vm88_vm1, %v5182_v11  ;;  %4508 = vmatprep.subr.mxu0 %v5110_v0 }
  0x2f   :  { %4499 = vmatprep.subr.mxu1 %v5110_v0  ;;  %4509 = vmatpush3.msra.mxu0 %v5186_v12 }
  0x30   :  { %4500 = vmatpush3.msra.mxu1 %v5190_v13  ;;  %4510 = vmatprep.subr.mxu0 %v5110_v0 }
  0x31   :  { %4502 = vmatmul.mubr.f32.vlgmr.msra.gmra.mxu1 %v5110_v0  ;;  %4511 = vmatpush3.msra.mxu0 %v5195_v14 }
  0x32   :  { %4512 = vmatprep.mubr.msk.f32.mxu0 %vm5111_vm0, %v5110_v0  ;;  %4515 = vmatprep.subr.mxu1 %v5110_v0 }
  0x33   :  { %4513 = vmatmul.mubr.f32.vlgmr.msra.gmra.mxu0 %v5110_v0  ;;  %4523 = vmatprep.mubr.msk.f32.mxu1 %vm5111_vm0, %v5110_v0 }
  0x34   :  { %4526 = vmatprep.subr.mxu0 %v5110_v0  ;;  %4534 = vmatprep.mubr.msk.f32.mxu0 %vm5111_vm0, %v5110_v0 }
  0x35   :  { %4527 = vmatpush3.msra.mxu0 %v5159_v4 }
  0x36   :  { %4528 = vmatprep.subr.mxu0 %v5110_v0 }
  0x37   :  { %4529 = vmatpush3.msra.mxu0 %v5164_v6 }
  0x38   :  { %4530 = vmatprep.subr.mxu0 %v5110_v0 }
  0x39   :  { %4531 = vmatpush3.msra.mxu0 %v5177_v10 }
  0x3a   :  { %4532 = vmatprep.subr.mxu0 %v5110_v0 }
  0x3b   :  { %4533 = vmatpush3.msra.mxu0 %v5190_v13 }
  0x3c   :  { %4548 = vmatprep.subr.mxu0 %v5110_v0 }
  0xea   :  { %v4489_v15 = vpop.f32.mrf.mxu0 }
  0xeb   :  { %v5237_v41 = vadd.f32 %v4489_v15, %v4307_v34 }
  0xec   :  { %v167_v16 = vpop.f32.mrf.mxu0 }
  0xed   :  { %v5233_v37 = vadd.f32 %v4307_v34, %v167_v16  ;;  %v5261_v16 = vsub.s32 %v433_v2, %v5220_v23 }
  0xee   :  { %v4492_v20 = vpop.f32.mrf.mxu0 }
  0xef   :  { %v5244_v47 = vadd.f32 %v4492_v20, %v4307_v34 }
  0xf0   :  { %v177_v21 = vpop.f32.mrf.mxu0 }
  0xf1   :  { %v276_v24 = vpop.f32.mrf.mxu1  ;;  %v5239_v42 = vadd.f32 %v4307_v34, %v177_v21  ;;  %v5277_v34 = vsub.s32 2, %v5220_v23 }
  0xf3   :  { %v346_v26 = vpop.f32.mrf.mxu0  ;;  %v4503_v27 = vpop.f32.mrf.mxu1 }
  0xf4   :  { %v347_v28 = vadd.f32 %v346_v26, %v276_v24 }
  0xf5   :  { %v4514_v30 = vpop.f32.mrf.mxu0 }
  0xf6   :  { %v354_v31 = vadd.f32 %v5222_v25, %v347_v28 }
  0xf8   :  { %v362_v32 = vrot.slane %v354_v31, %v5225_v29  ;;  %v5113_v31 = vmov 0  }
  0xf9   :  { %4796 = vset.pattern.permute.xlu0 %v5113_v31  ;;  %4795 = vset.pattern.permute.xlu1 %v5113_v31 }
  0xfa   :  { %v363_v35 = vcombine.high %v362_v32, %v362_v32  ;;  %v370_v36 = vrot.slane %v362_v32, %v5225_v29  ;;  %v5274_v32 = vsub.s32 1, %v5220_v23 }
  0xfc   :  { %v377_v38 = vrot.slane %v363_v35, %v5225_v29  ;;  %v378_v39 = vcombine.high %v370_v36, %v370_v36  ;;  %v383_v40 = vrot.slane %v370_v36, %v5230_v33  ;;  %v5280_v35 = vsub.s32 3, %v5220_v23 }
  0xfe   :  { %v379_v43 = vcombine.high %v377_v38, %v377_v38  ;;  %v387_v44 = vrot.slane %v377_v38, %v5230_v33  ;;  %v391_v45 = vrot.slane %v378_v39, %v5230_v33  ;;  %v400_v46 = vadd.f32 %v383_v40, %v5233_v37 }
 0x100   :  { %v395_v48 = vrot.slane %v379_v43, %v5230_v33  ;;  %v401_v49 = vadd.f32 %v387_v44, %v5237_v41  ;;  %v402_v50 = vadd.f32 %v391_v45, %v5239_v42  ;;  %4809 = vtanh.f32 %v400_v46 }
 0x102   :  { %v403_v51 = vadd.f32 %v395_v48, %v5244_v47  ;;  %4811 = vtanh.f32 %v401_v49 }
 0x103   :  { %4813 = vtanh.f32 %v402_v50 }
 0x104   :  { %4815 = vtanh.f32 %v403_v51 }
 0x10d   :  { %v4810_v53 = vpop.eup %4809 }
 0x10e   :  { %v412_v54 = vmul.f32 %v4810_v53, %v5250_v52 }
 0x10f   :  { %v4812_v55 = vpop.eup %4811 }
 0x110   :  { %v4814_v56 = vpop.eup %4813  ;;  %v416_v57 = vsel %vm88_vm1, %v412_v54, 0.0  ;;  %v413_v58 = vmul.f32 %v4812_v55, %v5250_v52 }
 0x111   :  { %v4816_v59 = vpop.eup %4815  ;;  %417 = vadd.xlane.f32.xlu0 %v416_v57  ;;  %v414_v60 = vmul.f32 %v4814_v56, %v5250_v52  ;;  %v4312_v57 = vld [vmem:[#allocation6 + $0x98] ss:$0 sm:$0xff] }
 0x112   :  { %v415_v62 = vmul.f32 %v4816_v59, %v5250_v52  ;;  %v419_v63 = vsel %vm88_vm1, %v413_v58, 0.0  ;;  %v190_v58 = vmul.f32 %v4312_v57, %v5155_v3  ;;  %v191_v3 = vmul.f32 %v4312_v57, %v5161_v5 }
 0x113   :  { %v422_v61 = vsel %vm88_vm1, %v414_v60, 0.0 }
 0x114   :  { %423 = vadd.xlane.f32.xlu1 %v422_v61  ;;  %v425_v1 = vsel %vm88_vm1, %v415_v62, 0.0  ;;  %v194_v59 = vsel %vm88_vm1, %v190_v58, 0.0  ;;  %v5324_v58 = vld [vmem:[#allocation6 + $0x8] sm:$0xff] }
 0x115   :  { %420 = vadd.xlane.f32.xlu0 %v419_v63 }
 0x118   :  { %426 = vadd.xlane.f32.xlu1 %v425_v1 }
 0x19a   :  { %v418_v15 = vpop.xlane.xlu0 %417 }
 0x19b   :  { %v437_v20 = vrot.slane %v418_v15, %v5261_v16 }
 0x19d   :  { %v424_v17 = vpop.xlane.xlu1 %423 }
 0x19e   :  { %v421_v18 = vpop.xlane.xlu0 %420  ;;  %v445_v22 = vrot.slane %v424_v17, %v5261_v16 }
 0x19f   :  { %v441_v21 = vrot.slane %v421_v18, %v5261_v16 }
 0x1a1   :  { %v427_v24 = vpop.xlane.xlu1 %426  ;;  %v451_v26 = vsel %vm450_vm2, %v441_v21, %v437_v20 }
 0x1a2   :  { %v449_v19 = vrot.slane %v427_v24, %v5261_v16  ;;  %v453_v27 = vsel %vm452_vm3, %v445_v22, %v451_v26  ;;  %v192_v26 = vmul.f32 %v4312_v57, %v5169_v8 }
 0x1a4   :  { %v455_v28 = vsel %vm454_vm4, %v449_v19, %v453_v27  ;;  %v200_v19 = vsel %vm88_vm1, %v192_v26, 0.0  ;;  %v193_v27 = vmul.f32 %v4312_v57, %v5182_v11  ;;  %v5320_v57 = vld [vmem:[#allocation6 + $0x10] sm:$0xff] }
 0x1a5   :  { %v458_v30 = vsel %vm457_vm5, %v455_v28, -inf }
 0x1a6   :  { %459 = vmax.xlane.f32.xlu0 %v458_v30  ;;  %v203_v28 = vsel %vm88_vm1, %v193_v27, 0.0 }
 0x22f   :  { %v460_v36 = vpop.xlane.xlu0 %459 }
 0x230   :  { %v465_v38 = vrot.slane %v460_v36, %v5230_v33  ;;  %v469_v39 = vrot.slane %v460_v36, %v5274_v32  ;;  %v473_v40 = vrot.slane %v460_v36, %v5277_v34  ;;  %v477_v43 = vrot.slane %v460_v36, %v5280_v35 }
 0x232   :  { %v482_v44 = vsub.f32 %v418_v15, %v465_v38  ;;  %v483_v45 = vsub.f32 %v421_v18, %v469_v39  ;;  %v484_v46 = vsub.f32 %v424_v17, %v473_v40  ;;  %v485_v50 = vsub.f32 %v427_v24, %v477_v43 }
 0x233   :  { %v197_v24 = vsel %vm88_vm1, %v191_v3, 0.0 }
 0x234   :  { %v486_v48 = vmul.f32 1.442695, %v482_v44  ;;  %v488_v49 = vmul.f32 1.442695, %v483_v45  ;;  %v490_v51 = vmul.f32 1.442695, %v484_v46 }
 0x235   :  { %v492_v23 = vmul.f32 1.442695, %v485_v50 }
 0x236   :  { %4817 = vpow2.f32 %v486_v48 }
 0x237   :  { %4819 = vpow2.f32 %v488_v49 }
 0x238   :  { %4821 = vpow2.f32 %v490_v51 }
 0x239   :  { %4823 = vpow2.f32 %v492_v23 }
 0x243   :  { %v4818_v53 = vpop.eup %4817 }
 0x244   :  { %v4820_v54 = vpop.eup %4819  ;;  %499 = vperm.xlu1 %4795, %v4818_v53  }
 0x245   :  { %502 = vperm.xlu0 %4796, %v4820_v54   ;;  %v4822_v55 = vpop.eup %4821 }
 0x246   :  { %v4824_v56 = vpop.eup %4823 }
 0x248   :  { %505 = vperm.xlu1 %4795, %v4822_v55  }
 0x24c   :  { %508 = vperm.xlu1 %4795, %v4824_v56  }
 0x264   :  { %195 = vadd.xlane.f32.xlu0 %v194_v59 }
 0x2bf   :  { %v500_v60 = vpop.permute.xlu1 %499 }
 0x2c0   :  { %v503_v61 = vpop.permute.xlu0 %502  ;;  %v513_v1 = vrot.slane %v500_v60, %v5261_v16 }
 0x2c1   :  { %v517_v63 = vrot.slane %v503_v61, %v5261_v16 }
 0x2c3   :  { %v506_v62 = vpop.permute.xlu1 %505  ;;  %v526_v18 = vsel %vm450_vm2, %v517_v63, %v513_v1 }
 0x2c4   :  { %v521_v2 = vrot.slane %v506_v62, %v5261_v16 }
 0x2c6   :  { %v527_v20 = vsel %vm452_vm3, %v521_v2, %v526_v18 }
 0x2c7   :  { %v509_v15 = vpop.permute.xlu1 %508 }
 0x2c8   :  { %v525_v17 = vrot.slane %v509_v15, %v5261_v16 }
 0x2ca   :  { %v528_v21 = vsel %vm454_vm4, %v525_v17, %v527_v20 }
 0x2cb   :  { %v530_v22 = vsel %vm457_vm5, %v528_v21, 0.0  ;;  %v75_v21 = vld [vmem:[#allocation4] sm:$0xf] }
 0x2cc   :  { %531 = vadd.xlane.f32.xlu1 %v530_v22 }
 0x2d0   :  { %198 = vadd.xlane.f32.xlu1 %v197_v24 }
 0x2d4   :  { %201 = vadd.xlane.f32.xlu1 %v200_v19 }
 0x2d8   :  { %204 = vadd.xlane.f32.xlu1 %v203_v28 }
 0x2ed   :  { %v5307_v40 = vpop.xlane.xlu0 %195 }
 0x355   :  { %v532_v30 = vpop.xlane.xlu1 %531 }
 0x356   :  { %4825 = vrcp.f32 %v532_v30  ;;  %v5356_v30 = vld [vmem:[#allocation6 + $0x20] ss:$0 sm:$0xff] }
 0x359   :  { %v5302_v5 = vpop.xlane.xlu1 %198 }
 0x35d   :  { %v5309_v11 = vpop.xlane.xlu1 %201 }
 0x361   :  { %v5315_v23 = vpop.xlane.xlu1 %204 }
 0x363   :  { %v4826_v36 = vpop.eup %4825 }
 0x364   :  { %v538_v38 = vrot.slane %v4826_v36, %v5230_v33  ;;  %v542_v39 = vrot.slane %v4826_v36, %v5274_v32  ;;  %v546_v8 = vrot.slane %v4826_v36, %v5277_v34  ;;  %v550_v49 = vrot.slane %v4826_v36, %v5280_v35 }
 0x366   :  { %v555_v43 = vmul.f32 %v4818_v53, %v538_v38  ;;  %v556_v44 = vmul.f32 %v4820_v54, %v542_v39  ;;  %v557_v48 = vmul.f32 %v4822_v55, %v546_v8  ;;  %v558_v51 = vmul.f32 %v4824_v56, %v550_v49  ;;  %v5318_v54 = vld [vmem:[#allocation6 + $0x18] sm:$0xff]  ;;  %v70_v55 = vld [vmem:[#allocation6 + $0xa0] sm:$0x1]  ;;  %v5358_v38 = vld [vmem:[#allocation6 + $0x28] ss:$0 sm:$0xff] }
 0x367   :  { %4516 = vmatpush3.msra.mxu1 %v5318_v54  ;;  %4775 = vpush %v70_v55  ;;  %v5328_v56 = vld [vmem:[#allocation6] sm:$0xff] }
 0x368   :  { %v559_v45 = vmul.f32 %v555_v43, %v5307_v40  ;;  %v560_v46 = vmul.f32 %v556_v44, %v5302_v5  ;;  %v561_v50 = vmul.f32 %v557_v48, %v5309_v11  ;;  %v562_v53 = vmul.f32 %v558_v51, %v5315_v23  ;;  %4517 = vmatprep.subr.mxu1 %v5110_v0 }
 0x369   :  { %4518 = vmatpush3.msra.mxu1 %v5320_v57 }
 0x36a   :  { %568 = vperm.xlu1 %4795, %v559_v45   ;;  %571 = vperm.xlu0 %4796, %v560_v46  }
 0x36b   :  { %4519 = vmatprep.subr.mxu1 %v5110_v0 }
 0x36c   :  { %4520 = vmatpush3.msra.mxu1 %v5324_v58 }
 0x36d   :  { %4521 = vmatprep.subr.mxu1 %v5110_v0 }
 0x36e   :  { %574 = vperm.xlu1 %4795, %v561_v50   ;;  %4522 = vmatpush3.msra.mxu1 %v5328_v56 }
 0x36f   :  { %4524 = vmatmul.mubr.f32.vlgmr.msra.gmra.mxu1 %v5110_v0  ;;  %4537 = vmatprep.subr.mxu1 %v5110_v0 }
 0x370   :  { %4538 = vmatpush3.msra.mxu1 %v5167_v7  ;;  %4545 = vmatprep.mubr.msk.f32.mxu1 %vm5111_vm0, %v5110_v0 }
 0x371   :  { %4539 = vmatprep.subr.mxu1 %v5110_v0 }
 0x372   :  { %577 = vperm.xlu1 %4795, %v562_v53   ;;  %4540 = vmatpush3.msra.mxu1 %v5175_v9 }
 0x373   :  { %4541 = vmatprep.subr.mxu1 %v5110_v0 }
 0x374   :  { %4542 = vmatpush3.msra.mxu1 %v5186_v12 }
 0x375   :  { %4543 = vmatprep.subr.mxu1 %v5110_v0 }
 0x376   :  { %4544 = vmatpush3.msra.mxu1 %v5195_v14 }
 0x377   :  { %4559 = vmatprep.subr.mxu1 %v5110_v0 }
 0x398   :  { %s4776_s0 = spop %4775 }
 0x399   :  { %v78_v22 = vstv %s4776_s0 }
 0x39a   :  { %v5353_v24 = vmul.f32 %v78_v22, %v75_v21 }
 0x3e5   :  { %v569_v59 = vpop.permute.xlu1 %568  ;;  %v572_v60 = vpop.permute.xlu0 %571 }
 0x3e6   :  { %v586_v62 = vrot.slane %v572_v60, %v5261_v16  ;;  %v582_v63 = vrot.slane %v569_v59, %v5261_v16 }
 0x3e8   :  { %v595_v17 = vsel %vm450_vm2, %v586_v62, %v582_v63 }
 0x3e9   :  { %v575_v61 = vpop.permute.xlu1 %574 }
 0x3ea   :  { %v590_v1 = vrot.slane %v575_v61, %v5261_v16 }
 0x3ec   :  { %v596_v18 = vsel %vm452_vm3, %v590_v1, %v595_v17 }
 0x3ed   :  { %v578_v2 = vpop.permute.xlu1 %577 }
 0x3ee   :  { %v594_v15 = vrot.slane %v578_v2, %v5261_v16 }
 0x3f0   :  { %v597_v20 = vsel %vm454_vm4, %v594_v15, %v596_v18 }
 0x3f1   :  { %v599_v3 = vsel %vm457_vm5, %v597_v20, 0.0 }
 0x3f2   :  { %600 = vadd.xlane.f32.xlu1 %v599_v3 }
 0x42f   :  { %v684_v27 = vpop.f32.mrf.mxu1 }
 0x431   :  { %v4525_v28 = vpop.f32.mrf.mxu1 }
 0x47b   :  { %v601_v26 = vpop.xlane.xlu1 %600 }
 0x47c   :  { %v602_v19 = vadd.f32 %v601_v26, %v5353_v24 }
 0x47e   :  { %605 = vperm.xlu0 %4796, %v602_v19  }
 0x4f9   :  { %v606_v36 = vpop.permute.xlu0 %605 }
 0x4fa   :  { %v612_v39 = vmul.f32 %v5356_v30, %v606_v36 }
 0x4fc   :  { %v617_v8 = vadd.f32 %v5358_v38, %v612_v39 }
 0x4fe   :  { %v688_v43 = vadd.f32 %v684_v27, %v617_v8 }
 0x500   :  { %4827 = vtanh.f32 %v688_v43  ;;  %v4317_v45 = vmul.f32 -1.442695, %v688_v43 }
 0x502   :  { %4829 = vpow2.f32 %v4317_v45 }
 0x50d   :  { %v4828_v44 = vpop.eup %4827 }
 0x50e   :  { %698 = vrot.lane.b32.xlu0 %v4828_v44, %s5114_s2 }
 0x50f   :  { %v4830_v46 = vpop.eup %4829 }
 0x510   :  { %v692_v48 = vadd.f32 1.0, %v4830_v46 }
 0x512   :  { %4831 = vrcp.f32 %v692_v48 }
 0x51f   :  { %v4832_v49 = vpop.eup %4831 }
 0x520   :  { %v696_v53 = vmul.f32 0.0, %v4832_v49 }
 0x580   :  { %v699_v50 = vpop.permute.xlu0 %698 }
 0x581   :  { %v701_v51 = vmul.f32 %v4832_v49, %v699_v50 }
 0x583   :  { %703 = vrot.lane.b32.xlu0 %v701_v51, %s5115_s28 }
 0x5f5   :  { %v704_v55 = vpop.permute.xlu0 %703 }
 0x5f6   :  { %v5364_v59 = vadd.f32 %v704_v55, %v696_v53 }
 0x5f8   :  { %4833 = vtanh.f32 %v5364_v59 }
 0x605   :  { %v4834_v60 = vpop.eup %4833 }
 0x606   :  { %709 = vrot.lane.b32.xlu0 %v4834_v60, %s5114_s2 }
 0x60a   :  { %714 = vrot.lane.b32.xlu0 %v5364_v59, %s5116_s29 }
 0x678   :  { %v710_v61 = vpop.permute.xlu0 %709 }
 0x679   :  { %v712_v62 = vmul.f32 %v4832_v49, %v710_v61 }
 0x67b   :  { %789 = vrot.lane.b32.xlu0 %v712_v62, %s5115_s28 }
 0x67c   :  { %v715_v63 = vpop.permute.xlu0 %714 }
 0x67d   :  { %4535 = vmatmul.mubr.msk.f32.vlgmr.msra.gmra.mxu0 %vm206_vm6, %v715_v63 }
 0x67e   :  { %4549 = vmatpush3.msra.mxu0 %v5318_v54  ;;  %4556 = vmatprep.mubr.msk.f32.mxu0 %vm5111_vm0, %v5110_v0 }
 0x67f   :  { %4550 = vmatprep.subr.mxu0 %v5110_v0 }
 0x680   :  { %4551 = vmatpush3.msra.mxu0 %v5320_v57 }
 0x681   :  { %4552 = vmatprep.subr.mxu0 %v5110_v0 }
 0x682   :  { %4553 = vmatpush3.msra.mxu0 %v5324_v58 }
 0x683   :  { %4554 = vmatprep.subr.mxu0 %v5110_v0 }
 0x684   :  { %4555 = vmatpush3.msra.mxu0 %v5328_v56 }
 0x685   :  { %4570 = vmatprep.subr.mxu0 %v5110_v0 }
 0x6ed   :  { %v790_v1 = vpop.permute.xlu0 %789 }
 0x6ee   :  { %4546 = vmatmul.mubr.msk.f32.vlgmr.msra.gmra.mxu1 %vm206_vm6, %v790_v1  ;;  %4557 = vmatmul.mubr.msk.f32.vlgmr.msra.gmra.mxu0 %vm206_vm6, %v790_v1 }
 0x6ef   :  { %4560 = vmatpush3.msra.mxu1 %v5159_v4  ;;  %4567 = vmatprep.mubr.msk.f32.mxu1 %vm5111_vm0, %v5110_v0 }
 0x6f0   :  { %4561 = vmatprep.subr.mxu1 %v5110_v0  ;;  %4571 = vmatpush3.msra.mxu0 %v5167_v7 }
 0x6f1   :  { %4562 = vmatpush3.msra.mxu1 %v5164_v6  ;;  %4572 = vmatprep.subr.mxu0 %v5110_v0 }
 0x6f2   :  { %4563 = vmatprep.subr.mxu1 %v5110_v0  ;;  %4573 = vmatpush3.msra.mxu0 %v5175_v9 }
 0x6f3   :  { %4564 = vmatpush3.msra.mxu1 %v5177_v10  ;;  %4574 = vmatprep.subr.mxu0 %v5110_v0 }
 0x6f4   :  { %4565 = vmatprep.subr.mxu1 %v5110_v0  ;;  %4575 = vmatpush3.msra.mxu0 %v5186_v12 }
 0x6f5   :  { %4566 = vmatpush3.msra.mxu1 %v5190_v13  ;;  %4576 = vmatprep.subr.mxu0 %v5110_v0 }
 0x6f6   :  { %4581 = vmatprep.subr.mxu1 %v5110_v0  ;;  %4577 = vmatpush3.msra.mxu0 %v5195_v14 }
 0x6f7   :  { %4578 = vmatprep.mubr.msk.f32.mxu0 %vm5111_vm0, %v5110_v0  ;;  %4592 = vmatprep.subr.mxu0 %v5110_v0 }
 0x73d   :  { %v784_v2 = vpop.f32.mrf.mxu0 }
 0x73f   :  { %v4536_v15 = vpop.f32.mrf.mxu0 }
 0x7ae   :  { %v859_v17 = vpop.f32.mrf.mxu1  ;;  %v5404_v18 = vpop.f32.mrf.mxu0 }
 0x7af   :  { %v860_v20 = vadd.f32 %v859_v17, %v784_v2 }
 0x7b0   :  { %v4547_v3 = vpop.f32.mrf.mxu1  ;;  %v4558_v21 = vpop.f32.mrf.mxu0 }
 0x7b1   :  { %v863_v22 = vadd.f32 %v5222_v25, %v860_v20 }
 0x7b3   :  { %v871_v26 = vrot.slane %v863_v22, %v5225_v29 }
 0x7b5   :  { %v872_v19 = vcombine.high %v871_v26, %v871_v26  ;;  %v879_v27 = vrot.slane %v871_v26, %v5225_v29 }
 0x7b7   :  { %v886_v28 = vrot.slane %v872_v19, %v5225_v29  ;;  %v887_v36 = vcombine.high %v879_v27, %v879_v27  ;;  %v892_v39 = vrot.slane %v879_v27, %v5230_v33 }
 0x7b9   :  { %v888_v8 = vcombine.high %v886_v28, %v886_v28  ;;  %v896_v43 = vrot.slane %v886_v28, %v5230_v33  ;;  %v900_v44 = vrot.slane %v887_v36, %v5230_v33  ;;  %v909_v45 = vadd.f32 %v892_v39, %v5233_v37 }
 0x7bb   :  { %v904_v46 = vrot.slane %v888_v8, %v5230_v33  ;;  %v910_v48 = vadd.f32 %v896_v43, %v5237_v41  ;;  %v911_v49 = vadd.f32 %v900_v44, %v5239_v42  ;;  %4835 = vtanh.f32 %v909_v45 }
 0x7bd   :  { %v912_v50 = vadd.f32 %v904_v46, %v5244_v47  ;;  %4837 = vtanh.f32 %v910_v48 }
 0x7be   :  { %4839 = vtanh.f32 %v911_v49 }
 0x7bf   :  { %4841 = vtanh.f32 %v912_v50 }
 0x7c8   :  { %v4836_v51 = vpop.eup %4835 }
 0x7c9   :  { %v917_v53 = vmul.f32 %v4836_v51, %v5250_v52 }
 0x7ca   :  { %v4838_v55 = vpop.eup %4837 }
 0x7cb   :  { %v4840_v60 = vpop.eup %4839  ;;  %v921_v61 = vsel %vm88_vm1, %v917_v53, 0.0  ;;  %v918_v62 = vmul.f32 %v4838_v55, %v5250_v52 }
 0x7cc   :  { %922 = vadd.xlane.f32.xlu0 %v921_v61  ;;  %v919_v1 = vmul.f32 %v4840_v60, %v5250_v52  ;;  %v4842_v2 = vpop.eup %4841 }
 0x7cd   :  { %v924_v63 = vsel %vm88_vm1, %v918_v62, 0.0  ;;  %v920_v17 = vmul.f32 %v4842_v2, %v5250_v52 }
 0x7ce   :  { %925 = vadd.xlane.f32.xlu1 %v924_v63  ;;  %v927_v15 = vsel %vm88_vm1, %v919_v1, 0.0 }
 0x7cf   :  { %v930_v20 = vsel %vm88_vm1, %v920_v17, 0.0 }
 0x7d2   :  { %928 = vadd.xlane.f32.xlu1 %v927_v15 }
 0x7d6   :  { %931 = vadd.xlane.f32.xlu1 %v930_v20 }
 0x855   :  { %v923_v21 = vpop.xlane.xlu0 %922 }
 0x856   :  { %v940_v27 = vrot.slane %v923_v21, %v5261_v16 }
 0x857   :  { %v926_v3 = vpop.xlane.xlu1 %925 }
 0x858   :  { %v944_v26 = vrot.slane %v926_v3, %v5261_v16 }
 0x85a   :  { %v953_v39 = vsel %vm450_vm2, %v944_v26, %v940_v27 }
 0x85b   :  { %v929_v22 = vpop.xlane.xlu1 %928 }
 0x85c   :  { %v948_v19 = vrot.slane %v929_v22, %v5261_v16 }
 0x85e   :  { %v954_v8 = vsel %vm452_vm3, %v948_v19, %v953_v39 }
 0x85f   :  { %v932_v28 = vpop.xlane.xlu1 %931 }
 0x860   :  { %v952_v36 = vrot.slane %v932_v28, %v5261_v16 }
 0x862   :  { %v955_v43 = vsel %vm454_vm4, %v952_v36, %v954_v8 }
 0x863   :  { %v957_v44 = vsel %vm457_vm5, %v955_v43, -inf }
 0x864   :  { %958 = vmax.xlane.f32.xlu1 %v957_v44 }
 0x8ed   :  { %v959_v45 = vpop.xlane.xlu1 %958 }
 0x8ee   :  { %v964_v46 = vrot.slane %v959_v45, %v5230_v33  ;;  %v968_v48 = vrot.slane %v959_v45, %v5274_v32  ;;  %v972_v49 = vrot.slane %v959_v45, %v5277_v34  ;;  %v976_v50 = vrot.slane %v959_v45, %v5280_v35 }
 0x8f0   :  { %v981_v51 = vsub.f32 %v923_v21, %v964_v46  ;;  %v982_v53 = vsub.f32 %v926_v3, %v968_v48  ;;  %v983_v55 = vsub.f32 %v929_v22, %v972_v49  ;;  %v984_v62 = vsub.f32 %v932_v28, %v976_v50 }
 0x8f2   :  { %v985_v60 = vmul.f32 1.442695, %v981_v51  ;;  %v987_v61 = vmul.f32 1.442695, %v982_v53  ;;  %v989_v63 = vmul.f32 1.442695, %v983_v55 }
 0x8f3   :  { %v991_v1 = vmul.f32 1.442695, %v984_v62 }
 0x8f4   :  { %4843 = vpow2.f32 %v985_v60 }
 0x8f5   :  { %4845 = vpow2.f32 %v987_v61 }
 0x8f6   :  { %4847 = vpow2.f32 %v989_v63 }
 0x8f7   :  { %4849 = vpow2.f32 %v991_v1 }
 0x901   :  { %v4844_v2 = vpop.eup %4843 }
 0x902   :  { %v4846_v15 = vpop.eup %4845  ;;  %998 = vperm.xlu1 %4795, %v4844_v2  }
 0x903   :  { %1001 = vperm.xlu0 %4796, %v4846_v15   ;;  %v4848_v17 = vpop.eup %4847 }
 0x904   :  { %v4850_v20 = vpop.eup %4849 }
 0x906   :  { %1004 = vperm.xlu1 %4795, %v4848_v17  }
 0x90a   :  { %1007 = vperm.xlu1 %4795, %v4850_v20  }
 0x97d   :  { %v999_v21 = vpop.permute.xlu1 %998 }
 0x97e   :  { %v1002_v3 = vpop.permute.xlu0 %1001  ;;  %v1012_v19 = vrot.slane %v999_v21, %v5261_v16 }
 0x97f   :  { %v1016_v26 = vrot.slane %v1002_v3, %v5261_v16 }
 0x981   :  { %v1005_v22 = vpop.permute.xlu1 %1004  ;;  %v1025_v39 = vsel %vm450_vm2, %v1016_v26, %v1012_v19 }
 0x982   :  { %v1020_v27 = vrot.slane %v1005_v22, %v5261_v16 }
 0x984   :  { %v1026_v8 = vsel %vm452_vm3, %v1020_v27, %v1025_v39 }
 0x985   :  { %v1008_v28 = vpop.permute.xlu1 %1007 }
 0x986   :  { %v1024_v36 = vrot.slane %v1008_v28, %v5261_v16 }
 0x988   :  { %v1027_v43 = vsel %vm454_vm4, %v1024_v36, %v1026_v8  ;;  %v5117_v8 = vmov 1  }
 0x989   :  { %v1029_v44 = vsel %vm457_vm5, %v1027_v43, 0.0  ;;  %4797 = vset.pattern.permute.xlu1 %v5117_v8 }
 0x98a   :  { %1030 = vadd.xlane.f32.xlu1 %v1029_v44 }
 0xa13   :  { %v1031_v45 = vpop.xlane.xlu1 %1030 }
 0xa14   :  { %4851 = vrcp.f32 %v1031_v45 }
 0xa21   :  { %v4852_v46 = vpop.eup %4851 }
 0xa22   :  { %v1037_v48 = vrot.slane %v4852_v46, %v5230_v33  ;;  %v1041_v49 = vrot.slane %v4852_v46, %v5274_v32  ;;  %v1045_v55 = vrot.slane %v4852_v46, %v5277_v34  ;;  %v1049_v62 = vrot.slane %v4852_v46, %v5280_v35 }
 0xa24   :  { %v1054_v50 = vmul.f32 %v4844_v2, %v1037_v48  ;;  %v1055_v53 = vmul.f32 %v4846_v15, %v1041_v49  ;;  %v1056_v61 = vmul.f32 %v4848_v17, %v1045_v55  ;;  %v1057_v1 = vmul.f32 %v4850_v20, %v1049_v62 }
 0xa26   :  { %v1058_v51 = vmul.f32 %v1054_v50, %v5307_v40  ;;  %v1059_v60 = vmul.f32 %v1055_v53, %v5302_v5  ;;  %v1060_v63 = vmul.f32 %v1056_v61, %v5309_v11  ;;  %v1061_v21 = vmul.f32 %v1057_v1, %v5315_v23 }
 0xa28   :  { %1067 = vperm.xlu0 %4796, %v1058_v51  }
 0xa2c   :  { %1070 = vperm.xlu0 %4796, %v1059_v60  }
 0xa30   :  { %1073 = vperm.xlu0 %4796, %v1060_v63  }
 0xa34   :  { %1076 = vperm.xlu0 %4796, %v1061_v21  }
 0xaa3   :  { %v1068_v2 = vpop.permute.xlu0 %1067 }
 0xaa4   :  { %v1081_v19 = vrot.slane %v1068_v2, %v5261_v16 }
 0xaa7   :  { %v1071_v3 = vpop.permute.xlu0 %1070 }
 0xaa8   :  { %v1085_v15 = vrot.slane %v1071_v3, %v5261_v16 }
 0xaaa   :  { %v1094_v28 = vsel %vm450_vm2, %v1085_v15, %v1081_v19 }
 0xaab   :  { %v1074_v22 = vpop.permute.xlu0 %1073 }
 0xaac   :  { %v1089_v26 = vrot.slane %v1074_v22, %v5261_v16 }
 0xaae   :  { %v1095_v20 = vsel %vm452_vm3, %v1089_v26, %v1094_v28 }
 0xaaf   :  { %v1077_v17 = vpop.permute.xlu0 %1076 }
 0xab0   :  { %v1093_v27 = vrot.slane %v1077_v17, %v5261_v16 }
 0xab2   :  { %v1096_v36 = vsel %vm454_vm4, %v1093_v27, %v1095_v20 }
 0xab3   :  { %v1098_v39 = vsel %vm457_vm5, %v1096_v36, 0.0 }
 0xab4   :  { %1099 = vadd.xlane.f32.xlu0 %v1098_v39 }
 0xb3d   :  { %v1100_v43 = vpop.xlane.xlu0 %1099 }
 0xb3e   :  { %v1101_v44 = vadd.f32 %v1100_v43, %v5353_v24 }
 0xb40   :  { %1104 = vperm.xlu1 %4797, %v1101_v44  }
 0xb44   :  { %4798 = vset.pattern.permute.xlu1 %v5113_v31 }
 0xbbb   :  { %v1105_v45 = vpop.permute.xlu1 %1104 }
 0xbbc   :  { %v1107_v46 = vmul.f32 %v5356_v30, %v1105_v45 }
 0xbbe   :  { %v1108_v48 = vadd.f32 %v5358_v38, %v1107_v46 }
 0xbc0   :  { %v1179_v49 = vadd.f32 %v5404_v18, %v1108_v48 }
 0xbc2   :  { %4853 = vtanh.f32 %v1179_v49  ;;  %v4321_v51 = vmul.f32 -1.442695, %v1179_v49 }
 0xbc4   :  { %4855 = vpow2.f32 %v4321_v51 }
 0xbcf   :  { %v4854_v50 = vpop.eup %4853 }
 0xbd0   :  { %1189 = vrot.lane.b32.xlu0 %v4854_v50, %s5114_s2 }
 0xbd1   :  { %v4856_v53 = vpop.eup %4855 }
 0xbd2   :  { %v1183_v55 = vadd.f32 1.0, %v4856_v53 }
 0xbd4   :  { %4857 = vrcp.f32 %v1183_v55 }
 0xbe1   :  { %v4858_v60 = vpop.eup %4857 }
 0xbe2   :  { %v1187_v63 = vmul.f32 %v4858_v60, %v5364_v59 }
 0xc42   :  { %v1190_v61 = vpop.permute.xlu0 %1189 }
 0xc43   :  { %v1192_v62 = vmul.f32 %v4858_v60, %v1190_v61 }
 0xc45   :  { %1194 = vrot.lane.b32.xlu1 %v1192_v62, %s5115_s28 }
 0xcb7   :  { %v1195_v1 = vpop.permute.xlu1 %1194 }
 0xcb8   :  { %v5470_v21 = vadd.f32 %v1195_v1, %v1187_v63 }
 0xcba   :  { %4859 = vtanh.f32 %v5470_v21 }
 0xcc7   :  { %v4860_v18 = vpop.eup %4859 }
 0xcc8   :  { %1200 = vrot.lane.b32.xlu1 %v4860_v18, %s5114_s2 }
 0xccc   :  { %1205 = vrot.lane.b32.xlu1 %v5470_v21, %s5116_s29 }
 0xd3a   :  { %v1201_v2 = vpop.permute.xlu1 %1200 }
 0xd3b   :  { %v1203_v3 = vmul.f32 %v4858_v60, %v1201_v2 }
 0xd3d   :  { %1280 = vrot.lane.b32.xlu1 %v1203_v3, %s5115_s28 }
 0xd3e   :  { %v1206_v22 = vpop.permute.xlu1 %1205 }
 0xd3f   :  { %4568 = vmatmul.mubr.msk.f32.vlgmr.msra.gmra.mxu1 %vm206_vm6, %v1206_v22 }
 0xd40   :  { %4582 = vmatpush3.msra.mxu1 %v5318_v54  ;;  %4589 = vmatprep.mubr.msk.f32.mxu1 %vm5111_vm0, %v5110_v0 }
 0xd41   :  { %4583 = vmatprep.subr.mxu1 %v5110_v0 }
 0xd42   :  { %4584 = vmatpush3.msra.mxu1 %v5320_v57 }
 0xd43   :  { %4585 = vmatprep.subr.mxu1 %v5110_v0 }
 0xd44   :  { %4586 = vmatpush3.msra.mxu1 %v5324_v58 }
 0xd45   :  { %4587 = vmatprep.subr.mxu1 %v5110_v0 }
 0xd46   :  { %4588 = vmatpush3.msra.mxu1 %v5328_v56 }
 0xd47   :  { %4603 = vmatprep.subr.mxu1 %v5110_v0 }
 0xdaf   :  { %v1281_v59 = vpop.permute.xlu1 %1280 }
 0xdb0   :  { %4579 = vmatmul.mubr.msk.f32.vlgmr.msra.gmra.mxu0 %vm206_vm6, %v1281_v59  ;;  %4590 = vmatmul.mubr.msk.f32.vlgmr.msra.gmra.mxu1 %vm206_vm6, %v1281_v59 }
 0xdb1   :  { %4593 = vmatpush3.msra.mxu0 %v5159_v4  ;;  %4600 = vmatprep.mubr.msk.f32.mxu0 %vm5111_vm0, %v5110_v0 }
 0xdb2   :  { %4594 = vmatprep.subr.mxu0 %v5110_v0  ;;  %4604 = vmatpush3.msra.mxu1 %v5167_v7 }
 0xdb3   :  { %4595 = vmatpush3.msra.mxu0 %v5164_v6  ;;  %4605 = vmatprep.subr.mxu1 %v5110_v0 }
 0xdb4   :  { %4596 = vmatprep.subr.mxu0 %v5110_v0  ;;  %4606 = vmatpush3.msra.mxu1 %v5175_v9 }
 0xdb5   :  { %4597 = vmatpush3.msra.mxu0 %v5177_v10  ;;  %4607 = vmatprep.subr.mxu1 %v5110_v0 }
 0xdb6   :  { %4598 = vmatprep.subr.mxu0 %v5110_v0  ;;  %4608 = vmatpush3.msra.mxu1 %v5186_v12 }
 0xdb7   :  { %4599 = vmatpush3.msra.mxu0 %v5190_v13  ;;  %4609 = vmatprep.subr.mxu1 %v5110_v0 }
 0xdb8   :  { %4614 = vmatprep.subr.mxu0 %v5110_v0  ;;  %4610 = vmatpush3.msra.mxu1 %v5195_v14 }
 0xdb9   :  { %4611 = vmatprep.mubr.msk.f32.mxu1 %vm5111_vm0, %v5110_v0  ;;  %4625 = vmatprep.subr.mxu1 %v5110_v0 }
 0xdff   :  { %v1275_v4 = vpop.f32.mrf.mxu1 }
 0xe01   :  { %v4569_v6 = vpop.f32.mrf.mxu1 }
 0xe70   :  { %v1350_v7 = vpop.f32.mrf.mxu0  ;;  %v5510_v9 = vpop.f32.mrf.mxu1 }
 0xe71   :  { %v1351_v10 = vadd.f32 %v1350_v7, %v1275_v4 }
 0xe72   :  { %v4580_v12 = vpop.f32.mrf.mxu0  ;;  %v4591_v15 = vpop.f32.mrf.mxu1 }
 0xe73   :  { %v1354_v13 = vadd.f32 %v5222_v25, %v1351_v10 }
 0xe75   :  { %v1362_v26 = vrot.slane %v1354_v13, %v5225_v29 }
 0xe77   :  { %v1363_v19 = vcombine.high %v1362_v26, %v1362_v26  ;;  %v1370_v14 = vrot.slane %v1362_v26, %v5225_v29 }
 0xe79   :  { %v1377_v17 = vrot.slane %v1363_v19, %v5225_v29  ;;  %v1378_v27 = vcombine.high %v1370_v14, %v1370_v14  ;;  %v1383_v28 = vrot.slane %v1370_v14, %v5230_v33 }
 0xe7b   :  { %v1379_v20 = vcombine.high %v1377_v17, %v1377_v17  ;;  %v1387_v36 = vrot.slane %v1377_v17, %v5230_v33  ;;  %v1391_v39 = vrot.slane %v1378_v27, %v5230_v33  ;;  %v1400_v8 = vadd.f32 %v1383_v28, %v5233_v37 }
 0xe7d   :  { %v1395_v43 = vrot.slane %v1379_v20, %v5230_v33  ;;  %v1401_v25 = vadd.f32 %v1387_v36, %v5237_v41  ;;  %v1402_v44 = vadd.f32 %v1391_v39, %v5239_v42  ;;  %4861 = vtanh.f32 %v1400_v8 }
 0xe7f   :  { %v1403_v45 = vadd.f32 %v1395_v43, %v5244_v47  ;;  %4863 = vtanh.f32 %v1401_v25 }
 0xe80   :  { %4865 = vtanh.f32 %v1402_v44 }
 0xe81   :  { %4867 = vtanh.f32 %v1403_v45 }
 0xe8a   :  { %v4862_v46 = vpop.eup %4861 }
 0xe8b   :  { %v1408_v48 = vmul.f32 %v4862_v46, %v5250_v52 }
 0xe8c   :  { %v4864_v49 = vpop.eup %4863 }
 0xe8d   :  { %v4866_v50 = vpop.eup %4865  ;;  %v1412_v51 = vsel %vm88_vm1, %v1408_v48, 0.0  ;;  %v1409_v53 = vmul.f32 %v4864_v49, %v5250_v52 }
 0xe8e   :  { %v4868_v55 = vpop.eup %4867  ;;  %1413 = vadd.xlane.f32.xlu1 %v1412_v51  ;;  %v1410_v62 = vmul.f32 %v4866_v50, %v5250_v52 }
 0xe8f   :  { %v1415_v60 = vsel %vm88_vm1, %v1409_v53, 0.0  ;;  %v1411_v61 = vmul.f32 %v4868_v55, %v5250_v52 }
 0xe90   :  { %1416 = vadd.xlane.f32.xlu0 %v1415_v60  ;;  %v1418_v1 = vsel %vm88_vm1, %v1410_v62, 0.0 }
 0xe91   :  { %v1421_v63 = vsel %vm88_vm1, %v1411_v61, 0.0 }
 0xe92   :  { %1422 = vadd.xlane.f32.xlu1 %v1421_v63 }
 0xe94   :  { %1419 = vadd.xlane.f32.xlu0 %v1418_v1 }
 0xf17   :  { %v1414_v18 = vpop.xlane.xlu1 %1413 }
 0xf18   :  { %v1431_v59 = vrot.slane %v1414_v18, %v5261_v16 }
 0xf19   :  { %v1417_v2 = vpop.xlane.xlu0 %1416 }
 0xf1a   :  { %v1435_v3 = vrot.slane %v1417_v2, %v5261_v16 }
 0xf1b   :  { %v1423_v22 = vpop.xlane.xlu1 %1422 }
 0xf1c   :  { %v1443_v7 = vrot.slane %v1423_v22, %v5261_v16  ;;  %v1444_v52 = vsel %vm450_vm2, %v1435_v3, %v1431_v59 }
 0xf1d   :  { %v1420_v4 = vpop.xlane.xlu0 %1419 }
 0xf1e   :  { %v1439_v6 = vrot.slane %v1420_v4, %v5261_v16 }
 0xf20   :  { %v1445_v10 = vsel %vm452_vm3, %v1439_v6, %v1444_v52 }
 0xf21   :  { %v1446_v12 = vsel %vm454_vm4, %v1443_v7, %v1445_v10 }
 0xf22   :  { %v1448_v15 = vsel %vm457_vm5, %v1446_v12, -inf }
 0xf23   :  { %1449 = vmax.xlane.f32.xlu0 %v1448_v15 }
 0xfac   :  { %v1450_v13 = vpop.xlane.xlu0 %1449 }
 0xfad   :  { %v1455_v26 = vrot.slane %v1450_v13, %v5230_v33  ;;  %v1459_v19 = vrot.slane %v1450_v13, %v5274_v32  ;;  %v1463_v14 = vrot.slane %v1450_v13, %v5277_v34  ;;  %v1467_v17 = vrot.slane %v1450_v13, %v5280_v35 }
 0xfaf   :  { %v1472_v27 = vsub.f32 %v1414_v18, %v1455_v26  ;;  %v1473_v28 = vsub.f32 %v1417_v2, %v1459_v19  ;;  %v1474_v20 = vsub.f32 %v1420_v4, %v1463_v14  ;;  %v1475_v8 = vsub.f32 %v1423_v22, %v1467_v17 }
 0xfb1   :  { %v1476_v36 = vmul.f32 1.442695, %v1472_v27  ;;  %v1478_v39 = vmul.f32 1.442695, %v1473_v28  ;;  %v1480_v43 = vmul.f32 1.442695, %v1474_v20 }
 0xfb2   :  { %v1482_v25 = vmul.f32 1.442695, %v1475_v8 }
 0xfb3   :  { %4869 = vpow2.f32 %v1476_v36 }
 0xfb4   :  { %4871 = vpow2.f32 %v1478_v39 }
 0xfb5   :  { %4873 = vpow2.f32 %v1480_v43 }
 0xfb6   :  { %4875 = vpow2.f32 %v1482_v25 }
 0xfc0   :  { %v4870_v44 = vpop.eup %4869 }
 0xfc1   :  { %v4872_v45 = vpop.eup %4871  ;;  %1489 = vperm.xlu1 %4798, %v4870_v44  }
 0xfc2   :  { %1492 = vperm.xlu0 %4796, %v4872_v45   ;;  %v4874_v46 = vpop.eup %4873 }
 0xfc3   :  { %v4876_v48 = vpop.eup %4875 }
 0xfc5   :  { %1495 = vperm.xlu1 %4798, %v4874_v46  }
 0xfc9   :  { %1498 = vperm.xlu1 %4798, %v4876_v48  }
0x103c   :  { %v1490_v49 = vpop.permute.xlu1 %1489 }
0x103d   :  { %v1493_v50 = vpop.permute.xlu0 %1492  ;;  %v1503_v55 = vrot.slane %v1490_v49, %v5261_v16 }
0x103e   :  { %v1507_v53 = vrot.slane %v1493_v50, %v5261_v16 }
0x1040   :  { %v1496_v51 = vpop.permute.xlu1 %1495  ;;  %v1516_v63 = vsel %vm450_vm2, %v1507_v53, %v1503_v55 }
0x1041   :  { %v1511_v60 = vrot.slane %v1496_v51, %v5261_v16 }
0x1043   :  { %v1517_v1 = vsel %vm452_vm3, %v1511_v60, %v1516_v63 }
0x1044   :  { %v1499_v61 = vpop.permute.xlu1 %1498 }
0x1045   :  { %v1515_v62 = vrot.slane %v1499_v61, %v5261_v16 }
0x1047   :  { %v1518_v18 = vsel %vm454_vm4, %v1515_v62, %v1517_v1 }
0x1048   :  { %v1520_v2 = vsel %vm457_vm5, %v1518_v18, 0.0 }
0x1049   :  { %1521 = vadd.xlane.f32.xlu0 %v1520_v2 }
0x10d2   :  { %v1522_v3 = vpop.xlane.xlu0 %1521 }
0x10d3   :  { %4877 = vrcp.f32 %v1522_v3 }
0x10e0   :  { %v4878_v22 = vpop.eup %4877 }
0x10e1   :  { %v1528_v59 = vrot.slane %v4878_v22, %v5230_v33  ;;  %v1532_v4 = vrot.slane %v4878_v22, %v5274_v32  ;;  %v1536_v10 = vrot.slane %v4878_v22, %v5277_v34  ;;  %v1540_v13 = vrot.slane %v4878_v22, %v5280_v35 }
0x10e3   :  { %v1545_v6 = vmul.f32 %v4870_v44, %v1528_v59  ;;  %v1546_v52 = vmul.f32 %v4872_v45, %v1532_v4  ;;  %v1547_v15 = vmul.f32 %v4874_v46, %v1536_v10  ;;  %v1548_v19 = vmul.f32 %v4876_v48, %v1540_v13  ;;  %v5621_v10 = vld [vmem:[#allocation6 + $0x50] sm:$0xff] }
0x10e4   :  { %v5118_v48 = vmov 2  }
0x10e5   :  { %v1549_v7 = vmul.f32 %v1545_v6, %v5307_v40  ;;  %v1550_v12 = vmul.f32 %v1546_v52, %v5302_v5  ;;  %v1551_v26 = vmul.f32 %v1547_v15, %v5309_v11  ;;  %v1552_v14 = vmul.f32 %v1548_v19, %v5315_v23  ;;  %4799 = vset.pattern.permute.xlu0 %v5118_v48  ;;  %v5610_v6 = vld [vmem:[#allocation6 + $0x40] sm:$0xff]  ;;  %v5618_v52 = vld [vmem:[#allocation6 + $0x38] sm:$0xff] }
0x10e7   :  { %1558 = vperm.xlu1 %4798, %v1549_v7   ;;  %v5613_v7 = vld [vmem:[#allocation6 + $0x58] sm:$0xff] }
0x10eb   :  { %1561 = vperm.xlu1 %4798, %v1550_v12   ;;  %v5626_v12 = vld [vmem:[#allocation6 + $0x30] sm:$0xff] }
0x10ef   :  { %1564 = vperm.xlu1 %4798, %v1551_v26  }
0x10f3   :  { %1567 = vperm.xlu1 %4798, %v1552_v14  }
0x1162   :  { %v1559_v17 = vpop.permute.xlu1 %1558 }
0x1163   :  { %v1572_v39 = vrot.slane %v1559_v17, %v5261_v16 }
0x1166   :  { %v1562_v27 = vpop.permute.xlu1 %1561 }
0x1167   :  { %v1576_v20 = vrot.slane %v1562_v27, %v5261_v16 }
0x1169   :  { %v1585_v25 = vsel %vm450_vm2, %v1576_v20, %v1572_v39 }
0x116a   :  { %v1565_v28 = vpop.permute.xlu1 %1564 }
0x116b   :  { %v1580_v36 = vrot.slane %v1565_v28, %v5261_v16  ;;  %v5634_v28 = vld [vmem:[#allocation6 + $0x70] ss:$0 sm:$0xff] }
0x116d   :  { %v1586_v44 = vsel %vm452_vm3, %v1580_v36, %v1585_v25 }
0x116e   :  { %v1568_v8 = vpop.permute.xlu1 %1567 }
0x116f   :  { %v1584_v43 = vrot.slane %v1568_v8, %v5261_v16 }
0x1171   :  { %v1587_v45 = vsel %vm454_vm4, %v1584_v43, %v1586_v44 }
0x1172   :  { %v1589_v46 = vsel %vm457_vm5, %v1587_v45, 0.0 }
0x1173   :  { %1590 = vadd.xlane.f32.xlu1 %v1589_v46 }
0x11fc   :  { %v1591_v49 = vpop.xlane.xlu1 %1590 }
0x11fd   :  { %v1592_v50 = vadd.f32 %v1591_v49, %v5353_v24 }
0x11ff   :  { %1595 = vperm.xlu0 %4799, %v1592_v50  }
0x1203   :  { %4800 = vset.pattern.permute.xlu0 %v5113_v31 }
0x127a   :  { %v1596_v51 = vpop.permute.xlu0 %1595 }
0x127b   :  { %v1598_v53 = vmul.f32 %v5356_v30, %v1596_v51 }
0x127d   :  { %v1599_v55 = vadd.f32 %v5358_v38, %v1598_v53 }
0x127f   :  { %v1670_v60 = vadd.f32 %v5510_v9, %v1599_v55 }
0x1281   :  { %4879 = vtanh.f32 %v1670_v60  ;;  %v4325_v62 = vmul.f32 -1.442695, %v1670_v60 }
0x1283   :  { %4881 = vpow2.f32 %v4325_v62 }
0x128e   :  { %v4880_v61 = vpop.eup %4879 }
0x128f   :  { %1680 = vrot.lane.b32.xlu1 %v4880_v61, %s5114_s2  ;;  %v5648_v61 = vld [vmem:[#allocation6 + $0x90] ss:$0 sm:$0xff] }
0x1290   :  { %v4882_v63 = vpop.eup %4881 }
0x1291   :  { %v1674_v1 = vadd.f32 1.0, %v4882_v63 }
0x1293   :  { %4883 = vrcp.f32 %v1674_v1 }
0x12a0   :  { %v4884_v18 = vpop.eup %4883 }
0x12a1   :  { %v1678_v30 = vmul.f32 %v4884_v18, %v5470_v21 }
0x1301   :  { %v1681_v2 = vpop.permute.xlu1 %1680 }
0x1302   :  { %v1683_v3 = vmul.f32 %v4884_v18, %v1681_v2 }
0x1304   :  { %1685 = vrot.lane.b32.xlu1 %v1683_v3, %s5115_s28 }
0x1376   :  { %v1686_v22 = vpop.permute.xlu1 %1685 }
0x1377   :  { %v5576_v38 = vadd.f32 %v1686_v22, %v1678_v30 }
0x1379   :  { %4885 = vtanh.f32 %v5576_v38  ;;  %1696 = vrot.lane.b32.xlu0 %v5576_v38, %s5116_s29 }
0x1386   :  { %v4886_v9 = vpop.eup %4885 }
0x1387   :  { %1691 = vrot.lane.b32.xlu1 %v4886_v9, %s5114_s2 }
0x13eb   :  { %v1697_v59 = vpop.permute.xlu0 %1696 }
0x13ec   :  { %4601 = vmatmul.mubr.msk.f32.vlgmr.msra.gmra.mxu0 %vm206_vm6, %v1697_v59 }
0x13ed   :  { %4615 = vmatpush3.msra.mxu0 %v5318_v54  ;;  %4622 = vmatprep.mubr.msk.f32.mxu0 %vm5111_vm0, %v5110_v0 }
0x13ee   :  { %4616 = vmatprep.subr.mxu0 %v5110_v0 }
0x13ef   :  { %4617 = vmatpush3.msra.mxu0 %v5320_v57  ;;  %v5596_v57 = vld [vmem:[#allocation6 + $0x68] sm:$0xff] }
0x13f0   :  { %4618 = vmatprep.subr.mxu0 %v5110_v0 }
0x13f1   :  { %4619 = vmatpush3.msra.mxu0 %v5324_v58  ;;  %v5602_v58 = vld [vmem:[#allocation6 + $0x48] sm:$0xff] }
0x13f2   :  { %4620 = vmatprep.subr.mxu0 %v5110_v0 }
0x13f3   :  { %4621 = vmatpush3.msra.mxu0 %v5328_v56  ;;  %v5605_v56 = vld [vmem:[#allocation6 + $0x60] sm:$0xff] }
0x13f4   :  { %4636 = vmatprep.subr.mxu0 %v5110_v0 }
0x13f9   :  { %v1692_v21 = vpop.permute.xlu1 %1691 }
0x13fa   :  { %v1694_v4 = vmul.f32 %v4884_v18, %v1692_v21 }
0x13fc   :  { %1771 = vrot.lane.b32.xlu1 %v1694_v4, %s5115_s28 }
0x146e   :  { %v1772_v54 = vpop.permute.xlu1 %1771 }
0x146f   :  { %4612 = vmatmul.mubr.msk.f32.vlgmr.msra.gmra.mxu1 %vm206_vm6, %v1772_v54  ;;  %4623 = vmatmul.mubr.msk.f32.vlgmr.msra.gmra.mxu0 %vm206_vm6, %v1772_v54 }
0x1470   :  { %4626 = vmatpush3.msra.mxu1 %v5596_v57  ;;  %4633 = vmatprep.mubr.msk.f32.mxu1 %vm5111_vm0, %v5110_v0 }
0x1471   :  { %4627 = vmatprep.subr.mxu1 %v5110_v0  ;;  %4637 = vmatpush3.msra.mxu0 %v5602_v58 }
0x1472   :  { %4628 = vmatpush3.msra.mxu1 %v5605_v56  ;;  %4638 = vmatprep.subr.mxu0 %v5110_v0 }
0x1473   :  { %4629 = vmatprep.subr.mxu1 %v5110_v0  ;;  %4639 = vmatpush3.msra.mxu0 %v5610_v6 }
0x1474   :  { %4630 = vmatpush3.msra.mxu1 %v5613_v7  ;;  %4640 = vmatprep.subr.mxu0 %v5110_v0 }
0x1475   :  { %4631 = vmatprep.subr.mxu1 %v5110_v0  ;;  %4641 = vmatpush3.msra.mxu0 %v5618_v52 }
0x1476   :  { %4632 = vmatpush3.msra.mxu1 %v5621_v10  ;;  %4642 = vmatprep.subr.mxu0 %v5110_v0 }
0x1477   :  { %4647 = vmatprep.subr.mxu1 %v5110_v0  ;;  %4643 = vmatpush3.msra.mxu0 %v5626_v12 }
0x1478   :  { %4644 = vmatprep.mubr.msk.f32.mxu0 %vm5111_vm0, %v5110_v0  ;;  %4658 = vmatprep.subr.mxu0 %v5110_v0 }
0x14ac   :  { %v1766_v15 = vpop.f32.mrf.mxu0 }
0x14ae   :  { %v4602_v13 = vpop.f32.mrf.mxu0 }
0x152f   :  { %v1841_v26 = vpop.f32.mrf.mxu1  ;;  %v5632_v19 = vpop.f32.mrf.mxu0 }
0x1530   :  { %v1842_v14 = vadd.f32 %v1841_v26, %v1766_v15 }
0x1531   :  { %v4613_v17 = vpop.f32.mrf.mxu1  ;;  %v4624_v27 = vpop.f32.mrf.mxu0 }
0x1532   :  { %v1845_v20 = vadd.f32 %v5634_v28, %v1842_v14 }
0x1534   :  { %v1853_v36 = vrot.slane %v1845_v20, %v5225_v29 }
0x1536   :  { %v1854_v39 = vcombine.high %v1853_v36, %v1853_v36  ;;  %v1861_v8 = vrot.slane %v1853_v36, %v5225_v29 }
0x1538   :  { %v1868_v43 = vrot.slane %v1854_v39, %v5225_v29  ;;  %v1869_v25 = vcombine.high %v1861_v8, %v1861_v8  ;;  %v1874_v44 = vrot.slane %v1861_v8, %v5230_v33 }
0x153a   :  { %v1870_v45 = vcombine.high %v1868_v43, %v1868_v43  ;;  %v1878_v46 = vrot.slane %v1868_v43, %v5230_v33  ;;  %v1882_v48 = vrot.slane %v1869_v25, %v5230_v33  ;;  %v1891_v49 = vadd.f32 %v1874_v44, %v5233_v37 }
0x153c   :  { %v1886_v50 = vrot.slane %v1870_v45, %v5230_v33  ;;  %v1892_v51 = vadd.f32 %v1878_v46, %v5237_v41  ;;  %v1893_v53 = vadd.f32 %v1882_v48, %v5239_v42  ;;  %4887 = vtanh.f32 %v1891_v49 }
0x153e   :  { %v1894_v55 = vadd.f32 %v1886_v50, %v5244_v47  ;;  %4889 = vtanh.f32 %v1892_v51 }
0x153f   :  { %4891 = vtanh.f32 %v1893_v53 }
0x1540   :  { %4893 = vtanh.f32 %v1894_v55 }
0x1549   :  { %v4888_v60 = vpop.eup %4887 }
0x154a   :  { %v1899_v62 = vmul.f32 %v5648_v61, %v4888_v60 }
0x154b   :  { %v4890_v63 = vpop.eup %4889 }
0x154c   :  { %v4892_v1 = vpop.eup %4891  ;;  %v1903_v18 = vsel %vm88_vm1, %v1899_v62, 0.0  ;;  %v1900_v2 = vmul.f32 %v5648_v61, %v4890_v63 }
0x154d   :  { %v4894_v3 = vpop.eup %4893  ;;  %1904 = vadd.xlane.f32.xlu0 %v1903_v18  ;;  %v1901_v30 = vmul.f32 %v5648_v61, %v4892_v1 }
0x154e   :  { %v1906_v22 = vsel %vm88_vm1, %v1900_v2, 0.0  ;;  %v1902_v59 = vmul.f32 %v5648_v61, %v4894_v3 }
0x154f   :  { %1907 = vadd.xlane.f32.xlu1 %v1906_v22  ;;  %v1909_v9 = vsel %vm88_vm1, %v1901_v30, 0.0 }
0x1550   :  { %v1912_v21 = vsel %vm88_vm1, %v1902_v59, 0.0 }
0x1551   :  { %1910 = vadd.xlane.f32.xlu0 %v1909_v9 }
0x1555   :  { %1913 = vadd.xlane.f32.xlu0 %v1912_v21 }
0x15d6   :  { %v1905_v4 = vpop.xlane.xlu0 %1904 }
0x15d7   :  { %v1922_v26 = vrot.slane %v1905_v4, %v5261_v16 }
0x15d8   :  { %v1908_v54 = vpop.xlane.xlu1 %1907 }
0x15d9   :  { %v1926_v15 = vrot.slane %v1908_v54, %v5261_v16 }
0x15da   :  { %v1911_v13 = vpop.xlane.xlu0 %1910 }
0x15db   :  { %v1930_v14 = vrot.slane %v1911_v13, %v5261_v16  ;;  %v1935_v17 = vsel %vm450_vm2, %v1926_v15, %v1922_v26 }
0x15dd   :  { %v1936_v36 = vsel %vm452_vm3, %v1930_v14, %v1935_v17 }
0x15de   :  { %v1914_v27 = vpop.xlane.xlu0 %1913 }
0x15df   :  { %v1934_v20 = vrot.slane %v1914_v27, %v5261_v16 }
0x15e1   :  { %v1937_v39 = vsel %vm454_vm4, %v1934_v20, %v1936_v36 }
0x15e2   :  { %v1939_v8 = vsel %vm457_vm5, %v1937_v39, -inf }
0x15e3   :  { %1940 = vmax.xlane.f32.xlu0 %v1939_v8 }
0x166c   :  { %v1941_v43 = vpop.xlane.xlu0 %1940 }
0x166d   :  { %v1946_v25 = vrot.slane %v1941_v43, %v5230_v33  ;;  %v1950_v44 = vrot.slane %v1941_v43, %v5274_v32  ;;  %v1954_v45 = vrot.slane %v1941_v43, %v5277_v34  ;;  %v1958_v46 = vrot.slane %v1941_v43, %v5280_v35 }
0x166f   :  { %v1963_v48 = vsub.f32 %v1905_v4, %v1946_v25  ;;  %v1964_v49 = vsub.f32 %v1908_v54, %v1950_v44  ;;  %v1965_v50 = vsub.f32 %v1911_v13, %v1954_v45  ;;  %v1966_v55 = vsub.f32 %v1914_v27, %v1958_v46 }
0x1671   :  { %v1967_v51 = vmul.f32 1.442695, %v1963_v48  ;;  %v1969_v53 = vmul.f32 1.442695, %v1964_v49  ;;  %v1971_v60 = vmul.f32 1.442695, %v1965_v50 }
0x1672   :  { %v1973_v62 = vmul.f32 1.442695, %v1966_v55 }
0x1673   :  { %4895 = vpow2.f32 %v1967_v51 }
0x1674   :  { %4897 = vpow2.f32 %v1969_v53 }
0x1675   :  { %4899 = vpow2.f32 %v1971_v60 }
0x1676   :  { %4901 = vpow2.f32 %v1973_v62 }
0x1680   :  { %v4896_v63 = vpop.eup %4895 }
0x1681   :  { %v4898_v1 = vpop.eup %4897  ;;  %1980 = vperm.xlu1 %4798, %v4896_v63  }
0x1682   :  { %1983 = vperm.xlu0 %4800, %v4898_v1   ;;  %v4900_v18 = vpop.eup %4899 }
0x1683   :  { %v4902_v2 = vpop.eup %4901 }
0x1685   :  { %1986 = vperm.xlu1 %4798, %v4900_v18  }
0x1689   :  { %1989 = vperm.xlu1 %4798, %v4902_v2  }
0x16fc   :  { %v1981_v3 = vpop.permute.xlu1 %1980 }
0x16fd   :  { %v1984_v30 = vpop.permute.xlu0 %1983  ;;  %v1994_v59 = vrot.slane %v1981_v3, %v5261_v16 }
0x16fe   :  { %v1998_v9 = vrot.slane %v1984_v30, %v5261_v16 }
0x1700   :  { %v1987_v22 = vpop.permute.xlu1 %1986  ;;  %v2007_v15 = vsel %vm450_vm2, %v1998_v9, %v1994_v59  ;;  %v5119_v9 = vmov 3  }
0x1701   :  { %v2002_v21 = vrot.slane %v1987_v22, %v5261_v16 }
0x1703   :  { %v2008_v13 = vsel %vm452_vm3, %v2002_v21, %v2007_v15 }
0x1704   :  { %v1990_v4 = vpop.permute.xlu1 %1989 }
0x1705   :  { %v2006_v54 = vrot.slane %v1990_v4, %v5261_v16 }
0x1707   :  { %v2009_v26 = vsel %vm454_vm4, %v2006_v54, %v2008_v13  ;;  %v5696_v54 = vld [vmem:[#allocation6 + $0x20] ss:$0 sm:$0xff]  ;;  %v5699_v13 = vld [vmem:[#allocation6 + $0x28] ss:$0 sm:$0xff] }
0x1708   :  { %v2011_v14 = vsel %vm457_vm5, %v2009_v26, 0.0 }
0x1709   :  { %2012 = vadd.xlane.f32.xlu1 %v2011_v14 }
0x1792   :  { %v2013_v17 = vpop.xlane.xlu1 %2012 }
0x1793   :  { %4903 = vrcp.f32 %v2013_v17 }
0x17a0   :  { %v4904_v27 = vpop.eup %4903 }
0x17a1   :  { %v2019_v20 = vrot.slane %v4904_v27, %v5230_v33  ;;  %v2023_v36 = vrot.slane %v4904_v27, %v5274_v32  ;;  %v2027_v25 = vrot.slane %v4904_v27, %v5277_v34  ;;  %v2031_v46 = vrot.slane %v4904_v27, %v5280_v35 }
0x17a3   :  { %v2036_v39 = vmul.f32 %v4896_v63, %v2019_v20  ;;  %v2037_v43 = vmul.f32 %v4898_v1, %v2023_v36  ;;  %v2038_v45 = vmul.f32 %v4900_v18, %v2027_v25  ;;  %v2039_v49 = vmul.f32 %v4902_v2, %v2031_v46 }
0x17a5   :  { %v2040_v8 = vmul.f32 %v2036_v39, %v5307_v40  ;;  %v2041_v44 = vmul.f32 %v2037_v43, %v5302_v5  ;;  %v2042_v48 = vmul.f32 %v2038_v45, %v5309_v11  ;;  %v2043_v50 = vmul.f32 %v2039_v49, %v5315_v23 }
0x17a7   :  { %2049 = vperm.xlu0 %4800, %v2040_v8  }
0x17ab   :  { %2052 = vperm.xlu0 %4800, %v2041_v44  }
0x17af   :  { %2055 = vperm.xlu0 %4800, %v2042_v48  }
0x17b3   :  { %2058 = vperm.xlu0 %4800, %v2043_v50   ;;  %v5714_v50 = vld [vmem:[#allocation6 + $0x18] sm:$0xff] }
0x17b7   :  { %4801 = vset.pattern.permute.xlu0 %v5119_v9 }
0x1822   :  { %v2050_v51 = vpop.permute.xlu0 %2049 }
0x1823   :  { %v2063_v63 = vrot.slane %v2050_v51, %v5261_v16  ;;  %v5724_v51 = vld [vmem:[#allocation6 + $0x8] sm:$0xff] }
0x1826   :  { %v2053_v53 = vpop.permute.xlu0 %2052 }
0x1827   :  { %v2067_v60 = vrot.slane %v2053_v53, %v5261_v16  ;;  %v5728_v53 = vld [vmem:[#allocation6] sm:$0xff] }
0x1829   :  { %v2076_v18 = vsel %vm450_vm2, %v2067_v60, %v2063_v63 }
0x182a   :  { %v2056_v55 = vpop.permute.xlu0 %2055 }
0x182b   :  { %v2071_v62 = vrot.slane %v2056_v55, %v5261_v16 }
0x182d   :  { %v2077_v2 = vsel %vm452_vm3, %v2071_v62, %v2076_v18 }
0x182e   :  { %v2059_v1 = vpop.permute.xlu0 %2058 }
0x182f   :  { %v2075_v3 = vrot.slane %v2059_v1, %v5261_v16 }
0x1831   :  { %v2078_v30 = vsel %vm454_vm4, %v2075_v3, %v2077_v2 }
0x1832   :  { %v2080_v22 = vsel %vm457_vm5, %v2078_v30, 0.0 }
0x1833   :  { %2081 = vadd.xlane.f32.xlu1 %v2080_v22 }
0x18bc   :  { %v2082_v59 = vpop.xlane.xlu1 %2081 }
0x18bd   :  { %v2083_v21 = vadd.f32 %v2082_v59, %v5353_v24 }
0x18bf   :  { %2086 = vperm.xlu0 %4801, %v2083_v21  }
0x18c3   :  { %4802 = vset.pattern.permute.xlu0 %v5113_v31 }
0x193a   :  { %v2087_v4 = vpop.permute.xlu0 %2086 }
0x193b   :  { %v2089_v15 = vmul.f32 %v5696_v54, %v2087_v4 }
0x193d   :  { %v2090_v26 = vadd.f32 %v5699_v13, %v2089_v15 }
0x193f   :  { %v2161_v14 = vadd.f32 %v5632_v19, %v2090_v26 }
0x1941   :  { %4905 = vtanh.f32 %v2161_v14  ;;  %v4329_v27 = vmul.f32 -1.442695, %v2161_v14 }
0x1943   :  { %4907 = vpow2.f32 %v4329_v27 }
0x194e   :  { %v4906_v17 = vpop.eup %4905 }
0x194f   :  { %2171 = vrot.lane.b32.xlu1 %v4906_v17, %s5114_s2 }
0x1950   :  { %v4908_v20 = vpop.eup %4907 }
0x1951   :  { %v2165_v36 = vadd.f32 1.0, %v4908_v20 }
0x1953   :  { %4909 = vrcp.f32 %v2165_v36 }
0x1960   :  { %v4910_v39 = vpop.eup %4909 }
0x1961   :  { %v2169_v25 = vmul.f32 %v4910_v39, %v5576_v38  ;;  %v5720_v38 = vld [vmem:[#allocation6 + $0x10] sm:$0xff] }
0x19c1   :  { %v2172_v8 = vpop.permute.xlu1 %2171 }
0x19c2   :  { %v2174_v43 = vmul.f32 %v4910_v39, %v2172_v8 }
0x19c4   :  { %2176 = vrot.lane.b32.xlu0 %v2174_v43, %s5115_s28 }
0x1a36   :  { %v2177_v44 = vpop.permute.xlu0 %2176 }
0x1a37   :  { %v5706_v45 = vadd.f32 %v2177_v44, %v2169_v25 }
0x1a39   :  { %4911 = vtanh.f32 %v5706_v45 }
0x1a46   :  { %v4912_v19 = vpop.eup %4911 }
0x1a47   :  { %2182 = vrot.lane.b32.xlu0 %v4912_v19, %s5114_s2 }
0x1a4b   :  { %2187 = vrot.lane.b32.xlu0 %v5706_v45, %s5116_s29 }
0x1ab9   :  { %v2183_v46 = vpop.permute.xlu0 %2182 }
0x1aba   :  { %v2185_v48 = vmul.f32 %v4910_v39, %v2183_v46 }
0x1abc   :  { %2262 = vrot.lane.b32.xlu1 %v2185_v48, %s5115_s28 }
0x1abd   :  { %v2188_v49 = vpop.permute.xlu0 %2187 }
0x1abe   :  { %4634 = vmatmul.mubr.msk.f32.vlgmr.msra.gmra.mxu1 %vm206_vm6, %v2188_v49 }
0x1abf   :  { %4648 = vmatpush3.msra.mxu1 %v5714_v50  ;;  %4655 = vmatprep.mubr.msk.f32.mxu1 %vm5111_vm0, %v5110_v0 }
0x1ac0   :  { %4649 = vmatprep.subr.mxu1 %v5110_v0 }
0x1ac1   :  { %4650 = vmatpush3.msra.mxu1 %v5720_v38 }
0x1ac2   :  { %4651 = vmatprep.subr.mxu1 %v5110_v0 }
0x1ac3   :  { %4652 = vmatpush3.msra.mxu1 %v5724_v51 }
0x1ac4   :  { %4653 = vmatprep.subr.mxu1 %v5110_v0 }
0x1ac5   :  { %4654 = vmatpush3.msra.mxu1 %v5728_v53 }
0x1ac6   :  { %4669 = vmatprep.subr.mxu1 %v5110_v0 }
0x1b2e   :  { %v2263_v55 = vpop.permute.xlu1 %2262 }
0x1b2f   :  { %4645 = vmatmul.mubr.msk.f32.vlgmr.msra.gmra.mxu0 %vm206_vm6, %v2263_v55  ;;  %4656 = vmatmul.mubr.msk.f32.vlgmr.msra.gmra.mxu1 %vm206_vm6, %v2263_v55 }
0x1b30   :  { %4659 = vmatpush3.msra.mxu0 %v5596_v57  ;;  %4666 = vmatprep.mubr.msk.f32.mxu0 %vm5111_vm0, %v5110_v0 }
0x1b31   :  { %4660 = vmatprep.subr.mxu0 %v5110_v0  ;;  %4670 = vmatpush3.msra.mxu1 %v5602_v58 }
0x1b32   :  { %4661 = vmatpush3.msra.mxu0 %v5605_v56  ;;  %4671 = vmatprep.subr.mxu1 %v5110_v0 }
0x1b33   :  { %4662 = vmatprep.subr.mxu0 %v5110_v0  ;;  %4672 = vmatpush3.msra.mxu1 %v5610_v6 }
0x1b34   :  { %4663 = vmatpush3.msra.mxu0 %v5613_v7  ;;  %4673 = vmatprep.subr.mxu1 %v5110_v0 }
0x1b35   :  { %4664 = vmatprep.subr.mxu0 %v5110_v0  ;;  %4674 = vmatpush3.msra.mxu1 %v5618_v52 }
0x1b36   :  { %4665 = vmatpush3.msra.mxu0 %v5621_v10  ;;  %4675 = vmatprep.subr.mxu1 %v5110_v0 }
0x1b37   :  { %4680 = vmatprep.subr.mxu0 %v5110_v0  ;;  %4676 = vmatpush3.msra.mxu1 %v5626_v12 }
0x1b38   :  { %4677 = vmatprep.mubr.msk.f32.mxu1 %vm5111_vm0, %v5110_v0  ;;  %4691 = vmatprep.subr.mxu1 %v5110_v0 }
0x1b7e   :  { %v2257_v60 = vpop.f32.mrf.mxu1 }
0x1b80   :  { %v4635_v62 = vpop.f32.mrf.mxu1 }
0x1bef   :  { %v2332_v63 = vpop.f32.mrf.mxu0  ;;  %v5754_v1 = vpop.f32.mrf.mxu1 }
0x1bf0   :  { %v2333_v18 = vadd.f32 %v2332_v63, %v2257_v60 }
0x1bf1   :  { %v4646_v3 = vpop.f32.mrf.mxu0  ;;  %v4657_v2 = vpop.f32.mrf.mxu1 }
0x1bf2   :  { %v2336_v30 = vadd.f32 %v5634_v28, %v2333_v18 }
0x1bf4   :  { %v2344_v22 = vrot.slane %v2336_v30, %v5225_v29 }
0x1bf6   :  { %v2345_v9 = vcombine.high %v2344_v22, %v2344_v22  ;;  %v2352_v59 = vrot.slane %v2344_v22, %v5225_v29 }
0x1bf8   :  { %v2359_v21 = vrot.slane %v2345_v9, %v5225_v29  ;;  %v2360_v4 = vcombine.high %v2352_v59, %v2352_v59  ;;  %v2365_v15 = vrot.slane %v2352_v59, %v5230_v33 }
0x1bfa   :  { %v2361_v26 = vcombine.high %v2359_v21, %v2359_v21  ;;  %v2369_v14 = vrot.slane %v2359_v21, %v5230_v33  ;;  %v2373_v17 = vrot.slane %v2360_v4, %v5230_v33  ;;  %v2382_v27 = vadd.f32 %v2365_v15, %v5233_v37 }
0x1bfc   :  { %v2377_v20 = vrot.slane %v2361_v26, %v5230_v33  ;;  %v2383_v36 = vadd.f32 %v2369_v14, %v5237_v41  ;;  %v2384_v39 = vadd.f32 %v2373_v17, %v5239_v42  ;;  %4913 = vtanh.f32 %v2382_v27 }
0x1bfe   :  { %v2385_v8 = vadd.f32 %v2377_v20, %v5244_v47  ;;  %4915 = vtanh.f32 %v2383_v36 }
0x1bff   :  { %4917 = vtanh.f32 %v2384_v39 }
0x1c00   :  { %4919 = vtanh.f32 %v2385_v8 }
0x1c09   :  { %v4914_v43 = vpop.eup %4913 }
0x1c0a   :  { %v2390_v25 = vmul.f32 %v5648_v61, %v4914_v43 }
0x1c0b   :  { %v4916_v44 = vpop.eup %4915 }
0x1c0c   :  { %v4918_v19 = vpop.eup %4917  ;;  %v2394_v46 = vsel %vm88_vm1, %v2390_v25, 0.0  ;;  %v2391_v48 = vmul.f32 %v5648_v61, %v4916_v44 }
0x1c0d   :  { %v4920_v49 = vpop.eup %4919  ;;  %2395 = vadd.xlane.f32.xlu0 %v2394_v46  ;;  %v2392_v55 = vmul.f32 %v5648_v61, %v4918_v19 }
0x1c0e   :  { %v2397_v60 = vsel %vm88_vm1, %v2391_v48, 0.0  ;;  %v2393_v63 = vmul.f32 %v5648_v61, %v4920_v49 }
0x1c0f   :  { %2398 = vadd.xlane.f32.xlu1 %v2397_v60  ;;  %v2400_v62 = vsel %vm88_vm1, %v2392_v55, 0.0 }
0x1c10   :  { %v2403_v18 = vsel %vm88_vm1, %v2393_v63, 0.0 }
0x1c11   :  { %2401 = vadd.xlane.f32.xlu0 %v2400_v62 }
0x1c15   :  { %2404 = vadd.xlane.f32.xlu0 %v2403_v18 }
0x1c96   :  { %v2396_v3 = vpop.xlane.xlu0 %2395 }
0x1c97   :  { %v2413_v9 = vrot.slane %v2396_v3, %v5261_v16 }
0x1c98   :  { %v2399_v2 = vpop.xlane.xlu1 %2398 }
0x1c99   :  { %v2417_v30 = vrot.slane %v2399_v2, %v5261_v16 }
0x1c9a   :  { %v2402_v22 = vpop.xlane.xlu0 %2401 }
0x1c9b   :  { %v2421_v59 = vrot.slane %v2402_v22, %v5261_v16  ;;  %v2426_v21 = vsel %vm450_vm2, %v2417_v30, %v2413_v9 }
0x1c9d   :  { %v2427_v26 = vsel %vm452_vm3, %v2421_v59, %v2426_v21 }
0x1c9e   :  { %v2405_v4 = vpop.xlane.xlu0 %2404 }
0x1c9f   :  { %v2425_v15 = vrot.slane %v2405_v4, %v5261_v16 }
0x1ca1   :  { %v2428_v14 = vsel %vm454_vm4, %v2425_v15, %v2427_v26 }
0x1ca2   :  { %v2430_v17 = vsel %vm457_vm5, %v2428_v14, -inf }
0x1ca3   :  { %2431 = vmax.xlane.f32.xlu1 %v2430_v17 }
0x1d2c   :  { %v2432_v27 = vpop.xlane.xlu1 %2431 }
0x1d2d   :  { %v2437_v20 = vrot.slane %v2432_v27, %v5230_v33  ;;  %v2441_v36 = vrot.slane %v2432_v27, %v5274_v32  ;;  %v2445_v39 = vrot.slane %v2432_v27, %v5277_v34  ;;  %v2449_v25 = vrot.slane %v2432_v27, %v5280_v35 }
0x1d2f   :  { %v2454_v8 = vsub.f32 %v2396_v3, %v2437_v20  ;;  %v2455_v43 = vsub.f32 %v2399_v2, %v2441_v36  ;;  %v2456_v44 = vsub.f32 %v2402_v22, %v2445_v39  ;;  %v2457_v48 = vsub.f32 %v2405_v4, %v2449_v25 }
0x1d31   :  { %v2458_v19 = vmul.f32 1.442695, %v2454_v8  ;;  %v2460_v46 = vmul.f32 1.442695, %v2455_v43  ;;  %v2462_v49 = vmul.f32 1.442695, %v2456_v44 }
0x1d32   :  { %v2464_v55 = vmul.f32 1.442695, %v2457_v48 }
0x1d33   :  { %4921 = vpow2.f32 %v2458_v19 }
0x1d34   :  { %4923 = vpow2.f32 %v2460_v46 }
0x1d35   :  { %4925 = vpow2.f32 %v2462_v49 }
0x1d36   :  { %4927 = vpow2.f32 %v2464_v55 }
0x1d40   :  { %v4922_v60 = vpop.eup %4921 }
0x1d41   :  { %v4924_v62 = vpop.eup %4923  ;;  %2471 = vperm.xlu0 %4802, %v4922_v60  }
0x1d42   :  { %2474 = vperm.xlu1 %4798, %v4924_v62   ;;  %v4926_v63 = vpop.eup %4925 }
0x1d43   :  { %v4928_v18 = vpop.eup %4927 }
0x1d46   :  { %2477 = vperm.xlu1 %4798, %v4926_v63  }
0x1d4a   :  { %2480 = vperm.xlu1 %4798, %v4928_v18  }
0x1dbc   :  { %v2472_v2 = vpop.permute.xlu0 %2471 }
0x1dbd   :  { %v2475_v3 = vpop.permute.xlu1 %2474  ;;  %v2485_v9 = vrot.slane %v2472_v2, %v5261_v16 }
0x1dbe   :  { %v2489_v22 = vrot.slane %v2475_v3, %v5261_v16 }
0x1dc0   :  { %v2498_v4 = vsel %vm450_vm2, %v2489_v22, %v2485_v9 }
0x1dc1   :  { %v2478_v30 = vpop.permute.xlu1 %2477 }
0x1dc2   :  { %v2493_v59 = vrot.slane %v2478_v30, %v5261_v16 }
0x1dc4   :  { %v2499_v26 = vsel %vm452_vm3, %v2493_v59, %v2498_v4 }
0x1dc5   :  { %v2481_v21 = vpop.permute.xlu1 %2480 }
0x1dc6   :  { %v2497_v15 = vrot.slane %v2481_v21, %v5261_v16 }
0x1dc8   :  { %v2500_v14 = vsel %vm454_vm4, %v2497_v15, %v2499_v26  ;;  %v5120_v26 = vmov 4  }
0x1dc9   :  { %v2502_v17 = vsel %vm457_vm5, %v2500_v14, 0.0  ;;  %4803 = vset.pattern.permute.xlu1 %v5120_v26 }
0x1dca   :  { %2503 = vadd.xlane.f32.xlu1 %v2502_v17 }
0x1e53   :  { %v2504_v27 = vpop.xlane.xlu1 %2503 }
0x1e54   :  { %4929 = vrcp.f32 %v2504_v27 }
0x1e61   :  { %v4930_v20 = vpop.eup %4929 }
0x1e62   :  { %v2510_v36 = vrot.slane %v4930_v20, %v5230_v33  ;;  %v2514_v39 = vrot.slane %v4930_v20, %v5274_v32  ;;  %v2518_v44 = vrot.slane %v4930_v20, %v5277_v34  ;;  %v2522_v48 = vrot.slane %v4930_v20, %v5280_v35 }
0x1e64   :  { %v2527_v8 = vmul.f32 %v4922_v60, %v2510_v36  ;;  %v2528_v25 = vmul.f32 %v4924_v62, %v2514_v39  ;;  %v2529_v46 = vmul.f32 %v4926_v63, %v2518_v44  ;;  %v2530_v55 = vmul.f32 %v4928_v18, %v2522_v48 }
0x1e66   :  { %v2531_v43 = vmul.f32 %v2527_v8, %v5307_v40  ;;  %v2532_v19 = vmul.f32 %v2528_v25, %v5302_v5  ;;  %v2533_v49 = vmul.f32 %v2529_v46, %v5309_v11  ;;  %v2534_v3 = vmul.f32 %v2530_v55, %v5315_v23 }
0x1e68   :  { %2540 = vperm.xlu0 %4802, %v2531_v43  }
0x1e6c   :  { %2543 = vperm.xlu0 %4802, %v2532_v19  }
0x1e70   :  { %2546 = vperm.xlu0 %4802, %v2533_v49  }
0x1e74   :  { %2549 = vperm.xlu0 %4802, %v2534_v3  }
0x1ee3   :  { %v2541_v60 = vpop.permute.xlu0 %2540 }
0x1ee4   :  { %v2554_v9 = vrot.slane %v2541_v60, %v5261_v16 }
0x1ee7   :  { %v2544_v2 = vpop.permute.xlu0 %2543 }
0x1ee8   :  { %v2558_v62 = vrot.slane %v2544_v2, %v5261_v16 }
0x1eea   :  { %v2567_v59 = vsel %vm450_vm2, %v2558_v62, %v2554_v9 }
0x1eeb   :  { %v2547_v30 = vpop.permute.xlu0 %2546 }
0x1eec   :  { %v2562_v22 = vrot.slane %v2547_v30, %v5261_v16 }
0x1eee   :  { %v2568_v18 = vsel %vm452_vm3, %v2562_v22, %v2567_v59 }
0x1eef   :  { %v2550_v63 = vpop.permute.xlu0 %2549 }
0x1ef0   :  { %v2566_v21 = vrot.slane %v2550_v63, %v5261_v16 }
0x1ef2   :  { %v2569_v4 = vsel %vm454_vm4, %v2566_v21, %v2568_v18 }
0x1ef3   :  { %v2571_v15 = vsel %vm457_vm5, %v2569_v4, 0.0 }
0x1ef4   :  { %2572 = vadd.xlane.f32.xlu0 %v2571_v15 }
0x1f7d   :  { %v2573_v14 = vpop.xlane.xlu0 %2572 }
0x1f7e   :  { %v2574_v17 = vadd.f32 %v2573_v14, %v5353_v24 }
0x1f80   :  { %2577 = vperm.xlu1 %4803, %v2574_v17  }
0x1f84   :  { %4804 = vset.pattern.permute.xlu1 %v5113_v31 }
0x1ffb   :  { %v2578_v27 = vpop.permute.xlu1 %2577 }
0x1ffc   :  { %v2580_v20 = vmul.f32 %v5696_v54, %v2578_v27 }
0x1ffe   :  { %v2581_v36 = vadd.f32 %v5699_v13, %v2580_v20 }
0x2000   :  { %v2652_v39 = vadd.f32 %v5754_v1, %v2581_v36 }
0x2002   :  { %4931 = vtanh.f32 %v2652_v39  ;;  %v4333_v43 = vmul.f32 -1.442695, %v2652_v39 }
0x2004   :  { %4933 = vpow2.f32 %v4333_v43 }
0x200f   :  { %v4932_v8 = vpop.eup %4931 }
0x2010   :  { %2662 = vrot.lane.b32.xlu1 %v4932_v8, %s5114_s2 }
0x2011   :  { %v4934_v25 = vpop.eup %4933 }
0x2012   :  { %v2656_v44 = vadd.f32 1.0, %v4934_v25 }
0x2014   :  { %4935 = vrcp.f32 %v2656_v44 }
0x2021   :  { %v4936_v19 = vpop.eup %4935 }
0x2022   :  { %v2660_v49 = vmul.f32 %v4936_v19, %v5706_v45 }
0x2082   :  { %v2663_v46 = vpop.permute.xlu1 %2662 }
0x2083   :  { %v2665_v48 = vmul.f32 %v4936_v19, %v2663_v46 }
0x2085   :  { %2667 = vrot.lane.b32.xlu1 %v2665_v48, %s5115_s28 }
0x20f7   :  { %v2668_v55 = vpop.permute.xlu1 %2667 }
0x20f8   :  { %v5820_v3 = vadd.f32 %v2668_v55, %v2660_v49 }
0x20fa   :  { %4937 = vtanh.f32 %v5820_v3  ;;  %2678 = vrot.lane.b32.xlu0 %v5820_v3, %s5116_s29 }
0x2107   :  { %v4938_v1 = vpop.eup %4937 }
0x2108   :  { %2673 = vrot.lane.b32.xlu1 %v4938_v1, %s5114_s2 }
0x216c   :  { %v2679_v60 = vpop.permute.xlu0 %2678 }
0x216d   :  { %4667 = vmatmul.mubr.msk.f32.vlgmr.msra.gmra.mxu0 %vm206_vm6, %v2679_v60 }
0x216e   :  { %4681 = vmatpush3.msra.mxu0 %v5714_v50  ;;  %4688 = vmatprep.mubr.msk.f32.mxu0 %vm5111_vm0, %v5110_v0 }
0x216f   :  { %4682 = vmatprep.subr.mxu0 %v5110_v0 }
0x2170   :  { %4683 = vmatpush3.msra.mxu0 %v5720_v38 }
0x2171   :  { %4684 = vmatprep.subr.mxu0 %v5110_v0 }
0x2172   :  { %4685 = vmatpush3.msra.mxu0 %v5724_v51 }
0x2173   :  { %4686 = vmatprep.subr.mxu0 %v5110_v0 }
0x2174   :  { %4687 = vmatpush3.msra.mxu0 %v5728_v53 }
0x2175   :  { %4702 = vmatprep.subr.mxu0 %v5110_v0 }
0x217a   :  { %v2674_v45 = vpop.permute.xlu1 %2673 }
0x217b   :  { %v2676_v2 = vmul.f32 %v4936_v19, %v2674_v45 }
0x217d   :  { %2753 = vrot.lane.b32.xlu1 %v2676_v2, %s5115_s28 }
0x21ef   :  { %v2754_v30 = vpop.permute.xlu1 %2753 }
0x21f0   :  { %4678 = vmatmul.mubr.msk.f32.vlgmr.msra.gmra.mxu1 %vm206_vm6, %v2754_v30  ;;  %4689 = vmatmul.mubr.msk.f32.vlgmr.msra.gmra.mxu0 %vm206_vm6, %v2754_v30 }
0x21f1   :  { %4692 = vmatpush3.msra.mxu1 %v5596_v57  ;;  %4699 = vmatprep.mubr.msk.f32.mxu1 %vm5111_vm0, %v5110_v0 }
0x21f2   :  { %4693 = vmatprep.subr.mxu1 %v5110_v0  ;;  %4703 = vmatpush3.msra.mxu0 %v5602_v58 }
0x21f3   :  { %4694 = vmatpush3.msra.mxu1 %v5605_v56  ;;  %4704 = vmatprep.subr.mxu0 %v5110_v0 }
0x21f4   :  { %4695 = vmatprep.subr.mxu1 %v5110_v0  ;;  %4705 = vmatpush3.msra.mxu0 %v5610_v6 }
0x21f5   :  { %4696 = vmatpush3.msra.mxu1 %v5613_v7  ;;  %4706 = vmatprep.subr.mxu0 %v5110_v0 }
0x21f6   :  { %4697 = vmatprep.subr.mxu1 %v5110_v0  ;;  %4707 = vmatpush3.msra.mxu0 %v5618_v52 }
0x21f7   :  { %4698 = vmatpush3.msra.mxu1 %v5621_v10  ;;  %4708 = vmatprep.subr.mxu0 %v5110_v0 }
0x21f8   :  { %4713 = vmatprep.subr.mxu1 %v5110_v0  ;;  %4709 = vmatpush3.msra.mxu0 %v5626_v12 }
0x21f9   :  { %4710 = vmatprep.mubr.msk.f32.mxu0 %vm5111_vm0, %v5110_v0  ;;  %4724 = vmatprep.subr.mxu0 %v5110_v0 }
0x222d   :  { %v2748_v57 = vpop.f32.mrf.mxu0 }
0x222f   :  { %v4668_v58 = vpop.f32.mrf.mxu0 }
0x22b0   :  { %v2823_v56 = vpop.f32.mrf.mxu1  ;;  %v5860_v6 = vpop.f32.mrf.mxu0 }
0x22b1   :  { %v2824_v7 = vadd.f32 %v2823_v56, %v2748_v57 }
0x22b2   :  { %v4679_v52 = vpop.f32.mrf.mxu1  ;;  %v4690_v62 = vpop.f32.mrf.mxu0 }
0x22b3   :  { %v2827_v10 = vadd.f32 %v5634_v28, %v2824_v7 }
0x22b5   :  { %v2835_v22 = vrot.slane %v2827_v10, %v5225_v29 }
0x22b7   :  { %v2836_v9 = vcombine.high %v2835_v22, %v2835_v22  ;;  %v2843_v12 = vrot.slane %v2835_v22, %v5225_v29 }
0x22b9   :  { %v2850_v63 = vrot.slane %v2836_v9, %v5225_v29  ;;  %v2851_v59 = vcombine.high %v2843_v12, %v2843_v12  ;;  %v2856_v21 = vrot.slane %v2843_v12, %v5230_v33 }
0x22bb   :  { %v2852_v18 = vcombine.high %v2850_v63, %v2850_v63  ;;  %v2860_v4 = vrot.slane %v2850_v63, %v5230_v33  ;;  %v2864_v15 = vrot.slane %v2851_v59, %v5230_v33  ;;  %v2873_v26 = vadd.f32 %v2856_v21, %v5233_v37 }
0x22bd   :  { %v2868_v14 = vrot.slane %v2852_v18, %v5230_v33  ;;  %v2874_v28 = vadd.f32 %v2860_v4, %v5237_v41  ;;  %v2875_v17 = vadd.f32 %v2864_v15, %v5239_v42  ;;  %4939 = vtanh.f32 %v2873_v26 }
0x22bf   :  { %v2876_v27 = vadd.f32 %v2868_v14, %v5244_v47  ;;  %4941 = vtanh.f32 %v2874_v28 }
0x22c0   :  { %4943 = vtanh.f32 %v2875_v17 }
0x22c1   :  { %4945 = vtanh.f32 %v2876_v27 }
0x22ca   :  { %v4940_v20 = vpop.eup %4939 }
0x22cb   :  { %v2881_v36 = vmul.f32 %v5648_v61, %v4940_v20 }
0x22cc   :  { %v4942_v39 = vpop.eup %4941 }
0x22cd   :  { %v4944_v8 = vpop.eup %4943  ;;  %v2885_v43 = vsel %vm88_vm1, %v2881_v36, 0.0  ;;  %v2882_v25 = vmul.f32 %v5648_v61, %v4942_v39 }
0x22ce   :  { %v4946_v44 = vpop.eup %4945  ;;  %2886 = vadd.xlane.f32.xlu1 %v2885_v43  ;;  %v2883_v19 = vmul.f32 %v5648_v61, %v4944_v8 }
0x22cf   :  { %v2888_v46 = vsel %vm88_vm1, %v2882_v25, 0.0  ;;  %v2884_v49 = vmul.f32 %v5648_v61, %v4946_v44 }
0x22d0   :  { %2889 = vadd.xlane.f32.xlu0 %v2888_v46  ;;  %v2891_v48 = vsel %vm88_vm1, %v2883_v19, 0.0 }
0x22d1   :  { %v2894_v55 = vsel %vm88_vm1, %v2884_v49, 0.0 }
0x22d2   :  { %2892 = vadd.xlane.f32.xlu1 %v2891_v48 }
0x22d6   :  { %2895 = vadd.xlane.f32.xlu1 %v2894_v55 }
0x2357   :  { %v2887_v1 = vpop.xlane.xlu1 %2886 }
0x2358   :  { %v2904_v30 = vrot.slane %v2887_v1, %v5261_v16 }
0x2359   :  { %v2890_v60 = vpop.xlane.xlu0 %2889 }
0x235a   :  { %v2908_v45 = vrot.slane %v2890_v60, %v5261_v16 }
0x235b   :  { %v2893_v2 = vpop.xlane.xlu1 %2892 }
0x235c   :  { %v2912_v57 = vrot.slane %v2893_v2, %v5261_v16  ;;  %v2917_v58 = vsel %vm450_vm2, %v2908_v45, %v2904_v30 }
0x235e   :  { %v2918_v61 = vsel %vm452_vm3, %v2912_v57, %v2917_v58 }
0x235f   :  { %v2896_v56 = vpop.xlane.xlu1 %2895 }
0x2360   :  { %v2916_v7 = vrot.slane %v2896_v56, %v5261_v16 }
0x2362   :  { %v2919_v52 = vsel %vm454_vm4, %v2916_v7, %v2918_v61 }
0x2363   :  { %v2921_v62 = vsel %vm457_vm5, %v2919_v52, -inf }
0x2364   :  { %2922 = vmax.xlane.f32.xlu1 %v2921_v62 }
0x23ed   :  { %v2923_v10 = vpop.xlane.xlu1 %2922 }
0x23ee   :  { %v2928_v22 = vrot.slane %v2923_v10, %v5230_v33  ;;  %v2932_v9 = vrot.slane %v2923_v10, %v5274_v32  ;;  %v2936_v12 = vrot.slane %v2923_v10, %v5277_v34  ;;  %v2940_v63 = vrot.slane %v2923_v10, %v5280_v35 }
0x23f0   :  { %v2945_v59 = vsub.f32 %v2887_v1, %v2928_v22  ;;  %v2946_v21 = vsub.f32 %v2890_v60, %v2932_v9  ;;  %v2948_v18 = vsub.f32 %v2896_v56, %v2940_v63  ;;  %v2947_v4 = vsub.f32 %v2893_v2, %v2936_v12 }
0x23f2   :  { %v2949_v15 = vmul.f32 1.442695, %v2945_v59  ;;  %v2951_v26 = vmul.f32 1.442695, %v2946_v21  ;;  %v2955_v14 = vmul.f32 1.442695, %v2948_v18 }
0x23f3   :  { %v2953_v28 = vmul.f32 1.442695, %v2947_v4 }
0x23f4   :  { %4947 = vpow2.f32 %v2949_v15 }
0x23f5   :  { %4949 = vpow2.f32 %v2951_v26 }
0x23f6   :  { %4951 = vpow2.f32 %v2955_v14 }
0x23f7   :  { %4953 = vpow2.f32 %v2953_v28 }
0x2401   :  { %v4948_v17 = vpop.eup %4947 }
0x2402   :  { %v4950_v27 = vpop.eup %4949  ;;  %2962 = vperm.xlu0 %4802, %v4948_v17  }
0x2403   :  { %2965 = vperm.xlu1 %4804, %v4950_v27   ;;  %v4952_v20 = vpop.eup %4951 }
0x2404   :  { %v4954_v36 = vpop.eup %4953 }
0x2406   :  { %2971 = vperm.xlu0 %4802, %v4952_v20  }
0x2407   :  { %2968 = vperm.xlu1 %4804, %v4954_v36  }
0x247d   :  { %v2963_v39 = vpop.permute.xlu0 %2962 }
0x247e   :  { %v2966_v8 = vpop.permute.xlu1 %2965  ;;  %v2976_v25 = vrot.slane %v2963_v39, %v5261_v16 }
0x247f   :  { %v2980_v43 = vrot.slane %v2966_v8, %v5261_v16 }
0x2481   :  { %v2972_v44 = vpop.permute.xlu0 %2971  ;;  %v2989_v49 = vsel %vm450_vm2, %v2980_v43, %v2976_v25 }
0x2482   :  { %v2969_v19 = vpop.permute.xlu1 %2968  ;;  %v2988_v46 = vrot.slane %v2972_v44, %v5261_v16 }
0x2483   :  { %v2984_v48 = vrot.slane %v2969_v19, %v5261_v16 }
0x2485   :  { %v2990_v55 = vsel %vm452_vm3, %v2984_v48, %v2989_v49 }
0x2486   :  { %v2991_v1 = vsel %vm454_vm4, %v2988_v46, %v2990_v55 }
0x2487   :  { %v2993_v60 = vsel %vm457_vm5, %v2991_v1, 0.0 }
0x2488   :  { %2994 = vadd.xlane.f32.xlu1 %v2993_v60 }
0x2511   :  { %v2995_v45 = vpop.xlane.xlu1 %2994 }
0x2512   :  { %4955 = vrcp.f32 %v2995_v45 }
0x251f   :  { %v4956_v2 = vpop.eup %4955 }
0x2520   :  { %v3001_v30 = vrot.slane %v4956_v2, %v5230_v33  ;;  %v3005_v57 = vrot.slane %v4956_v2, %v5274_v32  ;;  %v3009_v61 = vrot.slane %v4956_v2, %v5277_v34  ;;  %v3013_v10 = vrot.slane %v4956_v2, %v5280_v35 }
0x2522   :  { %v3018_v58 = vmul.f32 %v4948_v17, %v3001_v30  ;;  %v3019_v7 = vmul.f32 %v4950_v27, %v3005_v57  ;;  %v3020_v62 = vmul.f32 %v4954_v36, %v3009_v61  ;;  %v3021_v9 = vmul.f32 %v4952_v20, %v3013_v10  ;;  %v5031_v61 = vld [vmem:[#allocation6 + $0x50] sm:$0xff] }
0x2523   :  { %v5121_v36 = vmov 5  }
0x2524   :  { %v3022_v56 = vmul.f32 %v3018_v58, %v5307_v40  ;;  %v3023_v52 = vmul.f32 %v3019_v7, %v5302_v5  ;;  %v3024_v22 = vmul.f32 %v3020_v62, %v5309_v11  ;;  %v3025_v12 = vmul.f32 %v3021_v9, %v5315_v23  ;;  %4805 = vset.pattern.permute.xlu1 %v5121_v36  ;;  %v5030_v7 = vld [vmem:[#allocation6 + $0x38] sm:$0xff] }
0x2526   :  { %3031 = vperm.xlu0 %4802, %v3022_v56   ;;  %v5029_v56 = vld [vmem:[#allocation6 + $0x58] sm:$0xff] }
0x252a   :  { %3034 = vperm.xlu0 %4802, %v3023_v52   ;;  %v5032_v52 = vld [vmem:[#allocation6 + $0x30] sm:$0xff] }
0x252e   :  { %3037 = vperm.xlu0 %4802, %v3024_v22  }
0x2532   :  { %3040 = vperm.xlu0 %4802, %v3025_v12  }
0x25a1   :  { %v3032_v63 = vpop.permute.xlu0 %3031 }
0x25a2   :  { %v3045_v15 = vrot.slane %v3032_v63, %v5261_v16 }
0x25a5   :  { %v3035_v59 = vpop.permute.xlu0 %3034 }
0x25a6   :  { %v3049_v18 = vrot.slane %v3035_v59, %v5261_v16 }
0x25a8   :  { %v3058_v14 = vsel %vm450_vm2, %v3049_v18, %v3045_v15 }
0x25a9   :  { %v3038_v21 = vpop.permute.xlu0 %3037 }
0x25aa   :  { %v3053_v4 = vrot.slane %v3038_v21, %v5261_v16  ;;  %v5960_v21 = vld [vmem:[#allocation6 + $0x70] ss:$0 sm:$0xff] }
0x25ac   :  { %v3059_v17 = vsel %vm452_vm3, %v3053_v4, %v3058_v14 }
0x25ad   :  { %v3041_v26 = vpop.permute.xlu0 %3040 }
0x25ae   :  { %v3057_v28 = vrot.slane %v3041_v26, %v5261_v16 }
0x25b0   :  { %v3060_v27 = vsel %vm454_vm4, %v3057_v28, %v3059_v17 }
0x25b1   :  { %v3062_v20 = vsel %vm457_vm5, %v3060_v27, 0.0 }
0x25b2   :  { %3063 = vadd.xlane.f32.xlu0 %v3062_v20 }
0x263b   :  { %v3064_v39 = vpop.xlane.xlu0 %3063 }
0x263c   :  { %v3065_v8 = vadd.f32 %v3064_v39, %v5353_v24 }
0x263e   :  { %3068 = vperm.xlu1 %4805, %v3065_v8  }
0x2642   :  { %4806 = vset.pattern.permute.xlu1 %v5113_v31 }
0x26b9   :  { %v3069_v43 = vpop.permute.xlu1 %3068 }
0x26ba   :  { %v3071_v25 = vmul.f32 %v5696_v54, %v3069_v43 }
0x26bc   :  { %v3072_v44 = vadd.f32 %v5699_v13, %v3071_v25 }
0x26be   :  { %v3143_v19 = vadd.f32 %v5860_v6, %v3072_v44 }
0x26c0   :  { %4957 = vtanh.f32 %v3143_v19  ;;  %v4337_v48 = vmul.f32 -1.442695, %v3143_v19 }
0x26c2   :  { %4959 = vpow2.f32 %v4337_v48 }
0x26cd   :  { %v4958_v46 = vpop.eup %4957 }
0x26ce   :  { %3153 = vrot.lane.b32.xlu0 %v4958_v46, %s5114_s2  ;;  %v5974_v46 = vld [vmem:[#allocation6 + $0x90] ss:$0 sm:$0xff] }
0x26cf   :  { %v4960_v49 = vpop.eup %4959 }
0x26d0   :  { %v3147_v55 = vadd.f32 1.0, %v4960_v49 }
0x26d2   :  { %4961 = vrcp.f32 %v3147_v55 }
0x26df   :  { %v4962_v1 = vpop.eup %4961 }
0x26e0   :  { %v3151_v54 = vmul.f32 %v4962_v1, %v5820_v3 }
0x2740   :  { %v3154_v60 = vpop.permute.xlu0 %3153 }
0x2741   :  { %v3156_v45 = vmul.f32 %v4962_v1, %v3154_v60 }
0x2743   :  { %3158 = vrot.lane.b32.xlu1 %v3156_v45, %s5115_s28 }
0x27b5   :  { %v3159_v2 = vpop.permute.xlu1 %3158 }
0x27b6   :  { %v5926_v13 = vadd.f32 %v3159_v2, %v3151_v54 }
0x27b8   :  { %4963 = vtanh.f32 %v5926_v13 }
0x27c5   :  { %v4964_v6 = vpop.eup %4963 }
0x27c6   :  { %3164 = vrot.lane.b32.xlu1 %v4964_v6, %s5114_s2 }
0x27ca   :  { %3169 = vrot.lane.b32.xlu1 %v5926_v13, %s5116_s29 }
0x2838   :  { %v3165_v30 = vpop.permute.xlu1 %3164 }
0x2839   :  { %v3167_v57 = vmul.f32 %v4962_v1, %v3165_v30 }
0x283b   :  { %3244 = vrot.lane.b32.xlu1 %v3167_v57, %s5115_s28 }
0x283c   :  { %v3170_v58 = vpop.permute.xlu1 %3169 }
0x283d   :  { %4700 = vmatmul.mubr.msk.f32.vlgmr.msra.gmra.mxu1 %vm206_vm6, %v3170_v58 }
0x283e   :  { %4714 = vmatpush3.msra.mxu1 %v5714_v50  ;;  %4721 = vmatprep.mubr.msk.f32.mxu1 %vm5111_vm0, %v5110_v0  ;;  %v5025_v50 = vld [vmem:[#allocation6 + $0x68] sm:$0xff] }
0x283f   :  { %4715 = vmatprep.subr.mxu1 %v5110_v0 }
0x2840   :  { %4716 = vmatpush3.msra.mxu1 %v5720_v38  ;;  %v5026_v38 = vld [vmem:[#allocation6 + $0x48] sm:$0xff] }
0x2841   :  { %4717 = vmatprep.subr.mxu1 %v5110_v0 }
0x2842   :  { %4718 = vmatpush3.msra.mxu1 %v5724_v51  ;;  %v5027_v51 = vld [vmem:[#allocation6 + $0x60] sm:$0xff] }
0x2843   :  { %4719 = vmatprep.subr.mxu1 %v5110_v0 }
0x2844   :  { %4720 = vmatpush3.msra.mxu1 %v5728_v53  ;;  %v5028_v53 = vld [vmem:[#allocation6 + $0x40] sm:$0xff] }
0x2845   :  { %4735 = vmatprep.subr.mxu1 %v5110_v0 }
0x28ad   :  { %v3245_v3 = vpop.permute.xlu1 %3244 }
0x28ae   :  { %4711 = vmatmul.mubr.msk.f32.vlgmr.msra.gmra.mxu0 %vm206_vm6, %v3245_v3  ;;  %4722 = vmatmul.mubr.msk.f32.vlgmr.msra.gmra.mxu1 %vm206_vm6, %v3245_v3 }
0x28af   :  { %4725 = vmatpush3.msra.mxu0 %v5025_v50  ;;  %4732 = vmatprep.mubr.msk.f32.mxu0 %vm5111_vm0, %v5110_v0 }
0x28b0   :  { %4726 = vmatprep.subr.mxu0 %v5110_v0  ;;  %4736 = vmatpush3.msra.mxu1 %v5026_v38 }
0x28b1   :  { %4727 = vmatpush3.msra.mxu0 %v5027_v51  ;;  %4737 = vmatprep.subr.mxu1 %v5110_v0 }
0x28b2   :  { %4728 = vmatprep.subr.mxu0 %v5110_v0  ;;  %4738 = vmatpush3.msra.mxu1 %v5028_v53 }
0x28b3   :  { %4729 = vmatpush3.msra.mxu0 %v5029_v56  ;;  %4739 = vmatprep.subr.mxu1 %v5110_v0 }
0x28b4   :  { %4730 = vmatprep.subr.mxu0 %v5110_v0  ;;  %4740 = vmatpush3.msra.mxu1 %v5030_v7 }
0x28b5   :  { %4731 = vmatpush3.msra.mxu0 %v5031_v61  ;;  %4741 = vmatprep.subr.mxu1 %v5110_v0 }
0x28b6   :  { %4742 = vmatpush3.msra.mxu1 %v5032_v52  ;;  %4743 = vmatprep.mubr.msk.f32.mxu1 %vm5111_vm0, %v5110_v0 }
0x28b7   :  { %4746 = vmatprep.subr.mxu0 %v5110_v0  ;;  %4764 = vmatprep.subr.mxu1 %v5110_v0 }
0x28fd   :  { %v3239_v62 = vpop.f32.mrf.mxu1 }
0x28ff   :  { %v4701_v10 = vpop.f32.mrf.mxu1 }
0x296e   :  { %v3314_v22 = vpop.f32.mrf.mxu0  ;;  %v5958_v9 = vpop.f32.mrf.mxu1 }
0x296f   :  { %v3315_v12 = vadd.f32 %v3314_v22, %v3239_v62 }
0x2970   :  { %v4712_v63 = vpop.f32.mrf.mxu0  ;;  %v4723_v59 = vpop.f32.mrf.mxu1 }
0x2971   :  { %v3318_v18 = vadd.f32 %v5960_v21, %v3315_v12 }
0x2973   :  { %v3326_v4 = vrot.slane %v3318_v18, %v5225_v29 }
0x2975   :  { %v3327_v15 = vcombine.high %v3326_v4, %v3326_v4  ;;  %v3334_v26 = vrot.slane %v3326_v4, %v5225_v29 }
0x2977   :  { %v3341_v14 = vrot.slane %v3327_v15, %v5225_v29  ;;  %v3342_v28 = vcombine.high %v3334_v26, %v3334_v26  ;;  %v3347_v17 = vrot.slane %v3334_v26, %v5230_v33 }
0x2979   :  { %v3343_v27 = vcombine.high %v3341_v14, %v3341_v14  ;;  %v3351_v20 = vrot.slane %v3341_v14, %v5230_v33  ;;  %v3355_v36 = vrot.slane %v3342_v28, %v5230_v33  ;;  %v3364_v39 = vadd.f32 %v3347_v17, %v5233_v37 }
0x297b   :  { %v3359_v8 = vrot.slane %v3343_v27, %v5230_v33  ;;  %v3365_v43 = vadd.f32 %v3351_v20, %v5237_v41  ;;  %v3366_v25 = vadd.f32 %v3355_v36, %v5239_v42  ;;  %4965 = vtanh.f32 %v3364_v39 }
0x297d   :  { %v3367_v44 = vadd.f32 %v3359_v8, %v5244_v47  ;;  %4967 = vtanh.f32 %v3365_v43 }
0x297e   :  { %4969 = vtanh.f32 %v3366_v25 }
0x297f   :  { %4971 = vtanh.f32 %v3367_v44 }
0x2988   :  { %v4966_v19 = vpop.eup %4965 }
0x2989   :  { %v3372_v48 = vmul.f32 %v5974_v46, %v4966_v19 }
0x298a   :  { %v4968_v49 = vpop.eup %4967 }
0x298b   :  { %v4970_v55 = vpop.eup %4969  ;;  %v3376_v1 = vsel %vm88_vm1, %v3372_v48, 0.0  ;;  %v3373_v60 = vmul.f32 %v5974_v46, %v4968_v49 }
0x298c   :  { %v4972_v45 = vpop.eup %4971  ;;  %3377 = vadd.xlane.f32.xlu1 %v3376_v1  ;;  %v3374_v6 = vmul.f32 %v5974_v46, %v4970_v55 }
0x298d   :  { %v3379_v54 = vsel %vm88_vm1, %v3373_v60, 0.0  ;;  %v3375_v2 = vmul.f32 %v5974_v46, %v4972_v45 }
0x298e   :  { %3380 = vadd.xlane.f32.xlu0 %v3379_v54  ;;  %v3382_v57 = vsel %vm88_vm1, %v3374_v6, 0.0 }
0x298f   :  { %v3385_v30 = vsel %vm88_vm1, %v3375_v2, 0.0 }
0x2990   :  { %3386 = vadd.xlane.f32.xlu1 %v3385_v30 }
0x2992   :  { %3383 = vadd.xlane.f32.xlu0 %v3382_v57 }
0x2a15   :  { %v3378_v58 = vpop.xlane.xlu1 %3377 }
0x2a16   :  { %v3395_v51 = vrot.slane %v3378_v58, %v5261_v16 }
0x2a17   :  { %v3381_v3 = vpop.xlane.xlu0 %3380 }
0x2a18   :  { %v3399_v50 = vrot.slane %v3381_v3, %v5261_v16 }
0x2a19   :  { %v3387_v38 = vpop.xlane.xlu1 %3386 }
0x2a1a   :  { %v3408_v7 = vsel %vm450_vm2, %v3399_v50, %v3395_v51  ;;  %v3407_v61 = vrot.slane %v3387_v38, %v5261_v16 }
0x2a1b   :  { %v3384_v53 = vpop.xlane.xlu0 %3383 }
0x2a1c   :  { %v3403_v56 = vrot.slane %v3384_v53, %v5261_v16 }
0x2a1e   :  { %v3409_v52 = vsel %vm452_vm3, %v3403_v56, %v3408_v7 }
0x2a1f   :  { %v3410_v62 = vsel %vm454_vm4, %v3407_v61, %v3409_v52 }
0x2a20   :  { %v3412_v10 = vsel %vm457_vm5, %v3410_v62, -inf }
0x2a21   :  { %3413 = vmax.xlane.f32.xlu0 %v3412_v10 }
0x2aaa   :  { %v3414_v22 = vpop.xlane.xlu0 %3413 }
0x2aab   :  { %v3419_v12 = vrot.slane %v3414_v22, %v5230_v33  ;;  %v3423_v63 = vrot.slane %v3414_v22, %v5274_v32  ;;  %v3427_v59 = vrot.slane %v3414_v22, %v5277_v34  ;;  %v3431_v18 = vrot.slane %v3414_v22, %v5280_v35 }
0x2aad   :  { %v3436_v4 = vsub.f32 %v3378_v58, %v3419_v12  ;;  %v3437_v15 = vsub.f32 %v3381_v3, %v3423_v63  ;;  %v3438_v26 = vsub.f32 %v3384_v53, %v3427_v59  ;;  %v3439_v17 = vsub.f32 %v3387_v38, %v3431_v18 }
0x2aaf   :  { %v3440_v14 = vmul.f32 1.442695, %v3436_v4  ;;  %v3442_v28 = vmul.f32 1.442695, %v3437_v15  ;;  %v3444_v27 = vmul.f32 1.442695, %v3438_v26 }
0x2ab0   :  { %v3446_v20 = vmul.f32 1.442695, %v3439_v17 }
0x2ab1   :  { %4973 = vpow2.f32 %v3440_v14  ;;  %v5122_v14 = vmov 6  }
0x2ab2   :  { %4975 = vpow2.f32 %v3442_v28 }
0x2ab3   :  { %4977 = vpow2.f32 %v3444_v27 }
0x2ab4   :  { %4979 = vpow2.f32 %v3446_v20  ;;  %v5035_v20 = vld [vmem:[#allocation6 + $0x20] ss:$0 sm:$0xff] }
0x2abe   :  { %v4974_v36 = vpop.eup %4973 }
0x2abf   :  { %v4976_v39 = vpop.eup %4975  ;;  %3453 = vperm.xlu1 %4806, %v4974_v36  }
0x2ac0   :  { %3456 = vperm.xlu0 %4802, %v4976_v39   ;;  %v4978_v8 = vpop.eup %4977 }
0x2ac1   :  { %v4980_v43 = vpop.eup %4979 }
0x2ac3   :  { %3459 = vperm.xlu1 %4806, %v4978_v8  }
0x2ac4   :  { %4807 = vset.pattern.permute.xlu0 %v5122_v14 }
0x2ac7   :  { %3462 = vperm.xlu1 %4806, %v4980_v43  }
0x2b3a   :  { %v3454_v25 = vpop.permute.xlu1 %3453 }
0x2b3b   :  { %v3457_v44 = vpop.permute.xlu0 %3456  ;;  %v3467_v49 = vrot.slane %v3454_v25, %v5261_v16 }
0x2b3c   :  { %v3471_v48 = vrot.slane %v3457_v44, %v5261_v16 }
0x2b3e   :  { %v3460_v19 = vpop.permute.xlu1 %3459  ;;  %v3480_v60 = vsel %vm450_vm2, %v3471_v48, %v3467_v49 }
0x2b3f   :  { %v3475_v55 = vrot.slane %v3460_v19, %v5261_v16 }
0x2b41   :  { %v3481_v54 = vsel %vm452_vm3, %v3475_v55, %v3480_v60 }
0x2b42   :  { %v3463_v1 = vpop.permute.xlu1 %3462 }
0x2b43   :  { %v3479_v45 = vrot.slane %v3463_v1, %v5261_v16 }
0x2b45   :  { %v3482_v2 = vsel %vm454_vm4, %v3479_v45, %v3481_v54 }
0x2b46   :  { %v3484_v6 = vsel %vm457_vm5, %v3482_v2, 0.0 }
0x2b47   :  { %3485 = vadd.xlane.f32.xlu0 %v3484_v6 }
0x2bd0   :  { %v3486_v30 = vpop.xlane.xlu0 %3485 }
0x2bd1   :  { %4981 = vrcp.f32 %v3486_v30 }
0x2bde   :  { %v4982_v57 = vpop.eup %4981 }
0x2bdf   :  { %v3492_v58 = vrot.slane %v4982_v57, %v5230_v33  ;;  %v3496_v3 = vrot.slane %v4982_v57, %v5274_v32  ;;  %v3500_v53 = vrot.slane %v4982_v57, %v5277_v34  ;;  %v3504_v61 = vrot.slane %v4982_v57, %v5280_v35 }
0x2be1   :  { %v3509_v50 = vmul.f32 %v4974_v36, %v3492_v58  ;;  %v3510_v51 = vmul.f32 %v4976_v39, %v3496_v3  ;;  %v3511_v7 = vmul.f32 %v4978_v8, %v3500_v53  ;;  %v3512_v62 = vmul.f32 %v4980_v43, %v3504_v61  ;;  %v5036_v39 = vld [vmem:[#allocation6 + $0x28] ss:$0 sm:$0xff] }
0x2be3   :  { %v3513_v38 = vmul.f32 %v3509_v50, %v5307_v40  ;;  %v3514_v56 = vmul.f32 %v3510_v51, %v5302_v5  ;;  %v3515_v52 = vmul.f32 %v3511_v7, %v5309_v11  ;;  %v3516_v10 = vmul.f32 %v3512_v62, %v5315_v23 }
0x2be5   :  { %3522 = vperm.xlu1 %4806, %v3513_v38  }
0x2be9   :  { %3525 = vperm.xlu1 %4806, %v3514_v56  }
0x2bed   :  { %3528 = vperm.xlu1 %4806, %v3515_v52  }
0x2bf1   :  { %3531 = vperm.xlu1 %4806, %v3516_v10  }
0x2c60   :  { %v3523_v22 = vpop.permute.xlu1 %3522 }
0x2c61   :  { %v3536_v5 = vrot.slane %v3523_v22, %v5261_v16 }
0x2c64   :  { %v3526_v12 = vpop.permute.xlu1 %3525 }
0x2c65   :  { %v3540_v63 = vrot.slane %v3526_v12, %v5261_v16 }
0x2c67   :  { %v3549_v4 = vsel %vm450_vm2, %v3540_v63, %v3536_v5 }
0x2c68   :  { %v3529_v40 = vpop.permute.xlu1 %3528 }
0x2c69   :  { %v3544_v59 = vrot.slane %v3529_v40, %v5261_v16 }
0x2c6b   :  { %v3550_v11 = vsel %vm452_vm3, %v3544_v59, %v3549_v4 }
0x2c6c   :  { %v3532_v18 = vpop.permute.xlu1 %3531 }
0x2c6d   :  { %v3548_v15 = vrot.slane %v3532_v18, %v5261_v16 }
0x2c6f   :  { %v3551_v26 = vsel %vm454_vm4, %v3548_v15, %v3550_v11 }
0x2c70   :  { %v3553_v23 = vsel %vm457_vm5, %v3551_v26, 0.0 }
0x2c71   :  { %3554 = vadd.xlane.f32.xlu1 %v3553_v23 }
0x2cfa   :  { %v3555_v28 = vpop.xlane.xlu1 %3554 }
0x2cfb   :  { %v3556_v17 = vadd.f32 %v3555_v28, %v5353_v24 }
0x2cfd   :  { %3559 = vperm.xlu0 %4807, %v3556_v17  }
0x2d01   :  { %4808 = vset.pattern.permute.xlu0 %v5113_v31 }
0x2d78   :  { %v3560_v27 = vpop.permute.xlu0 %3559 }
0x2d79   :  { %v3562_v36 = vmul.f32 %v5035_v20, %v3560_v27 }
0x2d7b   :  { %v3563_v8 = vadd.f32 %v5036_v39, %v3562_v36 }
0x2d7d   :  { %v3634_v43 = vadd.f32 %v5958_v9, %v3563_v8 }
0x2d7f   :  { %4983 = vtanh.f32 %v3634_v43  ;;  %v4341_v44 = vmul.f32 -1.442695, %v3634_v43 }
0x2d81   :  { %4985 = vpow2.f32 %v4341_v44 }
0x2d8c   :  { %v4984_v25 = vpop.eup %4983 }
0x2d8d   :  { %3644 = vrot.lane.b32.xlu1 %v4984_v25, %s5114_s2 }
0x2d8e   :  { %v4986_v19 = vpop.eup %4985 }
0x2d8f   :  { %v3638_v48 = vadd.f32 1.0, %v4986_v19 }
0x2d91   :  { %4987 = vrcp.f32 %v3638_v48 }
0x2d9e   :  { %v4988_v24 = vpop.eup %4987 }
0x2d9f   :  { %v3642_v31 = vmul.f32 %v4988_v24, %v5926_v13 }
0x2dff   :  { %v3645_v49 = vpop.permute.xlu1 %3644 }
0x2e00   :  { %v3647_v55 = vmul.f32 %v4988_v24, %v3645_v49 }
0x2e02   :  { %3649 = vrot.lane.b32.xlu1 %v3647_v55, %s5115_s28 }
0x2e74   :  { %v3650_v1 = vpop.permute.xlu1 %3649 }
0x2e75   :  { %v3652_v60 = vadd.f32 %v3650_v1, %v3642_v31 }
0x2e77   :  { %4989 = vtanh.f32 %v3652_v60  ;;  %3660 = vrot.lane.b32.xlu0 %v3652_v60, %s5116_s29 }
0x2e84   :  { %v4990_v9 = vpop.eup %4989 }
0x2e85   :  { %3655 = vrot.lane.b32.xlu1 %v4990_v9, %s5114_s2 }
0x2ee9   :  { %v3661_v45 = vpop.permute.xlu0 %3660 }
0x2eea   :  { %4733 = vmatmul.mubr.msk.f32.vlgmr.msra.gmra.mxu0 %vm206_vm6, %v3661_v45 }
0x2eeb   :  { %4750 = vmatprep.mubr.msk.f32.mxu0 %vm5111_vm0, %v5110_v0 }
0x2ef7   :  { %v3656_v54 = vpop.permute.xlu1 %3655 }
0x2ef8   :  { %v3658_v2 = vmul.f32 %v4988_v24, %v3656_v54 }
0x2efa   :  { %3735 = vrot.lane.b32.xlu1 %v3658_v2, %s5115_s28 }
0x2f6c   :  { %v6032_v6 = vpop.permute.xlu1 %3735 }
0x2f6d   :  { %4744 = vmatmul.mubr.msk.f32.vlgmr.msra.gmra.mxu1 %vm206_vm6, %v6032_v6 }
0x2f6e   :  { %4772 = vmatprep.mubr.msk.f32.mxu1 %vm5111_vm0, %v5110_v0 }
0x2faa   :  { %v3730_v13 = vpop.f32.mrf.mxu0 }
0x2fac   :  { %v4734_v30 = vpop.f32.mrf.mxu0 }
0x302d   :  { %v3805_v57 = vpop.f32.mrf.mxu1 }
0x302e   :  { %v3806_v58 = vadd.f32 %v3805_v57, %v3730_v13 }
0x302f   :  { %v4745_v3 = vpop.f32.mrf.mxu1 }
0x3030   :  { %v3809_v50 = vadd.f32 %v5960_v21, %v3806_v58 }
0x3032   :  { %v3817_v38 = vrot.slane %v3809_v50, %v5225_v29 }
0x3034   :  { %v3818_v51 = vcombine.high %v3817_v38, %v3817_v38  ;;  %v3825_v53 = vrot.slane %v3817_v38, %v5225_v29 }
0x3036   :  { %v3832_v56 = vrot.slane %v3818_v51, %v5225_v29  ;;  %v3833_v7 = vcombine.high %v3825_v53, %v3825_v53  ;;  %v3838_v61 = vrot.slane %v3825_v53, %v5230_v33 }
0x3038   :  { %v3834_v52 = vcombine.high %v3832_v56, %v3832_v56  ;;  %v3842_v62 = vrot.slane %v3832_v56, %v5230_v33  ;;  %v3846_v10 = vrot.slane %v3833_v7, %v5230_v33  ;;  %v3855_v22 = vadd.f32 %v3838_v61, %v5233_v37 }
0x303a   :  { %v3850_v12 = vrot.slane %v3834_v52, %v5230_v33  ;;  %v3856_v21 = vadd.f32 %v3842_v62, %v5237_v41  ;;  %v3857_v40 = vadd.f32 %v3846_v10, %v5239_v42  ;;  %4991 = vtanh.f32 %v3855_v22 }
0x303c   :  { %v3858_v63 = vadd.f32 %v3850_v12, %v5244_v47  ;;  %4993 = vtanh.f32 %v3856_v21 }
0x303d   :  { %4995 = vtanh.f32 %v3857_v40 }
0x303e   :  { %4997 = vtanh.f32 %v3858_v63 }
0x3047   :  { %v4992_v29 = vpop.eup %4991 }
0x3048   :  { %v3863_v59 = vmul.f32 %v5974_v46, %v4992_v29 }
0x3049   :  { %v4994_v5 = vpop.eup %4993 }
0x304a   :  { %v4996_v18 = vpop.eup %4995  ;;  %v3867_v4 = vsel %vm88_vm1, %v3863_v59, 0.0  ;;  %v3864_v37 = vmul.f32 %v5974_v46, %v4994_v5 }
0x304b   :  { %v4998_v15 = vpop.eup %4997  ;;  %3868 = vadd.xlane.f32.xlu0 %v3867_v4  ;;  %v3865_v41 = vmul.f32 %v5974_v46, %v4996_v18 }
0x304c   :  { %v3870_v42 = vsel %vm88_vm1, %v3864_v37, 0.0  ;;  %v3866_v11 = vmul.f32 %v5974_v46, %v4998_v15  ;;  %v4061_v37 = vld [vmem:[#allocation6 + $0xd0] sm:$0xff]  ;;  %v4060_v15 = vld [vmem:[#allocation6 + $0xc8] sm:$0xff] }
0x304d   :  { %3871 = vadd.xlane.f32.xlu1 %v3870_v42  ;;  %v3873_v47 = vsel %vm88_vm1, %v3865_v41, 0.0  ;;  %4747 = vmatpush3.msra.mxu0 %v4061_v37 }
0x304e   :  { %v3876_v26 = vsel %vm88_vm1, %v3866_v11, 0.0  ;;  %4748 = vmatprep.subr.mxu0 %v5110_v0  ;;  %v5038_v11 = vld [vmem:[#allocation2 + $0x8] sm:$0xff] }
0x304f   :  { %3874 = vadd.xlane.f32.xlu0 %v3873_v47  ;;  %4749 = vmatpush3.msra.mxu0 %v4060_v15 }
0x3050   :  { %4753 = vmatprep.subr.mxu0 %v5110_v0 }
0x3053   :  { %3877 = vadd.xlane.f32.xlu0 %v3876_v26 }
0x30d4   :  { %v3869_v23 = vpop.xlane.xlu0 %3868 }
0x30d5   :  { %v3886_v27 = vrot.slane %v3869_v23, %v5261_v16 }
0x30d6   :  { %v3872_v14 = vpop.xlane.xlu1 %3871 }
0x30d7   :  { %v3890_v28 = vrot.slane %v3872_v14, %v5261_v16 }
0x30d8   :  { %v3875_v17 = vpop.xlane.xlu0 %3874 }
0x30d9   :  { %v3894_v20 = vrot.slane %v3875_v17, %v5261_v16  ;;  %v3899_v36 = vsel %vm450_vm2, %v3890_v28, %v3886_v27 }
0x30db   :  { %v3900_v46 = vsel %vm452_vm3, %v3894_v20, %v3899_v36 }
0x30dc   :  { %v3878_v39 = vpop.xlane.xlu0 %3877 }
0x30dd   :  { %v3898_v8 = vrot.slane %v3878_v39, %v5261_v16 }
0x30df   :  { %v3901_v43 = vsel %vm454_vm4, %v3898_v8, %v3900_v46 }
0x30e0   :  { %v3903_v25 = vsel %vm457_vm5, %v3901_v43, -inf }
0x30e1   :  { %3904 = vmax.xlane.f32.xlu1 %v3903_v25  ;;  %v5040_v25 = vld [vmem:[#allocation2 + $0x18] sm:$0xff] }
0x316a   :  { %v3905_v44 = vpop.xlane.xlu1 %3904 }
0x316b   :  { %v3910_v19 = vrot.slane %v3905_v44, %v5230_v33  ;;  %v3914_v48 = vrot.slane %v3905_v44, %v5274_v32  ;;  %v3918_v24 = vrot.slane %v3905_v44, %v5277_v34  ;;  %v3922_v31 = vrot.slane %v3905_v44, %v5280_v35 }
0x316d   :  { %v3927_v49 = vsub.f32 %v3869_v23, %v3910_v19  ;;  %v3928_v55 = vsub.f32 %v3872_v14, %v3914_v48  ;;  %v3929_v1 = vsub.f32 %v3875_v17, %v3918_v24  ;;  %v3930_v45 = vsub.f32 %v3878_v39, %v3922_v31  ;;  %v5039_v17 = vld [vmem:[#allocation2 + $0x10] sm:$0xff] }
0x316f   :  { %v3931_v60 = vmul.f32 1.442695, %v3927_v49  ;;  %v3933_v9 = vmul.f32 1.442695, %v3928_v55  ;;  %v3935_v54 = vmul.f32 1.442695, %v3929_v1 }
0x3170   :  { %v3937_v2 = vmul.f32 1.442695, %v3930_v45 }
0x3171   :  { %4999 = vpow2.f32 %v3931_v60 }
0x3172   :  { %5001 = vpow2.f32 %v3933_v9 }
0x3173   :  { %5003 = vpow2.f32 %v3935_v54 }
0x3174   :  { %5005 = vpow2.f32 %v3937_v2 }
0x317e   :  { %v5000_v13 = vpop.eup %4999 }
0x317f   :  { %v5002_v30 = vpop.eup %5001  ;;  %3944 = vperm.xlu0 %4808, %v5000_v13  }
0x3180   :  { %3947 = vperm.xlu1 %4806, %v5002_v30   ;;  %v5004_v57 = vpop.eup %5003 }
0x3181   :  { %v5006_v58 = vpop.eup %5005 }
0x3184   :  { %3950 = vperm.xlu1 %4806, %v5004_v57  }
0x3188   :  { %3953 = vperm.xlu1 %4806, %v5006_v58  }
0x31fa   :  { %v3945_v50 = vpop.permute.xlu0 %3944 }
0x31fb   :  { %v3948_v3 = vpop.permute.xlu1 %3947  ;;  %v3958_v53 = vrot.slane %v3945_v50, %v5261_v16 }
0x31fc   :  { %v3962_v51 = vrot.slane %v3948_v3, %v5261_v16 }
0x31fe   :  { %v3971_v61 = vsel %vm450_vm2, %v3962_v51, %v3958_v53  ;;  %v4059_v53 = vld [vmem:[#allocation6 + $0xc0] sm:$0xff] }
0x31ff   :  { %v3951_v38 = vpop.permute.xlu1 %3950 }
0x3200   :  { %v3966_v56 = vrot.slane %v3951_v38, %v5261_v16 }
0x3202   :  { %v3972_v62 = vsel %vm452_vm3, %v3966_v56, %v3971_v61  ;;  %v4057_v61 = vld [vmem:[#allocation6 + $0xb0] sm:$0xff] }
0x3203   :  { %v3954_v7 = vpop.permute.xlu1 %3953 }
0x3204   :  { %v3970_v52 = vrot.slane %v3954_v7, %v5261_v16  ;;  %v4058_v7 = vld [vmem:[#allocation6 + $0xb8] sm:$0xff] }
0x3206   :  { %v3973_v10 = vsel %vm454_vm4, %v3970_v52, %v3972_v62  ;;  %v4056_v52 = vld [vmem:[#allocation6 + $0xa8] sm:$0xff]  ;;  %v4220_v62 = vld [vmem:[#allocation6 + $0xf8] sm:$0xff] }
0x3207   :  { %v3975_v22 = vsel %vm457_vm5, %v3973_v10, 0.0  ;;  %4765 = vmatpush3.msra.mxu1 %v4220_v62  ;;  %v4219_v10 = vld [vmem:[#allocation6 + $0xf0] sm:$0xff] }
0x3208   :  { %3976 = vadd.xlane.f32.xlu1 %v3975_v22  ;;  %4766 = vmatprep.subr.mxu1 %v5110_v0  ;;  %v4218_v22 = vld [vmem:[#allocation6 + $0xe8] sm:$0xff] }
0x3209   :  { %4767 = vmatpush3.msra.mxu1 %v4219_v10 }
0x320a   :  { %4768 = vmatprep.subr.mxu1 %v5110_v0 }
0x320b   :  { %4769 = vmatpush3.msra.mxu1 %v4218_v22 }
0x320c   :  { %4770 = vmatprep.subr.mxu1 %v5110_v0 }
0x3291   :  { %v3977_v12 = vpop.xlane.xlu1 %3976 }
0x3292   :  { %5007 = vrcp.f32 %v3977_v12  ;;  %v4217_v12 = vld [vmem:[#allocation6 + $0xe0] sm:$0xff] }
0x3293   :  { %4771 = vmatpush3.msra.mxu1 %v4217_v12 }
0x329f   :  { %v5008_v21 = vpop.eup %5007 }
0x32a0   :  { %v3983_v40 = vrot.slane %v5008_v21, %v5230_v33  ;;  %v3987_v29 = vrot.slane %v5008_v21, %v5274_v32  ;;  %v3991_v5 = vrot.slane %v5008_v21, %v5277_v34  ;;  %v3995_v18 = vrot.slane %v5008_v21, %v5280_v35  ;;  %v5037_v32 = vld [vmem:[#allocation2] sm:$0xff] }
0x32a2   :  { %v4000_v63 = vmul.f32 %v5000_v13, %v3983_v40  ;;  %v4001_v59 = vmul.f32 %v5002_v30, %v3987_v29  ;;  %v4002_v16 = vmul.f32 %v5004_v57, %v3991_v5  ;;  %v4003_v4 = vmul.f32 %v5006_v58, %v3995_v18  ;;  %v4346_v29 = vld [vmem:[#allocation6 + $0xd8] ss:$0 sm:$0xff] }
0x32a4   :  { %4006 = vperm.xlu0 %4808, %v4000_v63  }
0x32a8   :  { %4011 = vperm.xlu0 %4808, %v4001_v59  }
0x32ac   :  { %4016 = vperm.xlu0 %4808, %v4002_v16   ;;  %v4347_v16 = vld [vmem:[#allocation6 + $0x100] ss:$0 sm:$0xff] }
0x32b0   :  { %4021 = vperm.xlu0 %4808, %v4003_v4  }
0x331f   :  { %v4007_v33 = vpop.permute.xlu0 %4006 }
0x3320   :  { %v4024_v41 = vmul.f32 %v5037_v32, %v4007_v33 }
0x3322   :  { %v4028_v34 = vsel %vm88_vm1, %v4024_v41, 0.0 }
0x3323   :  { %v4029_v42 = vrot.slane %v4028_v34, 4  ;;  %v4012_v47 = vpop.permute.xlu0 %4011 }
0x3324   :  { %v4025_v35 = vmul.f32 %v5038_v11, %v4012_v47 }
0x3325   :  { %v4030_v23 = vadd.f32 %v4029_v42, %v4028_v34 }
0x3326   :  { %v4035_v26 = vsel %vm88_vm1, %v4025_v35, 0.0 }
0x3327   :  { %v4036_v14 = vrot.slane %v4035_v26, 4  ;;  %v4017_v28 = vpop.permute.xlu0 %4016  ;;  %v4031_v39 = vrot.slane %v4030_v23, 2 }
0x3328   :  { %v4026_v27 = vmul.f32 %v5039_v17, %v4017_v28 }
0x3329   :  { %v4037_v20 = vadd.f32 %v4036_v14, %v4035_v26  ;;  %v4032_v49 = vadd.f32 %v4031_v39, %v4030_v23 }
0x332a   :  { %v4042_v36 = vsel %vm88_vm1, %v4026_v27, 0.0 }
0x332b   :  { %v4038_v8 = vrot.slane %v4037_v20, 2  ;;  %v4043_v46 = vrot.slane %v4042_v36, 4  ;;  %v4022_v43 = vpop.permute.xlu0 %4021  ;;  %v4033_v45 = vrot.slane %v4032_v49, 1 }
0x332c   :  { %v4027_v44 = vmul.f32 %v5040_v25, %v4022_v43 }
0x332d   :  { %v4039_v19 = vadd.f32 %v4038_v8, %v4037_v20  ;;  %v4044_v48 = vadd.f32 %v4043_v46, %v4042_v36  ;;  %v4034_v58 = vadd.f32 %v4033_v45, %v4032_v49 }
0x332e   :  { %v4049_v24 = vsel %vm88_vm1, %v4027_v44, 0.0 }
0x332f   :  { %v4045_v55 = vrot.slane %v4044_v48, 2  ;;  %v4050_v31 = vrot.slane %v4049_v24, 4  ;;  %v4040_v1 = vrot.slane %v4039_v19, 1 }
0x3331   :  { %v4046_v60 = vadd.f32 %v4045_v55, %v4044_v48  ;;  %v4051_v9 = vadd.f32 %v4050_v31, %v4049_v24  ;;  %v4041_v13 = vadd.f32 %v4040_v1, %v4039_v19 }
0x3333   :  { %v4047_v54 = vrot.slane %v4046_v60, 1  ;;  %v4052_v2 = vrot.slane %v4051_v9, 2  ;;  %v4066_v38 = vsel %vm450_vm2, %v4041_v13, %v4034_v58 }
0x3335   :  { %v4053_v30 = vadd.f32 %v4052_v2, %v4051_v9  ;;  %v4048_v57 = vadd.f32 %v4047_v54, %v4046_v60 }
0x3337   :  { %v4054_v3 = vrot.slane %v4053_v30, 1  ;;  %v4067_v51 = vsel %vm452_vm3, %v4048_v57, %v4066_v38 }
0x3339   :  { %v4055_v50 = vadd.f32 %v4054_v3, %v4053_v30 }
0x333b   :  { %v4068_v56 = vsel %vm454_vm4, %v4055_v50, %v4067_v51 }
0x333c   :  { %4751 = vmatmul.mubr.msk.f32.vlgmr.msra.gmra.mxu0 %vm88_vm1, %v4068_v56 }
0x333d   :  { %4754 = vmatpush3.msra.mxu0 %v4059_v53  ;;  %4761 = vmatprep.mubr.msk.f32.mxu0 %vm5111_vm0, %v5110_v0 }
0x333e   :  { %4755 = vmatprep.subr.mxu0 %v5110_v0 }
0x333f   :  { %4756 = vmatpush3.msra.mxu0 %v4058_v7 }
0x3340   :  { %4757 = vmatprep.subr.mxu0 %v5110_v0 }
0x3341   :  { %4758 = vmatpush3.msra.mxu0 %v4057_v61 }
0x3342   :  { %4759 = vmatprep.subr.mxu0 %v5110_v0 }
0x3343   :  { %4760 = vmatpush3.msra.mxu0 %v4056_v52 }
0x3344   :  { %4762 = vmatmul.mubr.msk.f32.vlgmr.msra.gmra.mxu0 %vm206_vm6, %v6032_v6 }
0x33fc   :  { %v4137_v21 = vpop.f32.mrf.mxu0 }
0x33fe   :  { %v4752_v40 = vpop.f32.mrf.mxu0 }
0x3404   :  { %v4207_v63 = vpop.f32.mrf.mxu0 }
0x3405   :  { %v4208_v59 = vadd.f32 %v4207_v63, %v4137_v21 }
0x3406   :  { %v4763_v6 = vpop.f32.mrf.mxu0 }
0x3407   :  { %v4216_v5 = vadd.f32 %v4346_v29, %v4208_v59 }
0x3409   :  { %4773 = vmatmul.mubr.msk.f32.vlgmr.msra.gmra.mxu1 %vm206_vm6, %v4216_v5 }
0x34c9   :  { %v4295_v18 = vpop.f32.mrf.mxu1 }
0x34ca   :  { %v4296_v4 = vadd.f32 %v4347_v16, %v4295_v18 }
0x34cb   :  { %v4774_v37 = vpop.f32.mrf.mxu1 }
0x34cc   :  { %4300 = vst.msk [vmem:[%s6109_s3] sm:$0xf] %vm4299_vm7, %v4296_v4 }
0x34cd   :  { %4305 = vsyncpa [#allocation3], 1 }
0x34ce   :  { %4306 = vsyncpa [#allocation5], 1 }

</bundles_post_ra>
